<compile_context>
chip_gen: v7x
topology: tpu7x:2x2x1
jax: 0.10.0
libtpu: 0.0.40
codegen_flags: <defaults>
</compile_context>

<pallas_src>
import functools

import jax
import jax.numpy as jnp
import numpy as np
from jax.experimental import pallas as pl
from jax.experimental.pallas import tpu as pltpu


# ----------------------------- Pallas kernel --------------------------------

def _make_kernel(B, T, P, E, H, off_h, off_e, off_b):
    BH, BE, G = B * H, B * E, 3 * B * H

    def wh(ref, name):                      # slice from the (B*H)-row weight slab
        o, w = off_h[name]
        return ref[:, o:o + w]

    def we(ref, name):                      # slice from the (B*E)-row weight slab
        o, w = off_e[name]
        return ref[:, o:o + w]

    def bb(ref, name):                      # slice from the bias/vector slab
        o, w = off_b[name]
        return ref[:, o:o + w]

    def gru(gi, gh, h):
        # PyTorch GRU cell, gate order (r, z, n), everything lane-packed (1, B*H).
        r = jax.nn.sigmoid(gi[:, :BH] + gh[:, :BH])
        z = jax.nn.sigmoid(gi[:, BH:2 * BH] + gh[:, BH:2 * BH])
        n = jnp.tanh(gi[:, 2 * BH:] + r * gh[:, 2 * BH:])
        return (1.0 - z) * n + z * h

    def kernel(obs_ref, wemb_ref, slab_e_ref, slab_h_ref, bias_ref, pred_ref):
        dot = functools.partial(jnp.dot, preferred_element_type=jnp.float32)

        # -------------------------- encoder --------------------------
        # Hoisted, batched input projections: one matmul over all T packed rows.
        b_emb = bb(bias_ref, 'b_emb')
        emb_all = jnp.tanh(dot(obs_ref[...], wemb_ref[...]) + b_emb)           # (T, B*E)
        gi_all = dot(emb_all, we(slab_e_ref, 'w_ih_enc')) + bb(bias_ref, 'b_ih_enc')  # (T, 3BH)

        b_hh_enc = bb(bias_ref, 'b_hh_enc')
        # t == 0: h == 0  ->  gh is just the bias and z*h vanishes (skip the matmul).
        gi0 = gi_all[0:1, :]
        r0 = jax.nn.sigmoid(gi0[:, :BH] + b_hh_enc[:, :BH])
        z0 = jax.nn.sigmoid(gi0[:, BH:2 * BH] + b_hh_enc[:, BH:2 * BH])
        n0 = jnp.tanh(gi0[:, 2 * BH:] + r0 * b_hh_enc[:, 2 * BH:])
        h = (1.0 - z0) * n0                                                    # (1, B*H)

        encs = [h]
        w_hh_enc = wh(slab_h_ref, 'w_hh_enc')
        for t in range(1, T):                                                  # fully unrolled
            gh = dot(h, w_hh_enc) + b_hh_enc
            h = gru(gi_all[t:t + 1, :], gh, h)
            encs.append(h)
        enc = jnp.concatenate(encs, axis=0)                                    # (T, B*H), vregs only

        # Decoder-step-invariant attention projection, computed ONCE.
        e_e = dot(enc, wh(slab_h_ref, 'wa_e')) + bb(bias_ref, 'b_attn')        # (T, B*H)
        v_p = bb(bias_ref, 'v')                                                # (1, B*H)

        # -------------------------- decoder --------------------------
        w_dec_h = wh(slab_h_ref, 'dec_h_fused')     # (B*H, 3BH + BH + BE) fused h-weight
        w_dec_e = we(slab_e_ref, 'w_dec_e')
        w_dec_c = wh(slab_h_ref, 'w_dec_c')
        w_out = wh(slab_h_ref, 'w_out')
        b_hh_dec = bb(bias_ref, 'b_hh_dec')
        b_ih_dec = bb(bias_ref, 'b_ih_dec')
        b_oe = bb(bias_ref, 'b_oe')
        b_out = bb(bias_ref, 'b_out')

        preds = []
        for _ in range(P):                                                     # fully unrolled
            # One fused MXU call for every h-dependent projection of this step.
            fused = dot(h, w_dec_h)                                            # (1, 3BH+BH+BE)
            gh = fused[:, :G] + b_hh_dec
            e_h = fused[:, G:G + BH]
            emb = jnp.tanh(fused[:, G + BH:G + BH + BE] + b_oe)                # out2loc ∘ loc_embedding folded

            # Temporal attention, fully lane-packed (T, B*H).
            energy = jnp.tanh(e_h + e_e)                                       # broadcast over T sublanes
            wen = energy * v_p
            # Segmented lane reduce over H, broadcast back across each batch segment.
            scores = jnp.concatenate(
                [jnp.broadcast_to(
                    jnp.sum(wen[:, b * H:(b + 1) * H], axis=-1, keepdims=True), (T, H))
                 for b in range(B)], axis=1)                                   # (T, B*H)
            m = jnp.max(scores, axis=0, keepdims=True)
            ex = jnp.exp(scores - m)
            attn = ex * pl.reciprocal(jnp.sum(ex, axis=0, keepdims=True), approx=True)
            ctx = jnp.sum(attn * enc, axis=0, keepdims=True)                   # (1, B*H)

            gi = dot(emb, w_dec_e) + dot(ctx, w_dec_c) + b_ih_dec
            h = gru(gi, gh, h)
            preds.append(dot(h, w_out) + b_out)                                # off the carried chain

        pred_ref[...] = jnp.concatenate(preds, axis=0)                         # (P, B*2)

    return kernel


# ------------------------ host-side weight packing ---------------------------

def _pack_params(params, B):
    """Pre-transpose, fold, block-diagonalize (batch -> lanes) and slab-pack all weights."""
    H = int(params['w_hh_enc'].shape[1])
    E = int(params['w_emb'].shape[0])
    BH = B * H

    a = lambda x: np.asarray(x, np.float32)

    w_emb_t = a(params['w_emb']).T                # (2, E)
    w_ih_enc_t = a(params['w_ih_enc']).T          # (E, 3H)
    w_hh_enc_t = a(params['w_hh_enc']).T          # (H, 3H)
    w_attn = a(params['w_attn'])                  # (H, 2H)
    wa_h_t, wa_e_t = w_attn[:, :H].T, w_attn[:, H:].T
    w_ih_dec = a(params['w_ih_dec'])              # (3H, E+H)
    w_de_t, w_dc_t = w_ih_dec[:, :E].T, w_ih_dec[:, E:].T
    w_hh_dec_t = a(params['w_hh_dec']).T          # (H, 3H)
    w_out_t = a(params['w_out']).T                # (H, 2)
    b_emb, b_ih_enc, b_hh_enc = a(params['b_emb']), a(params['b_ih_enc']), a(params['b_hh_enc'])
    b_attn, v = a(params['b_attn']), a(params['v'])
    b_ih_dec, b_hh_dec, b_out = a(params['b_ih_dec']), a(params['b_hh_dec']), a(params['b_out'])

    # Fold out2loc into loc_embedding (no nonlinearity between them).
    w_oe_t = w_out_t @ w_emb_t                    # (H, E)
    b_oe = b_out @ w_emb_t + b_emb                # (1, E)

    def blkdiag(w):                               # (fi, fo) -> (B*fi, B*fo), batch-major lanes
        fi, fo = w.shape
        o = np.zeros((B * fi, B * fo), np.float32)
        for b in range(B):
            o[b * fi:(b + 1) * fi, b * fo:(b + 1) * fo] = w
        return o

    def gru_w(w):                                 # (fi, 3H) -> (B*fi, 3*B*H), gate-major cols
        fi = w.shape[0]
        o = np.zeros((B * fi, 3 * BH), np.float32)
        for b in range(B):
            for g in range(3):
                o[b * fi:(b + 1) * fi, g * BH + b * H:g * BH + (b + 1) * H] = w[:, g * H:(g + 1) * H]
        return o

    def gru_b(bias):                              # (1, 3H) -> (1, 3*B*H), gate-major cols
        return np.concatenate([np.tile(bias[:, g * H:(g + 1) * H], (1, B)) for g in range(3)], axis=1)

    tile_b = lambda x: np.tile(x, (1, B))

    def slab(parts):
        offs, cols, off = {}, [], 0
        for name, arr in parts:
            offs[name] = (off, arr.shape[1])
            off += arr.shape[1]
            cols.append(arr)
        return np.concatenate(cols, axis=1), offs

    # Fused decoder weight acting on h: [w_hh_dec | wa_h | out2loc∘loc_embedding].
    w_dec_h_fused = np.concatenate([gru_w(w_hh_dec_t), blkdiag(wa_h_t), blkdiag(w_oe_t)], axis=1)

    slab_h, off_h = slab([                        # everything consuming the (·, B*H) hidden / enc
        ('dec_h_fused', w_dec_h_fused),
        ('w_hh_enc', gru_w(w_hh_enc_t)),
        ('wa_e', blkdiag(wa_e_t)),
        ('w_dec_c', gru_w(w_dc_t)),
        ('w_out', blkdiag(w_out_t)),
    ])
    slab_e, off_e = slab([                        # everything consuming a (·, B*E) embedding
        ('w_ih_enc', gru_w(w_ih_enc_t)),
        ('w_dec_e', gru_w(w_de_t)),
    ])
    slab_b, off_b = slab([                        # all bias / vector rows
        ('b_emb', tile_b(b_emb)),
        ('b_ih_enc', gru_b(b_ih_enc)),
        ('b_hh_enc', gru_b(b_hh_enc)),
        ('b_attn', tile_b(b_attn)),
        ('v', tile_b(v)),
        ('b_ih_dec', gru_b(b_ih_dec)),
        ('b_hh_dec', gru_b(b_hh_dec)),
        ('b_oe', tile_b(b_oe)),
        ('b_out', tile_b(b_out)),
    ])
    w_emb_blk = blkdiag(w_emb_t)                  # (B*2, B*E)
    return (w_emb_blk, slab_e, slab_h, slab_b), (off_e, off_h, off_b), (E, H)


# ----------------------------- JAX wrapper -----------------------------------

def asubnet_forward(obs, params, pred_len):
    """obs: (B, T, F) batch-first float32. Returns (B, pred_len, 2)."""
    B, T, _ = obs.shape
    (w_emb_blk, slab_e, slab_h, slab_b), (off_e, off_h, off_b), (E, H) = _pack_params(params, B)

    # torch.index_select(obs, dim=2, [0,1]) with batch folded into lanes: row t, col b*2+f.
    obs_p = jnp.transpose(obs[:, :, :2], (1, 0, 2)).reshape(T, B * 2).astype(jnp.float32)

    kernel = _make_kernel(B, T, pred_len, E, H, off_h, off_e, off_b)
    vmem = pl.BlockSpec(memory_space=pltpu.MemorySpace.VMEM)
    pred_flat = pl.pallas_call(
        kernel,
        out_shape=jax.ShapeDtypeStruct((pred_len, B * 2), jnp.float32),
        in_specs=[vmem] * 5,
        out_specs=vmem,
    )(obs_p, w_emb_blk, slab_e, slab_h, slab_b)
    return pred_flat.reshape(pred_len, B, 2).transpose(1, 0, 2)   # (B, P, 2)


# --------------------- deterministic parameter init --------------------------

def init_params(key, embedding_dim, hidden_dim):
    E, H = embedding_dim, hidden_dim
    ks = jax.random.split(key, 8)

    def lin(k, out_f, in_f):
        bound = 1.0 / np.sqrt(in_f)
        kw, kb = jax.random.split(k)
        w = jax.random.uniform(kw, (out_f, in_f), jnp.float32, -bound, bound)
        b = jax.random.uniform(kb, (1, out_f), jnp.float32, -bound, bound)
        return w, b

    p = {}
    p['w_emb'], p['b_emb'] = lin(ks[0], E, 2)                  # loc_embedding
    p['w_ih_enc'], p['b_ih_enc'] = lin(ks[1], 3 * H, E)        # gru_loc
    p['w_hh_enc'], p['b_hh_enc'] = lin(ks[2], 3 * H, H)
    p['w_attn'], p['b_attn'] = lin(ks[3], H, 2 * H)            # Attention.attn
    p['v'] = jax.random.normal(ks[4], (1, H), jnp.float32) / np.sqrt(H)   # Attention.v
    p['w_ih_dec'], p['b_ih_dec'] = lin(ks[5], 3 * H, E + H)    # gru_loc_dec
    p['w_hh_dec'], p['b_hh_dec'] = lin(ks[6], 3 * H, H)
    p['w_out'], p['b_out'] = lin(ks[7], 2, H)                  # out2loc
    # loc_embedding_dec exists in __init__ but is never used in forward -> omitted.
    return p


# --------------------------- pure-JAX reference -------------------------------

def asubnet_reference(obs, p, pred_len):
    obs_loc = obs[:, :, :2].astype(jnp.float32)
    B, T, _ = obs_loc.shape
    H = p['w_hh_enc'].shape[1]

    def gru_cell(x, h, w_ih, w_hh, b_ih, b_hh):
        gi = x @ w_ih.T + b_ih
        gh = h @ w_hh.T + b_hh
        r = jax.nn.sigmoid(gi[:, :H] + gh[:, :H])
        z = jax.nn.sigmoid(gi[:, H:2 * H] + gh[:, H:2 * H])
        n = jnp.tanh(gi[:, 2 * H:] + r * gh[:, 2 * H:])
        return (1.0 - z) * n + z * h

    h = jnp.zeros((B, H), jnp.float32)
    encs = []
    for t in range(T):
        emb = jnp.tanh(obs_loc[:, t] @ p['w_emb'].T + p['b_emb'])
        h = gru_cell(emb, h, p['w_ih_enc'], p['w_hh_enc'], p['b_ih_enc'], p['b_hh_enc'])
        encs.append(h)
    enc = jnp.stack(encs, axis=1)                              # (B, T, H)
    out = h @ p['w_out'].T + p['b_out']

    preds = []
    v = p['v'][0]
    for _ in range(pred_len):
        emb = jnp.tanh(out @ p['w_emb'].T + p['b_emb'])
        h_rep = jnp.broadcast_to(h[None], (T, B, H))
        enc_t = jnp.transpose(enc, (1, 0, 2))
        energy = jnp.tanh(jnp.concatenate([h_rep, enc_t], axis=-1) @ p['w_attn'].T + p['b_attn'])
        scores = jnp.einsum('tbh,h->bt', energy, v)
        w = jax.nn.softmax(scores, axis=1)
        ctx = jnp.einsum('bt,bth->bh', w, enc)
        x_dec = jnp.concatenate([emb, ctx], axis=-1)
        h = gru_cell(x_dec, h, p['w_ih_dec'], p['w_hh_dec'], p['b_ih_dec'], p['b_hh_dec'])
        out = h @ p['w_out'].T + p['b_out']
        preds.append(out)
    return jnp.stack(preds, axis=1)                            # (B, P, 2)


# ----------------------------------- main -------------------------------------

if __name__ == "__main__":
    B, T, F_feat = 2, 8, 4        # batch, observed steps, obs features (only [0,1] used)
    E, H, PRED = 16, 32, 4        # embedding_dim, hidden_dim, pred_len

    key = jax.random.PRNGKey(0)
    k_obs, k_par = jax.random.split(key)
    obs = jax.random.normal(k_obs, (B, T, F_feat), jnp.float32)
    params = init_params(k_par, E, H)

    out = asubnet_forward(obs, params, PRED)
    out = jax.block_until_ready(out)
    assert out.shape == (B, PRED, 2)

    ref = asubnet_reference(obs, params, PRED)
    # 1e-3: the only deliberate deviation from exact f32 math is the approximate EUP
    # reciprocal in the attention-softmax denominator (~1e-4 relative); everything else
    # (block-diag packed matmuls, folded out2loc∘loc_embedding) is f32-exact.
    np.testing.assert_allclose(np.asarray(out), np.asarray(ref), rtol=1e-3, atol=1e-3)

    print("KERNEL_OK")
</pallas_src>

<mosaic_0001>
module attributes {stable_mosaic.version = 11 : i64} {
  func.func @kernel(%arg0: memref<8x4xf32, #tpu.memory_space<vmem>>, %arg1: memref<4x32xf32, #tpu.memory_space<vmem>>, %arg2: memref<32x384xf32, #tpu.memory_space<vmem>>, %arg3: memref<64x740xf32, #tpu.memory_space<vmem>>, %arg4: memref<1x964xf32, #tpu.memory_space<vmem>>, %arg5: memref<4x4xf32, #tpu.memory_space<vmem>>) attributes {dimension_semantics = [], scalar_prefetch = 0 : i64, scratch_operands = 0 : i64, tpu.core_type = #tpu.core_type<tc>} {
    %c0 = arith.constant 0 : index
    %c0_0 = arith.constant 0 : index
    %0 = vector.load %arg4[%c0, %c0_0] : memref<1x964xf32, #tpu.memory_space<vmem>>, vector<1x32xf32>
    %c0_1 = arith.constant 0 : index
    %c0_2 = arith.constant 0 : index
    %1 = vector.load %arg0[%c0_1, %c0_2] : memref<8x4xf32, #tpu.memory_space<vmem>>, vector<8x4xf32>
    %c0_3 = arith.constant 0 : index
    %c0_4 = arith.constant 0 : index
    %2 = vector.load %arg1[%c0_3, %c0_4] : memref<4x32xf32, #tpu.memory_space<vmem>>, vector<4x32xf32>
    %cst = arith.constant dense<0.000000e+00> : vector<8x32xf32>
    %3 = tpu.matmul %1, %2, %cst {dimension_numbers = #tpu.dot_dimension_numbers<[1], [0], [0], [1], [0, 0, 1, 1], [], []>} : vector<8x4xf32>, vector<4x32xf32>, vector<8x32xf32> -> vector<8x32xf32>
    %4 = vector.broadcast %0 : vector<1x32xf32> to vector<8x32xf32>
    %5 = arith.addf %3, %4 : vector<8x32xf32>
    %6 = math.tanh %5 : vector<8x32xf32>
    %c0_5 = arith.constant 0 : index
    %c0_6 = arith.constant 0 : index
    %7 = vector.load %arg2[%c0_5, %c0_6] : memref<32x384xf32, #tpu.memory_space<vmem>>, vector<32x192xf32>
    %cst_7 = arith.constant dense<0.000000e+00> : vector<8x192xf32>
    %8 = tpu.matmul %6, %7, %cst_7 {dimension_numbers = #tpu.dot_dimension_numbers<[1], [0], [0], [1], [0, 0, 1, 1], [], []>} : vector<8x32xf32>, vector<32x192xf32>, vector<8x192xf32> -> vector<8x192xf32>
    %c0_8 = arith.constant 0 : index
    %c32 = arith.constant 32 : index
    %9 = vector.load %arg4[%c0_8, %c32] : memref<1x964xf32, #tpu.memory_space<vmem>>, vector<1x192xf32>
    %10 = vector.broadcast %9 : vector<1x192xf32> to vector<8x192xf32>
    %11 = arith.addf %8, %10 : vector<8x192xf32>
    %c0_9 = arith.constant 0 : index
    %c224 = arith.constant 224 : index
    %12 = vector.load %arg4[%c0_9, %c224] : memref<1x964xf32, #tpu.memory_space<vmem>>, vector<1x192xf32>
    %13 = vector.extract_strided_slice %11 {offsets = [0, 0], sizes = [1, 192], strides = [1, 1]} : vector<8x192xf32> to vector<1x192xf32>
    %14 = vector.extract_strided_slice %13 {offsets = [0, 0], sizes = [1, 64], strides = [1, 1]} : vector<1x192xf32> to vector<1x64xf32>
    %15 = vector.extract_strided_slice %12 {offsets = [0, 0], sizes = [1, 64], strides = [1, 1]} : vector<1x192xf32> to vector<1x64xf32>
    %16 = arith.addf %14, %15 : vector<1x64xf32>
    %17 = arith.negf %16 : vector<1x64xf32>
    %18 = math.exp %17 : vector<1x64xf32>
    %cst_10 = arith.constant 1.000000e+00 : f32
    %19 = vector.broadcast %cst_10 : f32 to vector<1x64xf32>
    %20 = arith.addf %19, %18 : vector<1x64xf32>
    %21 = arith.divf %19, %20 : vector<1x64xf32>
    %22 = vector.extract_strided_slice %13 {offsets = [0, 64], sizes = [1, 64], strides = [1, 1]} : vector<1x192xf32> to vector<1x64xf32>
    %23 = vector.extract_strided_slice %12 {offsets = [0, 64], sizes = [1, 64], strides = [1, 1]} : vector<1x192xf32> to vector<1x64xf32>
    %24 = arith.addf %22, %23 : vector<1x64xf32>
    %25 = arith.negf %24 : vector<1x64xf32>
    %26 = math.exp %25 : vector<1x64xf32>
    %cst_11 = arith.constant 1.000000e+00 : f32
    %27 = vector.broadcast %cst_11 : f32 to vector<1x64xf32>
    %28 = arith.addf %27, %26 : vector<1x64xf32>
    %29 = arith.divf %27, %28 : vector<1x64xf32>
    %30 = vector.extract_strided_slice %13 {offsets = [0, 128], sizes = [1, 64], strides = [1, 1]} : vector<1x192xf32> to vector<1x64xf32>
    %31 = vector.extract_strided_slice %12 {offsets = [0, 128], sizes = [1, 64], strides = [1, 1]} : vector<1x192xf32> to vector<1x64xf32>
    %32 = arith.mulf %21, %31 : vector<1x64xf32>
    %33 = arith.addf %30, %32 : vector<1x64xf32>
    %34 = math.tanh %33 : vector<1x64xf32>
    %cst_12 = arith.constant 1.000000e+00 : f32
    %35 = vector.broadcast %cst_12 : f32 to vector<1x64xf32>
    %36 = arith.subf %35, %29 : vector<1x64xf32>
    %37 = arith.mulf %36, %34 : vector<1x64xf32>
    %c0_13 = arith.constant 0 : index
    %c288 = arith.constant 288 : index
    %38 = vector.load %arg3[%c0_13, %c288] : memref<64x740xf32, #tpu.memory_space<vmem>>, vector<64x192xf32>
    %cst_14 = arith.constant dense<0.000000e+00> : vector<1x192xf32>
    %39 = tpu.matmul %37, %38, %cst_14 {dimension_numbers = #tpu.dot_dimension_numbers<[1], [0], [0], [1], [0, 0, 1, 1], [], []>} : vector<1x64xf32>, vector<64x192xf32>, vector<1x192xf32> -> vector<1x192xf32>
    %40 = arith.addf %39, %12 : vector<1x192xf32>
    %41 = vector.extract_strided_slice %11 {offsets = [1, 0], sizes = [1, 192], strides = [1, 1]} : vector<8x192xf32> to vector<1x192xf32>
    %42 = vector.extract_strided_slice %41 {offsets = [0, 0], sizes = [1, 64], strides = [1, 1]} : vector<1x192xf32> to vector<1x64xf32>
    %43 = vector.extract_strided_slice %40 {offsets = [0, 0], sizes = [1, 64], strides = [1, 1]} : vector<1x192xf32> to vector<1x64xf32>
    %44 = arith.addf %42, %43 : vector<1x64xf32>
    %45 = arith.negf %44 : vector<1x64xf32>
    %46 = math.exp %45 : vector<1x64xf32>
    %cst_15 = arith.constant 1.000000e+00 : f32
    %47 = vector.broadcast %cst_15 : f32 to vector<1x64xf32>
    %48 = arith.addf %47, %46 : vector<1x64xf32>
    %49 = arith.divf %47, %48 : vector<1x64xf32>
    %50 = vector.extract_strided_slice %41 {offsets = [0, 64], sizes = [1, 64], strides = [1, 1]} : vector<1x192xf32> to vector<1x64xf32>
    %51 = vector.extract_strided_slice %40 {offsets = [0, 64], sizes = [1, 64], strides = [1, 1]} : vector<1x192xf32> to vector<1x64xf32>
    %52 = arith.addf %50, %51 : vector<1x64xf32>
    %53 = arith.negf %52 : vector<1x64xf32>
    %54 = math.exp %53 : vector<1x64xf32>
    %cst_16 = arith.constant 1.000000e+00 : f32
    %55 = vector.broadcast %cst_16 : f32 to vector<1x64xf32>
    %56 = arith.addf %55, %54 : vector<1x64xf32>
    %57 = arith.divf %55, %56 : vector<1x64xf32>
    %58 = vector.extract_strided_slice %41 {offsets = [0, 128], sizes = [1, 64], strides = [1, 1]} : vector<1x192xf32> to vector<1x64xf32>
    %59 = vector.extract_strided_slice %40 {offsets = [0, 128], sizes = [1, 64], strides = [1, 1]} : vector<1x192xf32> to vector<1x64xf32>
    %60 = arith.mulf %49, %59 : vector<1x64xf32>
    %61 = arith.addf %58, %60 : vector<1x64xf32>
    %62 = math.tanh %61 : vector<1x64xf32>
    %cst_17 = arith.constant 1.000000e+00 : f32
    %63 = vector.broadcast %cst_17 : f32 to vector<1x64xf32>
    %64 = arith.subf %63, %57 : vector<1x64xf32>
    %65 = arith.mulf %64, %62 : vector<1x64xf32>
    %66 = arith.mulf %57, %37 : vector<1x64xf32>
    %67 = arith.addf %65, %66 : vector<1x64xf32>
    %cst_18 = arith.constant dense<0.000000e+00> : vector<1x192xf32>
    %68 = tpu.matmul %67, %38, %cst_18 {dimension_numbers = #tpu.dot_dimension_numbers<[1], [0], [0], [1], [0, 0, 1, 1], [], []>} : vector<1x64xf32>, vector<64x192xf32>, vector<1x192xf32> -> vector<1x192xf32>
    %69 = arith.addf %68, %12 : vector<1x192xf32>
    %70 = vector.extract_strided_slice %11 {offsets = [2, 0], sizes = [1, 192], strides = [1, 1]} : vector<8x192xf32> to vector<1x192xf32>
    %71 = vector.extract_strided_slice %70 {offsets = [0, 0], sizes = [1, 64], strides = [1, 1]} : vector<1x192xf32> to vector<1x64xf32>
    %72 = vector.extract_strided_slice %69 {offsets = [0, 0], sizes = [1, 64], strides = [1, 1]} : vector<1x192xf32> to vector<1x64xf32>
    %73 = arith.addf %71, %72 : vector<1x64xf32>
    %74 = arith.negf %73 : vector<1x64xf32>
    %75 = math.exp %74 : vector<1x64xf32>
    %cst_19 = arith.constant 1.000000e+00 : f32
    %76 = vector.broadcast %cst_19 : f32 to vector<1x64xf32>
    %77 = arith.addf %76, %75 : vector<1x64xf32>
    %78 = arith.divf %76, %77 : vector<1x64xf32>
    %79 = vector.extract_strided_slice %70 {offsets = [0, 64], sizes = [1, 64], strides = [1, 1]} : vector<1x192xf32> to vector<1x64xf32>
    %80 = vector.extract_strided_slice %69 {offsets = [0, 64], sizes = [1, 64], strides = [1, 1]} : vector<1x192xf32> to vector<1x64xf32>
    %81 = arith.addf %79, %80 : vector<1x64xf32>
    %82 = arith.negf %81 : vector<1x64xf32>
    %83 = math.exp %82 : vector<1x64xf32>
    %cst_20 = arith.constant 1.000000e+00 : f32
    %84 = vector.broadcast %cst_20 : f32 to vector<1x64xf32>
    %85 = arith.addf %84, %83 : vector<1x64xf32>
    %86 = arith.divf %84, %85 : vector<1x64xf32>
    %87 = vector.extract_strided_slice %70 {offsets = [0, 128], sizes = [1, 64], strides = [1, 1]} : vector<1x192xf32> to vector<1x64xf32>
    %88 = vector.extract_strided_slice %69 {offsets = [0, 128], sizes = [1, 64], strides = [1, 1]} : vector<1x192xf32> to vector<1x64xf32>
    %89 = arith.mulf %78, %88 : vector<1x64xf32>
    %90 = arith.addf %87, %89 : vector<1x64xf32>
    %91 = math.tanh %90 : vector<1x64xf32>
    %cst_21 = arith.constant 1.000000e+00 : f32
    %92 = vector.broadcast %cst_21 : f32 to vector<1x64xf32>
    %93 = arith.subf %92, %86 : vector<1x64xf32>
    %94 = arith.mulf %93, %91 : vector<1x64xf32>
    %95 = arith.mulf %86, %67 : vector<1x64xf32>
    %96 = arith.addf %94, %95 : vector<1x64xf32>
    %cst_22 = arith.constant dense<0.000000e+00> : vector<1x192xf32>
    %97 = tpu.matmul %96, %38, %cst_22 {dimension_numbers = #tpu.dot_dimension_numbers<[1], [0], [0], [1], [0, 0, 1, 1], [], []>} : vector<1x64xf32>, vector<64x192xf32>, vector<1x192xf32> -> vector<1x192xf32>
    %98 = arith.addf %97, %12 : vector<1x192xf32>
    %99 = vector.extract_strided_slice %11 {offsets = [3, 0], sizes = [1, 192], strides = [1, 1]} : vector<8x192xf32> to vector<1x192xf32>
    %100 = vector.extract_strided_slice %99 {offsets = [0, 0], sizes = [1, 64], strides = [1, 1]} : vector<1x192xf32> to vector<1x64xf32>
    %101 = vector.extract_strided_slice %98 {offsets = [0, 0], sizes = [1, 64], strides = [1, 1]} : vector<1x192xf32> to vector<1x64xf32>
    %102 = arith.addf %100, %101 : vector<1x64xf32>
    %103 = arith.negf %102 : vector<1x64xf32>
    %104 = math.exp %103 : vector<1x64xf32>
    %cst_23 = arith.constant 1.000000e+00 : f32
    %105 = vector.broadcast %cst_23 : f32 to vector<1x64xf32>
    %106 = arith.addf %105, %104 : vector<1x64xf32>
    %107 = arith.divf %105, %106 : vector<1x64xf32>
    %108 = vector.extract_strided_slice %99 {offsets = [0, 64], sizes = [1, 64], strides = [1, 1]} : vector<1x192xf32> to vector<1x64xf32>
    %109 = vector.extract_strided_slice %98 {offsets = [0, 64], sizes = [1, 64], strides = [1, 1]} : vector<1x192xf32> to vector<1x64xf32>
    %110 = arith.addf %108, %109 : vector<1x64xf32>
    %111 = arith.negf %110 : vector<1x64xf32>
    %112 = math.exp %111 : vector<1x64xf32>
    %cst_24 = arith.constant 1.000000e+00 : f32
    %113 = vector.broadcast %cst_24 : f32 to vector<1x64xf32>
    %114 = arith.addf %113, %112 : vector<1x64xf32>
    %115 = arith.divf %113, %114 : vector<1x64xf32>
    %116 = vector.extract_strided_slice %99 {offsets = [0, 128], sizes = [1, 64], strides = [1, 1]} : vector<1x192xf32> to vector<1x64xf32>
    %117 = vector.extract_strided_slice %98 {offsets = [0, 128], sizes = [1, 64], strides = [1, 1]} : vector<1x192xf32> to vector<1x64xf32>
    %118 = arith.mulf %107, %117 : vector<1x64xf32>
    %119 = arith.addf %116, %118 : vector<1x64xf32>
    %120 = math.tanh %119 : vector<1x64xf32>
    %cst_25 = arith.constant 1.000000e+00 : f32
    %121 = vector.broadcast %cst_25 : f32 to vector<1x64xf32>
    %122 = arith.subf %121, %115 : vector<1x64xf32>
    %123 = arith.mulf %122, %120 : vector<1x64xf32>
    %124 = arith.mulf %115, %96 : vector<1x64xf32>
    %125 = arith.addf %123, %124 : vector<1x64xf32>
    %cst_26 = arith.constant dense<0.000000e+00> : vector<1x192xf32>
    %126 = tpu.matmul %125, %38, %cst_26 {dimension_numbers = #tpu.dot_dimension_numbers<[1], [0], [0], [1], [0, 0, 1, 1], [], []>} : vector<1x64xf32>, vector<64x192xf32>, vector<1x192xf32> -> vector<1x192xf32>
    %127 = arith.addf %126, %12 : vector<1x192xf32>
    %128 = vector.extract_strided_slice %11 {offsets = [4, 0], sizes = [1, 192], strides = [1, 1]} : vector<8x192xf32> to vector<1x192xf32>
    %129 = vector.extract_strided_slice %128 {offsets = [0, 0], sizes = [1, 64], strides = [1, 1]} : vector<1x192xf32> to vector<1x64xf32>
    %130 = vector.extract_strided_slice %127 {offsets = [0, 0], sizes = [1, 64], strides = [1, 1]} : vector<1x192xf32> to vector<1x64xf32>
    %131 = arith.addf %129, %130 : vector<1x64xf32>
    %132 = arith.negf %131 : vector<1x64xf32>
    %133 = math.exp %132 : vector<1x64xf32>
    %cst_27 = arith.constant 1.000000e+00 : f32
    %134 = vector.broadcast %cst_27 : f32 to vector<1x64xf32>
    %135 = arith.addf %134, %133 : vector<1x64xf32>
    %136 = arith.divf %134, %135 : vector<1x64xf32>
    %137 = vector.extract_strided_slice %128 {offsets = [0, 64], sizes = [1, 64], strides = [1, 1]} : vector<1x192xf32> to vector<1x64xf32>
    %138 = vector.extract_strided_slice %127 {offsets = [0, 64], sizes = [1, 64], strides = [1, 1]} : vector<1x192xf32> to vector<1x64xf32>
    %139 = arith.addf %137, %138 : vector<1x64xf32>
    %140 = arith.negf %139 : vector<1x64xf32>
    %141 = math.exp %140 : vector<1x64xf32>
    %cst_28 = arith.constant 1.000000e+00 : f32
    %142 = vector.broadcast %cst_28 : f32 to vector<1x64xf32>
    %143 = arith.addf %142, %141 : vector<1x64xf32>
    %144 = arith.divf %142, %143 : vector<1x64xf32>
    %145 = vector.extract_strided_slice %128 {offsets = [0, 128], sizes = [1, 64], strides = [1, 1]} : vector<1x192xf32> to vector<1x64xf32>
    %146 = vector.extract_strided_slice %127 {offsets = [0, 128], sizes = [1, 64], strides = [1, 1]} : vector<1x192xf32> to vector<1x64xf32>
    %147 = arith.mulf %136, %146 : vector<1x64xf32>
    %148 = arith.addf %145, %147 : vector<1x64xf32>
    %149 = math.tanh %148 : vector<1x64xf32>
    %cst_29 = arith.constant 1.000000e+00 : f32
    %150 = vector.broadcast %cst_29 : f32 to vector<1x64xf32>
    %151 = arith.subf %150, %144 : vector<1x64xf32>
    %152 = arith.mulf %151, %149 : vector<1x64xf32>
    %153 = arith.mulf %144, %125 : vector<1x64xf32>
    %154 = arith.addf %152, %153 : vector<1x64xf32>
    %cst_30 = arith.constant dense<0.000000e+00> : vector<1x192xf32>
    %155 = tpu.matmul %154, %38, %cst_30 {dimension_numbers = #tpu.dot_dimension_numbers<[1], [0], [0], [1], [0, 0, 1, 1], [], []>} : vector<1x64xf32>, vector<64x192xf32>, vector<1x192xf32> -> vector<1x192xf32>
    %156 = arith.addf %155, %12 : vector<1x192xf32>
    %157 = vector.extract_strided_slice %11 {offsets = [5, 0], sizes = [1, 192], strides = [1, 1]} : vector<8x192xf32> to vector<1x192xf32>
    %158 = vector.extract_strided_slice %157 {offsets = [0, 0], sizes = [1, 64], strides = [1, 1]} : vector<1x192xf32> to vector<1x64xf32>
    %159 = vector.extract_strided_slice %156 {offsets = [0, 0], sizes = [1, 64], strides = [1, 1]} : vector<1x192xf32> to vector<1x64xf32>
    %160 = arith.addf %158, %159 : vector<1x64xf32>
    %161 = arith.negf %160 : vector<1x64xf32>
    %162 = math.exp %161 : vector<1x64xf32>
    %cst_31 = arith.constant 1.000000e+00 : f32
    %163 = vector.broadcast %cst_31 : f32 to vector<1x64xf32>
    %164 = arith.addf %163, %162 : vector<1x64xf32>
    %165 = arith.divf %163, %164 : vector<1x64xf32>
    %166 = vector.extract_strided_slice %157 {offsets = [0, 64], sizes = [1, 64], strides = [1, 1]} : vector<1x192xf32> to vector<1x64xf32>
    %167 = vector.extract_strided_slice %156 {offsets = [0, 64], sizes = [1, 64], strides = [1, 1]} : vector<1x192xf32> to vector<1x64xf32>
    %168 = arith.addf %166, %167 : vector<1x64xf32>
    %169 = arith.negf %168 : vector<1x64xf32>
    %170 = math.exp %169 : vector<1x64xf32>
    %cst_32 = arith.constant 1.000000e+00 : f32
    %171 = vector.broadcast %cst_32 : f32 to vector<1x64xf32>
    %172 = arith.addf %171, %170 : vector<1x64xf32>
    %173 = arith.divf %171, %172 : vector<1x64xf32>
    %174 = vector.extract_strided_slice %157 {offsets = [0, 128], sizes = [1, 64], strides = [1, 1]} : vector<1x192xf32> to vector<1x64xf32>
    %175 = vector.extract_strided_slice %156 {offsets = [0, 128], sizes = [1, 64], strides = [1, 1]} : vector<1x192xf32> to vector<1x64xf32>
    %176 = arith.mulf %165, %175 : vector<1x64xf32>
    %177 = arith.addf %174, %176 : vector<1x64xf32>
    %178 = math.tanh %177 : vector<1x64xf32>
    %cst_33 = arith.constant 1.000000e+00 : f32
    %179 = vector.broadcast %cst_33 : f32 to vector<1x64xf32>
    %180 = arith.subf %179, %173 : vector<1x64xf32>
    %181 = arith.mulf %180, %178 : vector<1x64xf32>
    %182 = arith.mulf %173, %154 : vector<1x64xf32>
    %183 = arith.addf %181, %182 : vector<1x64xf32>
    %cst_34 = arith.constant dense<0.000000e+00> : vector<1x192xf32>
    %184 = tpu.matmul %183, %38, %cst_34 {dimension_numbers = #tpu.dot_dimension_numbers<[1], [0], [0], [1], [0, 0, 1, 1], [], []>} : vector<1x64xf32>, vector<64x192xf32>, vector<1x192xf32> -> vector<1x192xf32>
    %185 = arith.addf %184, %12 : vector<1x192xf32>
    %186 = vector.extract_strided_slice %11 {offsets = [6, 0], sizes = [1, 192], strides = [1, 1]} : vector<8x192xf32> to vector<1x192xf32>
    %187 = vector.extract_strided_slice %186 {offsets = [0, 0], sizes = [1, 64], strides = [1, 1]} : vector<1x192xf32> to vector<1x64xf32>
    %188 = vector.extract_strided_slice %185 {offsets = [0, 0], sizes = [1, 64], strides = [1, 1]} : vector<1x192xf32> to vector<1x64xf32>
    %189 = arith.addf %187, %188 : vector<1x64xf32>
    %190 = arith.negf %189 : vector<1x64xf32>
    %191 = math.exp %190 : vector<1x64xf32>
    %cst_35 = arith.constant 1.000000e+00 : f32
    %192 = vector.broadcast %cst_35 : f32 to vector<1x64xf32>
    %193 = arith.addf %192, %191 : vector<1x64xf32>
    %194 = arith.divf %192, %193 : vector<1x64xf32>
    %195 = vector.extract_strided_slice %186 {offsets = [0, 64], sizes = [1, 64], strides = [1, 1]} : vector<1x192xf32> to vector<1x64xf32>
    %196 = vector.extract_strided_slice %185 {offsets = [0, 64], sizes = [1, 64], strides = [1, 1]} : vector<1x192xf32> to vector<1x64xf32>
    %197 = arith.addf %195, %196 : vector<1x64xf32>
    %198 = arith.negf %197 : vector<1x64xf32>
    %199 = math.exp %198 : vector<1x64xf32>
    %cst_36 = arith.constant 1.000000e+00 : f32
    %200 = vector.broadcast %cst_36 : f32 to vector<1x64xf32>
    %201 = arith.addf %200, %199 : vector<1x64xf32>
    %202 = arith.divf %200, %201 : vector<1x64xf32>
    %203 = vector.extract_strided_slice %186 {offsets = [0, 128], sizes = [1, 64], strides = [1, 1]} : vector<1x192xf32> to vector<1x64xf32>
    %204 = vector.extract_strided_slice %185 {offsets = [0, 128], sizes = [1, 64], strides = [1, 1]} : vector<1x192xf32> to vector<1x64xf32>
    %205 = arith.mulf %194, %204 : vector<1x64xf32>
    %206 = arith.addf %203, %205 : vector<1x64xf32>
    %207 = math.tanh %206 : vector<1x64xf32>
    %cst_37 = arith.constant 1.000000e+00 : f32
    %208 = vector.broadcast %cst_37 : f32 to vector<1x64xf32>
    %209 = arith.subf %208, %202 : vector<1x64xf32>
    %210 = arith.mulf %209, %207 : vector<1x64xf32>
    %211 = arith.mulf %202, %183 : vector<1x64xf32>
    %212 = arith.addf %210, %211 : vector<1x64xf32>
    %cst_38 = arith.constant dense<0.000000e+00> : vector<1x192xf32>
    %213 = tpu.matmul %212, %38, %cst_38 {dimension_numbers = #tpu.dot_dimension_numbers<[1], [0], [0], [1], [0, 0, 1, 1], [], []>} : vector<1x64xf32>, vector<64x192xf32>, vector<1x192xf32> -> vector<1x192xf32>
    %214 = arith.addf %213, %12 : vector<1x192xf32>
    %215 = vector.extract_strided_slice %11 {offsets = [7, 0], sizes = [1, 192], strides = [1, 1]} : vector<8x192xf32> to vector<1x192xf32>
    %216 = vector.extract_strided_slice %215 {offsets = [0, 0], sizes = [1, 64], strides = [1, 1]} : vector<1x192xf32> to vector<1x64xf32>
    %217 = vector.extract_strided_slice %214 {offsets = [0, 0], sizes = [1, 64], strides = [1, 1]} : vector<1x192xf32> to vector<1x64xf32>
    %218 = arith.addf %216, %217 : vector<1x64xf32>
    %219 = arith.negf %218 : vector<1x64xf32>
    %220 = math.exp %219 : vector<1x64xf32>
    %cst_39 = arith.constant 1.000000e+00 : f32
    %221 = vector.broadcast %cst_39 : f32 to vector<1x64xf32>
    %222 = arith.addf %221, %220 : vector<1x64xf32>
    %223 = arith.divf %221, %222 : vector<1x64xf32>
    %224 = vector.extract_strided_slice %215 {offsets = [0, 64], sizes = [1, 64], strides = [1, 1]} : vector<1x192xf32> to vector<1x64xf32>
    %225 = vector.extract_strided_slice %214 {offsets = [0, 64], sizes = [1, 64], strides = [1, 1]} : vector<1x192xf32> to vector<1x64xf32>
    %226 = arith.addf %224, %225 : vector<1x64xf32>
    %227 = arith.negf %226 : vector<1x64xf32>
    %228 = math.exp %227 : vector<1x64xf32>
    %cst_40 = arith.constant 1.000000e+00 : f32
    %229 = vector.broadcast %cst_40 : f32 to vector<1x64xf32>
    %230 = arith.addf %229, %228 : vector<1x64xf32>
    %231 = arith.divf %229, %230 : vector<1x64xf32>
    %232 = vector.extract_strided_slice %215 {offsets = [0, 128], sizes = [1, 64], strides = [1, 1]} : vector<1x192xf32> to vector<1x64xf32>
    %233 = vector.extract_strided_slice %214 {offsets = [0, 128], sizes = [1, 64], strides = [1, 1]} : vector<1x192xf32> to vector<1x64xf32>
    %234 = arith.mulf %223, %233 : vector<1x64xf32>
    %235 = arith.addf %232, %234 : vector<1x64xf32>
    %236 = math.tanh %235 : vector<1x64xf32>
    %cst_41 = arith.constant 1.000000e+00 : f32
    %237 = vector.broadcast %cst_41 : f32 to vector<1x64xf32>
    %238 = arith.subf %237, %231 : vector<1x64xf32>
    %239 = arith.mulf %238, %236 : vector<1x64xf32>
    %240 = arith.mulf %231, %212 : vector<1x64xf32>
    %241 = arith.addf %239, %240 : vector<1x64xf32>
    %242 = tpu.concatenate %37, %67, %96, %125, %154, %183, %212, %241 in 0 : vector<1x64xf32>, vector<1x64xf32>, vector<1x64xf32>, vector<1x64xf32>, vector<1x64xf32>, vector<1x64xf32>, vector<1x64xf32>, vector<1x64xf32> -> vector<8x64xf32>
    %c0_42 = arith.constant 0 : index
    %c480 = arith.constant 480 : index
    %243 = vector.load %arg3[%c0_42, %c480] : memref<64x740xf32, #tpu.memory_space<vmem>>, vector<64x64xf32>
    %cst_43 = arith.constant dense<0.000000e+00> : vector<8x64xf32>
    %244 = tpu.matmul %242, %243, %cst_43 {dimension_numbers = #tpu.dot_dimension_numbers<[1], [0], [0], [1], [0, 0, 1, 1], [], []>} : vector<8x64xf32>, vector<64x64xf32>, vector<8x64xf32> -> vector<8x64xf32>
    %c0_44 = arith.constant 0 : index
    %c416 = arith.constant 416 : index
    %245 = vector.load %arg4[%c0_44, %c416] : memref<1x964xf32, #tpu.memory_space<vmem>>, vector<1x64xf32>
    %246 = vector.broadcast %245 : vector<1x64xf32> to vector<8x64xf32>
    %247 = arith.addf %244, %246 : vector<8x64xf32>
    %c0_45 = arith.constant 0 : index
    %c480_46 = arith.constant 480 : index
    %248 = vector.load %arg4[%c0_45, %c480_46] : memref<1x964xf32, #tpu.memory_space<vmem>>, vector<1x64xf32>
    %c0_47 = arith.constant 0 : index
    %c0_48 = arith.constant 0 : index
    %249 = vector.load %arg3[%c0_47, %c0_48] : memref<64x740xf32, #tpu.memory_space<vmem>>, vector<64x288xf32>
    %c0_49 = arith.constant 0 : index
    %c192 = arith.constant 192 : index
    %250 = vector.load %arg2[%c0_49, %c192] : memref<32x384xf32, #tpu.memory_space<vmem>>, vector<32x192xf32>
    %c0_50 = arith.constant 0 : index
    %c544 = arith.constant 544 : index
    %251 = vector.load %arg3[%c0_50, %c544] : memref<64x740xf32, #tpu.memory_space<vmem>>, vector<64x192xf32>
    %c0_51 = arith.constant 0 : index
    %c736 = arith.constant 736 : index
    %252 = vector.load %arg3[%c0_51, %c736] : memref<64x740xf32, #tpu.memory_space<vmem>>, vector<64x4xf32>
    %c0_52 = arith.constant 0 : index
    %c736_53 = arith.constant 736 : index
    %253 = vector.load %arg4[%c0_52, %c736_53] : memref<1x964xf32, #tpu.memory_space<vmem>>, vector<1x192xf32>
    %c0_54 = arith.constant 0 : index
    %c544_55 = arith.constant 544 : index
    %254 = vector.load %arg4[%c0_54, %c544_55] : memref<1x964xf32, #tpu.memory_space<vmem>>, vector<1x192xf32>
    %c0_56 = arith.constant 0 : index
    %c928 = arith.constant 928 : index
    %255 = vector.load %arg4[%c0_56, %c928] : memref<1x964xf32, #tpu.memory_space<vmem>>, vector<1x32xf32>
    %c0_57 = arith.constant 0 : index
    %c960 = arith.constant 960 : index
    %256 = vector.load %arg4[%c0_57, %c960] : memref<1x964xf32, #tpu.memory_space<vmem>>, vector<1x4xf32>
    %cst_58 = arith.constant dense<0.000000e+00> : vector<1x288xf32>
    %257 = tpu.matmul %241, %249, %cst_58 {dimension_numbers = #tpu.dot_dimension_numbers<[1], [0], [0], [1], [0, 0, 1, 1], [], []>} : vector<1x64xf32>, vector<64x288xf32>, vector<1x288xf32> -> vector<1x288xf32>
    %258 = vector.extract_strided_slice %257 {offsets = [0, 0], sizes = [1, 192], strides = [1, 1]} : vector<1x288xf32> to vector<1x192xf32>
    %259 = arith.addf %258, %253 : vector<1x192xf32>
    %260 = vector.extract_strided_slice %257 {offsets = [0, 192], sizes = [1, 64], strides = [1, 1]} : vector<1x288xf32> to vector<1x64xf32>
    %261 = vector.extract_strided_slice %257 {offsets = [0, 256], sizes = [1, 32], strides = [1, 1]} : vector<1x288xf32> to vector<1x32xf32>
    %262 = arith.addf %261, %255 : vector<1x32xf32>
    %263 = math.tanh %262 : vector<1x32xf32>
    %264 = vector.broadcast %260 : vector<1x64xf32> to vector<8x64xf32>
    %265 = arith.addf %264, %247 : vector<8x64xf32>
    %266 = math.tanh %265 : vector<8x64xf32>
    %267 = vector.broadcast %248 : vector<1x64xf32> to vector<8x64xf32>
    %268 = arith.mulf %266, %267 : vector<8x64xf32>
    %269 = vector.extract_strided_slice %268 {offsets = [0, 0], sizes = [8, 32], strides = [1, 1]} : vector<8x64xf32> to vector<8x32xf32>
    %cst_59 = arith.constant dense<0.000000e+00> : vector<8xf32>
    %270 = vector.multi_reduction <add>, %269, %cst_59 [1] : vector<8x32xf32> to vector<8xf32>
    %271 = vector.shape_cast %270 : vector<8xf32> to vector<8x1xf32>
    %272 = vector.shape_cast %271 : vector<8x1xf32> to vector<8x1xf32>
    %273 = vector.broadcast %272 : vector<8x1xf32> to vector<8x32xf32>
    %274 = vector.extract_strided_slice %268 {offsets = [0, 32], sizes = [8, 32], strides = [1, 1]} : vector<8x64xf32> to vector<8x32xf32>
    %cst_60 = arith.constant dense<0.000000e+00> : vector<8xf32>
    %275 = vector.multi_reduction <add>, %274, %cst_60 [1] : vector<8x32xf32> to vector<8xf32>
    %276 = vector.shape_cast %275 : vector<8xf32> to vector<8x1xf32>
    %277 = vector.shape_cast %276 : vector<8x1xf32> to vector<8x1xf32>
    %278 = vector.broadcast %277 : vector<8x1xf32> to vector<8x32xf32>
    %279 = tpu.concatenate %273, %278 in 1 : vector<8x32xf32>, vector<8x32xf32> -> vector<8x64xf32>
    %cst_61 = arith.constant dense<0xFF800000> : vector<64xf32>
    %280 = vector.multi_reduction <maximumf>, %279, %cst_61 [0] : vector<8x64xf32> to vector<64xf32>
    %281 = vector.shape_cast %280 : vector<64xf32> to vector<1x64xf32>
    %282 = vector.broadcast %281 : vector<1x64xf32> to vector<8x64xf32>
    %283 = arith.subf %279, %282 : vector<8x64xf32>
    %284 = math.exp %283 : vector<8x64xf32>
    %cst_62 = arith.constant dense<0.000000e+00> : vector<64xf32>
    %285 = vector.multi_reduction <add>, %284, %cst_62 [0] : vector<8x64xf32> to vector<64xf32>
    %286 = vector.shape_cast %285 : vector<64xf32> to vector<1x64xf32>
    %287 = tpu.reciprocal %286 {approx = true} : vector<1x64xf32> -> vector<1x64xf32>
    %288 = vector.broadcast %287 : vector<1x64xf32> to vector<8x64xf32>
    %289 = arith.mulf %284, %288 : vector<8x64xf32>
    %290 = arith.mulf %289, %242 : vector<8x64xf32>
    %cst_63 = arith.constant dense<0.000000e+00> : vector<64xf32>
    %291 = vector.multi_reduction <add>, %290, %cst_63 [0] : vector<8x64xf32> to vector<64xf32>
    %292 = vector.shape_cast %291 : vector<64xf32> to vector<1x64xf32>
    %cst_64 = arith.constant dense<0.000000e+00> : vector<1x192xf32>
    %293 = tpu.matmul %263, %250, %cst_64 {dimension_numbers = #tpu.dot_dimension_numbers<[1], [0], [0], [1], [0, 0, 1, 1], [], []>} : vector<1x32xf32>, vector<32x192xf32>, vector<1x192xf32> -> vector<1x192xf32>
    %cst_65 = arith.constant dense<0.000000e+00> : vector<1x192xf32>
    %294 = tpu.matmul %292, %251, %cst_65 {dimension_numbers = #tpu.dot_dimension_numbers<[1], [0], [0], [1], [0, 0, 1, 1], [], []>} : vector<1x64xf32>, vector<64x192xf32>, vector<1x192xf32> -> vector<1x192xf32>
    %295 = arith.addf %293, %294 : vector<1x192xf32>
    %296 = arith.addf %295, %254 : vector<1x192xf32>
    %297 = vector.extract_strided_slice %296 {offsets = [0, 0], sizes = [1, 64], strides = [1, 1]} : vector<1x192xf32> to vector<1x64xf32>
    %298 = vector.extract_strided_slice %259 {offsets = [0, 0], sizes = [1, 64], strides = [1, 1]} : vector<1x192xf32> to vector<1x64xf32>
    %299 = arith.addf %297, %298 : vector<1x64xf32>
    %300 = arith.negf %299 : vector<1x64xf32>
    %301 = math.exp %300 : vector<1x64xf32>
    %cst_66 = arith.constant 1.000000e+00 : f32
    %302 = vector.broadcast %cst_66 : f32 to vector<1x64xf32>
    %303 = arith.addf %302, %301 : vector<1x64xf32>
    %304 = arith.divf %302, %303 : vector<1x64xf32>
    %305 = vector.extract_strided_slice %296 {offsets = [0, 64], sizes = [1, 64], strides = [1, 1]} : vector<1x192xf32> to vector<1x64xf32>
    %306 = vector.extract_strided_slice %259 {offsets = [0, 64], sizes = [1, 64], strides = [1, 1]} : vector<1x192xf32> to vector<1x64xf32>
    %307 = arith.addf %305, %306 : vector<1x64xf32>
    %308 = arith.negf %307 : vector<1x64xf32>
    %309 = math.exp %308 : vector<1x64xf32>
    %cst_67 = arith.constant 1.000000e+00 : f32
    %310 = vector.broadcast %cst_67 : f32 to vector<1x64xf32>
    %311 = arith.addf %310, %309 : vector<1x64xf32>
    %312 = arith.divf %310, %311 : vector<1x64xf32>
    %313 = vector.extract_strided_slice %296 {offsets = [0, 128], sizes = [1, 64], strides = [1, 1]} : vector<1x192xf32> to vector<1x64xf32>
    %314 = vector.extract_strided_slice %259 {offsets = [0, 128], sizes = [1, 64], strides = [1, 1]} : vector<1x192xf32> to vector<1x64xf32>
    %315 = arith.mulf %304, %314 : vector<1x64xf32>
    %316 = arith.addf %313, %315 : vector<1x64xf32>
    %317 = math.tanh %316 : vector<1x64xf32>
    %cst_68 = arith.constant 1.000000e+00 : f32
    %318 = vector.broadcast %cst_68 : f32 to vector<1x64xf32>
    %319 = arith.subf %318, %312 : vector<1x64xf32>
    %320 = arith.mulf %319, %317 : vector<1x64xf32>
    %321 = arith.mulf %312, %241 : vector<1x64xf32>
    %322 = arith.addf %320, %321 : vector<1x64xf32>
    %cst_69 = arith.constant dense<0.000000e+00> : vector<1x4xf32>
    %323 = tpu.matmul %322, %252, %cst_69 {dimension_numbers = #tpu.dot_dimension_numbers<[1], [0], [0], [1], [0, 0, 1, 1], [], []>} : vector<1x64xf32>, vector<64x4xf32>, vector<1x4xf32> -> vector<1x4xf32>
    %324 = arith.addf %323, %256 : vector<1x4xf32>
    %cst_70 = arith.constant dense<0.000000e+00> : vector<1x288xf32>
    %325 = tpu.matmul %322, %249, %cst_70 {dimension_numbers = #tpu.dot_dimension_numbers<[1], [0], [0], [1], [0, 0, 1, 1], [], []>} : vector<1x64xf32>, vector<64x288xf32>, vector<1x288xf32> -> vector<1x288xf32>
    %326 = vector.extract_strided_slice %325 {offsets = [0, 0], sizes = [1, 192], strides = [1, 1]} : vector<1x288xf32> to vector<1x192xf32>
    %327 = arith.addf %326, %253 : vector<1x192xf32>
    %328 = vector.extract_strided_slice %325 {offsets = [0, 192], sizes = [1, 64], strides = [1, 1]} : vector<1x288xf32> to vector<1x64xf32>
    %329 = vector.extract_strided_slice %325 {offsets = [0, 256], sizes = [1, 32], strides = [1, 1]} : vector<1x288xf32> to vector<1x32xf32>
    %330 = arith.addf %329, %255 : vector<1x32xf32>
    %331 = math.tanh %330 : vector<1x32xf32>
    %332 = vector.broadcast %328 : vector<1x64xf32> to vector<8x64xf32>
    %333 = arith.addf %332, %247 : vector<8x64xf32>
    %334 = math.tanh %333 : vector<8x64xf32>
    %335 = vector.broadcast %248 : vector<1x64xf32> to vector<8x64xf32>
    %336 = arith.mulf %334, %335 : vector<8x64xf32>
    %337 = vector.extract_strided_slice %336 {offsets = [0, 0], sizes = [8, 32], strides = [1, 1]} : vector<8x64xf32> to vector<8x32xf32>
    %cst_71 = arith.constant dense<0.000000e+00> : vector<8xf32>
    %338 = vector.multi_reduction <add>, %337, %cst_71 [1] : vector<8x32xf32> to vector<8xf32>
    %339 = vector.shape_cast %338 : vector<8xf32> to vector<8x1xf32>
    %340 = vector.shape_cast %339 : vector<8x1xf32> to vector<8x1xf32>
    %341 = vector.broadcast %340 : vector<8x1xf32> to vector<8x32xf32>
    %342 = vector.extract_strided_slice %336 {offsets = [0, 32], sizes = [8, 32], strides = [1, 1]} : vector<8x64xf32> to vector<8x32xf32>
    %cst_72 = arith.constant dense<0.000000e+00> : vector<8xf32>
    %343 = vector.multi_reduction <add>, %342, %cst_72 [1] : vector<8x32xf32> to vector<8xf32>
    %344 = vector.shape_cast %343 : vector<8xf32> to vector<8x1xf32>
    %345 = vector.shape_cast %344 : vector<8x1xf32> to vector<8x1xf32>
    %346 = vector.broadcast %345 : vector<8x1xf32> to vector<8x32xf32>
    %347 = tpu.concatenate %341, %346 in 1 : vector<8x32xf32>, vector<8x32xf32> -> vector<8x64xf32>
    %cst_73 = arith.constant dense<0xFF800000> : vector<64xf32>
    %348 = vector.multi_reduction <maximumf>, %347, %cst_73 [0] : vector<8x64xf32> to vector<64xf32>
    %349 = vector.shape_cast %348 : vector<64xf32> to vector<1x64xf32>
    %350 = vector.broadcast %349 : vector<1x64xf32> to vector<8x64xf32>
    %351 = arith.subf %347, %350 : vector<8x64xf32>
    %352 = math.exp %351 : vector<8x64xf32>
    %cst_74 = arith.constant dense<0.000000e+00> : vector<64xf32>
    %353 = vector.multi_reduction <add>, %352, %cst_74 [0] : vector<8x64xf32> to vector<64xf32>
    %354 = vector.shape_cast %353 : vector<64xf32> to vector<1x64xf32>
    %355 = tpu.reciprocal %354 {approx = true} : vector<1x64xf32> -> vector<1x64xf32>
    %356 = vector.broadcast %355 : vector<1x64xf32> to vector<8x64xf32>
    %357 = arith.mulf %352, %356 : vector<8x64xf32>
    %358 = arith.mulf %357, %242 : vector<8x64xf32>
    %cst_75 = arith.constant dense<0.000000e+00> : vector<64xf32>
    %359 = vector.multi_reduction <add>, %358, %cst_75 [0] : vector<8x64xf32> to vector<64xf32>
    %360 = vector.shape_cast %359 : vector<64xf32> to vector<1x64xf32>
    %cst_76 = arith.constant dense<0.000000e+00> : vector<1x192xf32>
    %361 = tpu.matmul %331, %250, %cst_76 {dimension_numbers = #tpu.dot_dimension_numbers<[1], [0], [0], [1], [0, 0, 1, 1], [], []>} : vector<1x32xf32>, vector<32x192xf32>, vector<1x192xf32> -> vector<1x192xf32>
    %cst_77 = arith.constant dense<0.000000e+00> : vector<1x192xf32>
    %362 = tpu.matmul %360, %251, %cst_77 {dimension_numbers = #tpu.dot_dimension_numbers<[1], [0], [0], [1], [0, 0, 1, 1], [], []>} : vector<1x64xf32>, vector<64x192xf32>, vector<1x192xf32> -> vector<1x192xf32>
    %363 = arith.addf %361, %362 : vector<1x192xf32>
    %364 = arith.addf %363, %254 : vector<1x192xf32>
    %365 = vector.extract_strided_slice %364 {offsets = [0, 0], sizes = [1, 64], strides = [1, 1]} : vector<1x192xf32> to vector<1x64xf32>
    %366 = vector.extract_strided_slice %327 {offsets = [0, 0], sizes = [1, 64], strides = [1, 1]} : vector<1x192xf32> to vector<1x64xf32>
    %367 = arith.addf %365, %366 : vector<1x64xf32>
    %368 = arith.negf %367 : vector<1x64xf32>
    %369 = math.exp %368 : vector<1x64xf32>
    %cst_78 = arith.constant 1.000000e+00 : f32
    %370 = vector.broadcast %cst_78 : f32 to vector<1x64xf32>
    %371 = arith.addf %370, %369 : vector<1x64xf32>
    %372 = arith.divf %370, %371 : vector<1x64xf32>
    %373 = vector.extract_strided_slice %364 {offsets = [0, 64], sizes = [1, 64], strides = [1, 1]} : vector<1x192xf32> to vector<1x64xf32>
    %374 = vector.extract_strided_slice %327 {offsets = [0, 64], sizes = [1, 64], strides = [1, 1]} : vector<1x192xf32> to vector<1x64xf32>
    %375 = arith.addf %373, %374 : vector<1x64xf32>
    %376 = arith.negf %375 : vector<1x64xf32>
    %377 = math.exp %376 : vector<1x64xf32>
    %cst_79 = arith.constant 1.000000e+00 : f32
    %378 = vector.broadcast %cst_79 : f32 to vector<1x64xf32>
    %379 = arith.addf %378, %377 : vector<1x64xf32>
    %380 = arith.divf %378, %379 : vector<1x64xf32>
    %381 = vector.extract_strided_slice %364 {offsets = [0, 128], sizes = [1, 64], strides = [1, 1]} : vector<1x192xf32> to vector<1x64xf32>
    %382 = vector.extract_strided_slice %327 {offsets = [0, 128], sizes = [1, 64], strides = [1, 1]} : vector<1x192xf32> to vector<1x64xf32>
    %383 = arith.mulf %372, %382 : vector<1x64xf32>
    %384 = arith.addf %381, %383 : vector<1x64xf32>
    %385 = math.tanh %384 : vector<1x64xf32>
    %cst_80 = arith.constant 1.000000e+00 : f32
    %386 = vector.broadcast %cst_80 : f32 to vector<1x64xf32>
    %387 = arith.subf %386, %380 : vector<1x64xf32>
    %388 = arith.mulf %387, %385 : vector<1x64xf32>
    %389 = arith.mulf %380, %322 : vector<1x64xf32>
    %390 = arith.addf %388, %389 : vector<1x64xf32>
    %cst_81 = arith.constant dense<0.000000e+00> : vector<1x4xf32>
    %391 = tpu.matmul %390, %252, %cst_81 {dimension_numbers = #tpu.dot_dimension_numbers<[1], [0], [0], [1], [0, 0, 1, 1], [], []>} : vector<1x64xf32>, vector<64x4xf32>, vector<1x4xf32> -> vector<1x4xf32>
    %392 = arith.addf %391, %256 : vector<1x4xf32>
    %cst_82 = arith.constant dense<0.000000e+00> : vector<1x288xf32>
    %393 = tpu.matmul %390, %249, %cst_82 {dimension_numbers = #tpu.dot_dimension_numbers<[1], [0], [0], [1], [0, 0, 1, 1], [], []>} : vector<1x64xf32>, vector<64x288xf32>, vector<1x288xf32> -> vector<1x288xf32>
    %394 = vector.extract_strided_slice %393 {offsets = [0, 0], sizes = [1, 192], strides = [1, 1]} : vector<1x288xf32> to vector<1x192xf32>
    %395 = arith.addf %394, %253 : vector<1x192xf32>
    %396 = vector.extract_strided_slice %393 {offsets = [0, 192], sizes = [1, 64], strides = [1, 1]} : vector<1x288xf32> to vector<1x64xf32>
    %397 = vector.extract_strided_slice %393 {offsets = [0, 256], sizes = [1, 32], strides = [1, 1]} : vector<1x288xf32> to vector<1x32xf32>
    %398 = arith.addf %397, %255 : vector<1x32xf32>
    %399 = math.tanh %398 : vector<1x32xf32>
    %400 = vector.broadcast %396 : vector<1x64xf32> to vector<8x64xf32>
    %401 = arith.addf %400, %247 : vector<8x64xf32>
    %402 = math.tanh %401 : vector<8x64xf32>
    %403 = vector.broadcast %248 : vector<1x64xf32> to vector<8x64xf32>
    %404 = arith.mulf %402, %403 : vector<8x64xf32>
    %405 = vector.extract_strided_slice %404 {offsets = [0, 0], sizes = [8, 32], strides = [1, 1]} : vector<8x64xf32> to vector<8x32xf32>
    %cst_83 = arith.constant dense<0.000000e+00> : vector<8xf32>
    %406 = vector.multi_reduction <add>, %405, %cst_83 [1] : vector<8x32xf32> to vector<8xf32>
    %407 = vector.shape_cast %406 : vector<8xf32> to vector<8x1xf32>
    %408 = vector.shape_cast %407 : vector<8x1xf32> to vector<8x1xf32>
    %409 = vector.broadcast %408 : vector<8x1xf32> to vector<8x32xf32>
    %410 = vector.extract_strided_slice %404 {offsets = [0, 32], sizes = [8, 32], strides = [1, 1]} : vector<8x64xf32> to vector<8x32xf32>
    %cst_84 = arith.constant dense<0.000000e+00> : vector<8xf32>
    %411 = vector.multi_reduction <add>, %410, %cst_84 [1] : vector<8x32xf32> to vector<8xf32>
    %412 = vector.shape_cast %411 : vector<8xf32> to vector<8x1xf32>
    %413 = vector.shape_cast %412 : vector<8x1xf32> to vector<8x1xf32>
    %414 = vector.broadcast %413 : vector<8x1xf32> to vector<8x32xf32>
    %415 = tpu.concatenate %409, %414 in 1 : vector<8x32xf32>, vector<8x32xf32> -> vector<8x64xf32>
    %cst_85 = arith.constant dense<0xFF800000> : vector<64xf32>
    %416 = vector.multi_reduction <maximumf>, %415, %cst_85 [0] : vector<8x64xf32> to vector<64xf32>
    %417 = vector.shape_cast %416 : vector<64xf32> to vector<1x64xf32>
    %418 = vector.broadcast %417 : vector<1x64xf32> to vector<8x64xf32>
    %419 = arith.subf %415, %418 : vector<8x64xf32>
    %420 = math.exp %419 : vector<8x64xf32>
    %cst_86 = arith.constant dense<0.000000e+00> : vector<64xf32>
    %421 = vector.multi_reduction <add>, %420, %cst_86 [0] : vector<8x64xf32> to vector<64xf32>
    %422 = vector.shape_cast %421 : vector<64xf32> to vector<1x64xf32>
    %423 = tpu.reciprocal %422 {approx = true} : vector<1x64xf32> -> vector<1x64xf32>
    %424 = vector.broadcast %423 : vector<1x64xf32> to vector<8x64xf32>
    %425 = arith.mulf %420, %424 : vector<8x64xf32>
    %426 = arith.mulf %425, %242 : vector<8x64xf32>
    %cst_87 = arith.constant dense<0.000000e+00> : vector<64xf32>
    %427 = vector.multi_reduction <add>, %426, %cst_87 [0] : vector<8x64xf32> to vector<64xf32>
    %428 = vector.shape_cast %427 : vector<64xf32> to vector<1x64xf32>
    %cst_88 = arith.constant dense<0.000000e+00> : vector<1x192xf32>
    %429 = tpu.matmul %399, %250, %cst_88 {dimension_numbers = #tpu.dot_dimension_numbers<[1], [0], [0], [1], [0, 0, 1, 1], [], []>} : vector<1x32xf32>, vector<32x192xf32>, vector<1x192xf32> -> vector<1x192xf32>
    %cst_89 = arith.constant dense<0.000000e+00> : vector<1x192xf32>
    %430 = tpu.matmul %428, %251, %cst_89 {dimension_numbers = #tpu.dot_dimension_numbers<[1], [0], [0], [1], [0, 0, 1, 1], [], []>} : vector<1x64xf32>, vector<64x192xf32>, vector<1x192xf32> -> vector<1x192xf32>
    %431 = arith.addf %429, %430 : vector<1x192xf32>
    %432 = arith.addf %431, %254 : vector<1x192xf32>
    %433 = vector.extract_strided_slice %432 {offsets = [0, 0], sizes = [1, 64], strides = [1, 1]} : vector<1x192xf32> to vector<1x64xf32>
    %434 = vector.extract_strided_slice %395 {offsets = [0, 0], sizes = [1, 64], strides = [1, 1]} : vector<1x192xf32> to vector<1x64xf32>
    %435 = arith.addf %433, %434 : vector<1x64xf32>
    %436 = arith.negf %435 : vector<1x64xf32>
    %437 = math.exp %436 : vector<1x64xf32>
    %cst_90 = arith.constant 1.000000e+00 : f32
    %438 = vector.broadcast %cst_90 : f32 to vector<1x64xf32>
    %439 = arith.addf %438, %437 : vector<1x64xf32>
    %440 = arith.divf %438, %439 : vector<1x64xf32>
    %441 = vector.extract_strided_slice %432 {offsets = [0, 64], sizes = [1, 64], strides = [1, 1]} : vector<1x192xf32> to vector<1x64xf32>
    %442 = vector.extract_strided_slice %395 {offsets = [0, 64], sizes = [1, 64], strides = [1, 1]} : vector<1x192xf32> to vector<1x64xf32>
    %443 = arith.addf %441, %442 : vector<1x64xf32>
    %444 = arith.negf %443 : vector<1x64xf32>
    %445 = math.exp %444 : vector<1x64xf32>
    %cst_91 = arith.constant 1.000000e+00 : f32
    %446 = vector.broadcast %cst_91 : f32 to vector<1x64xf32>
    %447 = arith.addf %446, %445 : vector<1x64xf32>
    %448 = arith.divf %446, %447 : vector<1x64xf32>
    %449 = vector.extract_strided_slice %432 {offsets = [0, 128], sizes = [1, 64], strides = [1, 1]} : vector<1x192xf32> to vector<1x64xf32>
    %450 = vector.extract_strided_slice %395 {offsets = [0, 128], sizes = [1, 64], strides = [1, 1]} : vector<1x192xf32> to vector<1x64xf32>
    %451 = arith.mulf %440, %450 : vector<1x64xf32>
    %452 = arith.addf %449, %451 : vector<1x64xf32>
    %453 = math.tanh %452 : vector<1x64xf32>
    %cst_92 = arith.constant 1.000000e+00 : f32
    %454 = vector.broadcast %cst_92 : f32 to vector<1x64xf32>
    %455 = arith.subf %454, %448 : vector<1x64xf32>
    %456 = arith.mulf %455, %453 : vector<1x64xf32>
    %457 = arith.mulf %448, %390 : vector<1x64xf32>
    %458 = arith.addf %456, %457 : vector<1x64xf32>
    %cst_93 = arith.constant dense<0.000000e+00> : vector<1x4xf32>
    %459 = tpu.matmul %458, %252, %cst_93 {dimension_numbers = #tpu.dot_dimension_numbers<[1], [0], [0], [1], [0, 0, 1, 1], [], []>} : vector<1x64xf32>, vector<64x4xf32>, vector<1x4xf32> -> vector<1x4xf32>
    %460 = arith.addf %459, %256 : vector<1x4xf32>
    %cst_94 = arith.constant dense<0.000000e+00> : vector<1x288xf32>
    %461 = tpu.matmul %458, %249, %cst_94 {dimension_numbers = #tpu.dot_dimension_numbers<[1], [0], [0], [1], [0, 0, 1, 1], [], []>} : vector<1x64xf32>, vector<64x288xf32>, vector<1x288xf32> -> vector<1x288xf32>
    %462 = vector.extract_strided_slice %461 {offsets = [0, 0], sizes = [1, 192], strides = [1, 1]} : vector<1x288xf32> to vector<1x192xf32>
    %463 = arith.addf %462, %253 : vector<1x192xf32>
    %464 = vector.extract_strided_slice %461 {offsets = [0, 192], sizes = [1, 64], strides = [1, 1]} : vector<1x288xf32> to vector<1x64xf32>
    %465 = vector.extract_strided_slice %461 {offsets = [0, 256], sizes = [1, 32], strides = [1, 1]} : vector<1x288xf32> to vector<1x32xf32>
    %466 = arith.addf %465, %255 : vector<1x32xf32>
    %467 = math.tanh %466 : vector<1x32xf32>
    %468 = vector.broadcast %464 : vector<1x64xf32> to vector<8x64xf32>
    %469 = arith.addf %468, %247 : vector<8x64xf32>
    %470 = math.tanh %469 : vector<8x64xf32>
    %471 = vector.broadcast %248 : vector<1x64xf32> to vector<8x64xf32>
    %472 = arith.mulf %470, %471 : vector<8x64xf32>
    %473 = vector.extract_strided_slice %472 {offsets = [0, 0], sizes = [8, 32], strides = [1, 1]} : vector<8x64xf32> to vector<8x32xf32>
    %cst_95 = arith.constant dense<0.000000e+00> : vector<8xf32>
    %474 = vector.multi_reduction <add>, %473, %cst_95 [1] : vector<8x32xf32> to vector<8xf32>
    %475 = vector.shape_cast %474 : vector<8xf32> to vector<8x1xf32>
    %476 = vector.shape_cast %475 : vector<8x1xf32> to vector<8x1xf32>
    %477 = vector.broadcast %476 : vector<8x1xf32> to vector<8x32xf32>
    %478 = vector.extract_strided_slice %472 {offsets = [0, 32], sizes = [8, 32], strides = [1, 1]} : vector<8x64xf32> to vector<8x32xf32>
    %cst_96 = arith.constant dense<0.000000e+00> : vector<8xf32>
    %479 = vector.multi_reduction <add>, %478, %cst_96 [1] : vector<8x32xf32> to vector<8xf32>
    %480 = vector.shape_cast %479 : vector<8xf32> to vector<8x1xf32>
    %481 = vector.shape_cast %480 : vector<8x1xf32> to vector<8x1xf32>
    %482 = vector.broadcast %481 : vector<8x1xf32> to vector<8x32xf32>
    %483 = tpu.concatenate %477, %482 in 1 : vector<8x32xf32>, vector<8x32xf32> -> vector<8x64xf32>
    %cst_97 = arith.constant dense<0xFF800000> : vector<64xf32>
    %484 = vector.multi_reduction <maximumf>, %483, %cst_97 [0] : vector<8x64xf32> to vector<64xf32>
    %485 = vector.shape_cast %484 : vector<64xf32> to vector<1x64xf32>
    %486 = vector.broadcast %485 : vector<1x64xf32> to vector<8x64xf32>
    %487 = arith.subf %483, %486 : vector<8x64xf32>
    %488 = math.exp %487 : vector<8x64xf32>
    %cst_98 = arith.constant dense<0.000000e+00> : vector<64xf32>
    %489 = vector.multi_reduction <add>, %488, %cst_98 [0] : vector<8x64xf32> to vector<64xf32>
    %490 = vector.shape_cast %489 : vector<64xf32> to vector<1x64xf32>
    %491 = tpu.reciprocal %490 {approx = true} : vector<1x64xf32> -> vector<1x64xf32>
    %492 = vector.broadcast %491 : vector<1x64xf32> to vector<8x64xf32>
    %493 = arith.mulf %488, %492 : vector<8x64xf32>
    %494 = arith.mulf %493, %242 : vector<8x64xf32>
    %cst_99 = arith.constant dense<0.000000e+00> : vector<64xf32>
    %495 = vector.multi_reduction <add>, %494, %cst_99 [0] : vector<8x64xf32> to vector<64xf32>
    %496 = vector.shape_cast %495 : vector<64xf32> to vector<1x64xf32>
    %cst_100 = arith.constant dense<0.000000e+00> : vector<1x192xf32>
    %497 = tpu.matmul %467, %250, %cst_100 {dimension_numbers = #tpu.dot_dimension_numbers<[1], [0], [0], [1], [0, 0, 1, 1], [], []>} : vector<1x32xf32>, vector<32x192xf32>, vector<1x192xf32> -> vector<1x192xf32>
    %cst_101 = arith.constant dense<0.000000e+00> : vector<1x192xf32>
    %498 = tpu.matmul %496, %251, %cst_101 {dimension_numbers = #tpu.dot_dimension_numbers<[1], [0], [0], [1], [0, 0, 1, 1], [], []>} : vector<1x64xf32>, vector<64x192xf32>, vector<1x192xf32> -> vector<1x192xf32>
    %499 = arith.addf %497, %498 : vector<1x192xf32>
    %500 = arith.addf %499, %254 : vector<1x192xf32>
    %501 = vector.extract_strided_slice %500 {offsets = [0, 0], sizes = [1, 64], strides = [1, 1]} : vector<1x192xf32> to vector<1x64xf32>
    %502 = vector.extract_strided_slice %463 {offsets = [0, 0], sizes = [1, 64], strides = [1, 1]} : vector<1x192xf32> to vector<1x64xf32>
    %503 = arith.addf %501, %502 : vector<1x64xf32>
    %504 = arith.negf %503 : vector<1x64xf32>
    %505 = math.exp %504 : vector<1x64xf32>
    %cst_102 = arith.constant 1.000000e+00 : f32
    %506 = vector.broadcast %cst_102 : f32 to vector<1x64xf32>
    %507 = arith.addf %506, %505 : vector<1x64xf32>
    %508 = arith.divf %506, %507 : vector<1x64xf32>
    %509 = vector.extract_strided_slice %500 {offsets = [0, 64], sizes = [1, 64], strides = [1, 1]} : vector<1x192xf32> to vector<1x64xf32>
    %510 = vector.extract_strided_slice %463 {offsets = [0, 64], sizes = [1, 64], strides = [1, 1]} : vector<1x192xf32> to vector<1x64xf32>
    %511 = arith.addf %509, %510 : vector<1x64xf32>
    %512 = arith.negf %511 : vector<1x64xf32>
    %513 = math.exp %512 : vector<1x64xf32>
    %cst_103 = arith.constant 1.000000e+00 : f32
    %514 = vector.broadcast %cst_103 : f32 to vector<1x64xf32>
    %515 = arith.addf %514, %513 : vector<1x64xf32>
    %516 = arith.divf %514, %515 : vector<1x64xf32>
    %517 = vector.extract_strided_slice %500 {offsets = [0, 128], sizes = [1, 64], strides = [1, 1]} : vector<1x192xf32> to vector<1x64xf32>
    %518 = vector.extract_strided_slice %463 {offsets = [0, 128], sizes = [1, 64], strides = [1, 1]} : vector<1x192xf32> to vector<1x64xf32>
    %519 = arith.mulf %508, %518 : vector<1x64xf32>
    %520 = arith.addf %517, %519 : vector<1x64xf32>
    %521 = math.tanh %520 : vector<1x64xf32>
    %cst_104 = arith.constant 1.000000e+00 : f32
    %522 = vector.broadcast %cst_104 : f32 to vector<1x64xf32>
    %523 = arith.subf %522, %516 : vector<1x64xf32>
    %524 = arith.mulf %523, %521 : vector<1x64xf32>
    %525 = arith.mulf %516, %458 : vector<1x64xf32>
    %526 = arith.addf %524, %525 : vector<1x64xf32>
    %cst_105 = arith.constant dense<0.000000e+00> : vector<1x4xf32>
    %527 = tpu.matmul %526, %252, %cst_105 {dimension_numbers = #tpu.dot_dimension_numbers<[1], [0], [0], [1], [0, 0, 1, 1], [], []>} : vector<1x64xf32>, vector<64x4xf32>, vector<1x4xf32> -> vector<1x4xf32>
    %528 = arith.addf %527, %256 : vector<1x4xf32>
    %529 = tpu.concatenate %324, %392, %460, %528 in 0 : vector<1x4xf32>, vector<1x4xf32>, vector<1x4xf32>, vector<1x4xf32> -> vector<4x4xf32>
    %c0_106 = arith.constant 0 : index
    %c0_107 = arith.constant 0 : index
    %530 = vector.load %arg5[%c0_106, %c0_107] : memref<4x4xf32, #tpu.memory_space<vmem>>, vector<4x4xf32>
    tpu.vector_store %arg5[%c0_106, %c0_107], %529 {strides = array<i32>} : memref<4x4xf32, #tpu.memory_space<vmem>>, vector<4x4xf32>,
    return
  }
}

</mosaic_0001>

<bundles_post_ra>
// kernel: tpu_custom_call.1
= control target key start
LH: loop header
LB: loop body
LE: loop exit
PB: predicated region body
PF: predicated region fallthrough
CT: control target
= control target key end

     0   :  { %10 = vsyncpa [#allocation3], 0  ;;  %s5282_s0 = inlined_call_operand.vmem [shape: f32[8,4], index: 0, kind: input, shape index: {}]   ;;  %s5283_s1 = inlined_call_operand.vmem [shape: f32[4,32], index: 1, kind: input, shape index: {}]   ;;  %s5284_s2 = inlined_call_operand.hbm [shape: f32[32,384], index: 2, kind: input, shape index: {}]   ;;  %s5285_s3 = inlined_call_operand.hbm [shape: f32[64,740], index: 3, kind: input, shape index: {}]   ;;  %s5286_s4 = inlined_call_operand.vmem [shape: f32[1,964], index: 4, kind: input, shape index: {}]   ;;  %s5287_s5 = inlined_call_operand.hbm [shape: f32[4,4], index: 5, kind: output, shape index: {}]  }
   0x1   :  { %11 = vsyncpa [#allocation6], 0 }
   0x2   :  { %12 = vsyncpa [#allocation4], 0  ;;  %s4365_s18 = smov [#allocation2]   ;;  %s4293_s22 = scalar_lea.hbm %s5284_s2, 1536 }
   0x3   :  { %s22_s19 = sshll.u32 %s4365_s18, 4  ;;  %p4294_p0 = scmp.ne.s32.totalorder %s5284_s2, %s4293_s22  ;;  %s23_s19 = int_to_ptr.vmem [resolvable:$true] %s22_s19 }
   0x4   :  { %p4297_p1 = scmp.lt.u32.totalorder %s4293_s22, %s5284_s2 }
   0x6   :  { %p4299_p2 = pnand %p4297_p1, %p4294_p0 }
   0x8   :  { %4302 = shalt.err (!%p4299_p2)
}
   0x9   :  { %s4303_s27 = scalar_lea.vmem %s23_s19, 1536  ;;  %p4308_p4 = scmp.lt.s32.totalorder %s23_s19, %s23_s19 }
   0xa   :  { %p4304_p3 = scmp.ne.s32.totalorder %s23_s19, %s4303_s27  ;;  %p4309_p5 = scmp.lt.s32.totalorder %s4303_s27, %s4303_s27 }
   0xc   :  { %p4310_p6 = por %p4309_p5, %p4308_p4 }
   0xe   :  { %p4311_p7 = pnand %p4310_p6, %p4304_p3 }
  0x10   :  { %4314 = shalt.err (!%p4311_p7)
}
  0x11   :  { %s4366_s28 = smov 384   ;;  %s4367_s29 = smov 24  }
  0x12   :  { %28 = dma.hbm_to_vmem [thread:$0]  %s5284_s2, 1536, %s23_s19, [#allocation3], %s4366_s28, %s4366_s28, %s4367_s29  }
  0x13   :  { %s4368_s7 = smov [#allocation5]   ;;  %s4315_s11 = scalar_lea.hbm %s5285_s3, 6144 }
  0x14   :  { %s34_s8 = sshll.u32 %s4368_s7, 4  ;;  %p4316_p8 = scmp.ne.s32.totalorder %s5285_s3, %s4315_s11  ;;  %s35_s8 = int_to_ptr.vmem [resolvable:$true] %s34_s8 }
  0x15   :  { %p4319_p9 = scmp.lt.u32.totalorder %s4315_s11, %s5285_s3 }
  0x17   :  { %p4321_p10 = pnand %p4319_p9, %p4316_p8 }
  0x19   :  { %4324 = shalt.err (!%p4321_p10)
}
  0x1a   :  { %s4325_s16 = scalar_lea.vmem %s35_s8, 6144  ;;  %p4330_p12 = scmp.lt.s32.totalorder %s35_s8, %s35_s8 }
  0x1b   :  { %p4326_p11 = scmp.ne.s32.totalorder %s35_s8, %s4325_s16  ;;  %p4331_p13 = scmp.lt.s32.totalorder %s4325_s16, %s4325_s16 }
  0x1d   :  { %p4332_p0 = por %p4331_p13, %p4330_p12 }
  0x1f   :  { %p4333_p1 = pnand %p4332_p0, %p4326_p11 }
  0x21   :  { %4336 = shalt.err (!%p4333_p1)
}
  0x22   :  { %s4369_s2 = smov 768   ;;  %s4370_s17 = smov 48  }
  0x23   :  { %40 = dma.hbm_to_vmem [thread:$0]  %s5285_s3, 6144, %s35_s8, [#allocation6], %s4369_s2, %s4369_s2, %s4370_s17  }
  0x24   :  { %4359 = dma.done.wait [#allocation3], 1536  }
  0x25   :  { %4360 = vsyncadd [#allocation3], 4294965760 }
  0x26   :  { %4361 = dma.done.wait [#allocation6], 6144  }
  0x27   :  { %4362 = vsyncadd [#allocation6], 4294961152  ;;  %v4371_v0 = vmov 0.0   ;;  %vm4372_vm0 = vmmov 0   ;;  %vm62_vm1 = vcmask 1043456   ;;  %vm58_vm2 = vcmask 31744  }
  0x28   :  { %3437 = vmatprep.subr.mxu0 %v4371_v0  ;;  %3439 = vmatprep.mubr.msk.f32.mxu0 %vm4372_vm0, %v4371_v0  ;;  %v51_v1 = vld [vmem:[%s5283_s1] sm:$0xf]  ;;  %v138_v3 = vld [vmem:[#allocation2 + $0x8] sm:$0xff]  ;;  %v140_v4 = vld [vmem:[#allocation2 + $0x20] sm:$0xff]  ;;  %v147_v15 = vlaneseq  ;;  %s4373_s25 = smov 96   ;;  %s4374_s26 = smov 32  }
  0x29   :  { %231 = vmatprep.mubr.f32.mxu1 %v4371_v0  ;;  %v50_v2 = vld [vmem:[%s5282_s0] sm:$0xff]  ;;  %3438 = vmatpush3.msk.msra.mxu0 %vm62_vm1, %v51_v1  ;;  %v137_v5 = vld [vmem:[#allocation2] sm:$0xff]  ;;  %v3613_v6 = vpack.c.bf16 %v140_v4, %v138_v3  ;;  %v144_v9 = vld [vmem:[#allocation2 + $0x50] sm:$0xff]  ;;  %vm163_vm3 = vcmask 261120   ;;  %vm159_vm4 = vcmask 785408   ;;  %s4375_s29 = smov 64  }
  0x2a   :  { %3440 = vmatmul.mubr.msk.f32.vlgmr.msra.gmra.mrb[0].mxu0 %vm58_vm2, %v50_v2  ;;  %v139_v7 = vld [vmem:[#allocation2 + $0x18] sm:$0xff]  ;;  %v141_v12 = vld [vmem:[#allocation2 + $0x30] sm:$0xff]  ;;  %v143_v13 = vld [vmem:[#allocation2 + $0x48] sm:$0xff]  ;;  %v4444_v16 = vshrl.u32 %v147_v15, 7  ;;  %vm377_vm5 = vcmask 523264   ;;  %vm1095_vm6 = vcmask 1040384  }
  0x2b   :  { %444 = vmatprep.mubr.f32.mxu0 %v4371_v0  ;;  %v142_v8 = vld [vmem:[#allocation2 + $0x38] sm:$0xff]  ;;  %v3615_v10 = vpack.c.bf16 %v139_v7, %v137_v5  ;;  %3614 = vmatprep.subr.bf16.mxu1 %v3613_v6  ;;  %v3619_v14 = vpack.c.bf16 %v143_v13, %v141_v12  ;;  %v4475_v32 = vld [vmem:[#allocation5 + $0x10] sm:$0xff]  ;;  %v4518_v63 = vld [vmem:[#allocation5 + $0x40] sm:$0xff]  ;;  %vm1097_vm7 = vcmask 1041408   ;;  %vm1099_vm8 = vcmask 1042432  }
  0x2c   :  { %v3617_v11 = vpack.c.bf16 %v144_v9, %v142_v8  ;;  %v145_v17 = vld [vmem:[%s5286_s4] sm:$0x3]  ;;  %v4453_v19 = vsub.s32 0, %v4444_v16  ;;  %v4456_v20 = vsub.s32 1, %v4444_v16  ;;  %v271_v25 = vsub.s32 2, %v4444_v16  ;;  %v4482_v35 = vld [vmem:[#allocation5 + $0x70] sm:$0xff] }
  0x2d   :  { %3616 = vmatpush1.bf16.msra.mxu1 %v3615_v10  ;;  %v238_v18 = vld [vmem:[%s5286_s4 + $0x1] sm:$0x7]  ;;  %v3307_v27 = vld [vmem:[%s5286_s4] ss:$0 sm:$0xff]  ;;  %v4489_v38 = vld [vmem:[#allocation5 + $0xd0] sm:$0xff]  ;;  %vm1102_vm9 = vcmask 1044480  }
  0x2e   :  { %3618 = vmatprep.subr.bf16.mxu1 %v3617_v11  ;;  %v150_v21 = vrot.slane %v145_v17, %v4453_v19  ;;  %v243_v22 = vrot.slane %v238_v18, %v4453_v19  ;;  %v154_v23 = vrot.slane %v145_v17, %v4456_v20  ;;  %v247_v24 = vrot.slane %v238_v18, %v4456_v20  ;;  %v4477_v33 = vld [vmem:[#allocation5 + $0x18] sm:$0xff]  ;;  %v4496_v41 = vld [vmem:[#allocation5 + $0x130] sm:$0xff]  ;;  %v4520_v1 = vld [vmem:[#allocation5 + $0x48] sm:$0xff] }
  0x2f   :  { %v272_v26 = vrot.slane %v238_v18, %v271_v25  ;;  %v4022_v34 = vpack.i.bf16 %v4477_v33, %v4475_v32  ;;  %v4484_v36 = vld [vmem:[#allocation5 + $0x78] sm:$0xff]  ;;  %v4027_v3 = vpack.i.bf16 %v4520_v1, %v4518_v63  ;;  %v4525_v4 = vld [vmem:[#allocation5 + $0xa0] sm:$0xff]  ;;  %v4527_v5 = vld [vmem:[#allocation5 + $0xa8] sm:$0xff]  ;;  %vm1104_vm10 = vcmask 1045504  }
  0x30   :  { %155 = vrot.lane.b32.xlu0 %v150_v21, %s4373_s25  ;;  %248 = vrot.lane.b32.xlu1 %v243_v22, %s4374_s26  ;;  %v4032_v37 = vpack.i.bf16 %v4484_v36, %v4482_v35  ;;  %v4491_v39 = vld [vmem:[#allocation5 + $0xd8] sm:$0xff]  ;;  %v4037_v6 = vpack.i.bf16 %v4527_v5, %v4525_v4  ;;  %v4532_v7 = vld [vmem:[#allocation5 + $0x100] sm:$0xff]  ;;  %v4534_v8 = vld [vmem:[#allocation5 + $0x108] sm:$0xff]  ;;  %vm1106_vm11 = vcmask 1046528   ;;  %vm3289_vm12 = vcmask 27648  }
  0x31   :  { %3620 = vmatpush1.bf16.msra.mxu1 %v3619_v14  ;;  %v4042_v40 = vpack.i.bf16 %v4491_v39, %v4489_v38  ;;  %v4498_v42 = vld [vmem:[#allocation5 + $0x138] sm:$0xff]  ;;  %v4047_v9 = vpack.i.bf16 %v4534_v8, %v4532_v7  ;;  %v4539_v10 = vld [vmem:[#allocation5 + $0x160] sm:$0xff]  ;;  %v4541_v11 = vld [vmem:[#allocation5 + $0x168] sm:$0xff] }
  0x32   :  { %v4052_v43 = vpack.i.bf16 %v4498_v42, %v4496_v41  ;;  %v4057_v12 = vpack.i.bf16 %v4541_v11, %v4539_v10 }
  0x34   :  { %157 = vrot.lane.b32.xlu0 %v154_v23, %s4373_s25  ;;  %250 = vrot.lane.b32.xlu1 %v247_v24, %s4374_s26 }
  0x38   :  { %273 = vrot.lane.b32.xlu0 %v272_v26, %s4374_s26 }
  0x3c   :  { %4023 = vrot.lane.b32.xlu0 %v4022_v34, %s4373_s25 }
  0x40   :  { %4033 = vrot.lane.b32.xlu0 %v4032_v37, %s4373_s25 }
  0x44   :  { %4043 = vrot.lane.b32.xlu0 %v4042_v40, %s4373_s25 }
  0x48   :  { %4053 = vrot.lane.b32.xlu0 %v4052_v43, %s4373_s25 }
  0xa2   :  { %v156_v44 = vpop.permute.xlu0 %155  ;;  %v249_v45 = vpop.permute.xlu1 %248 }
  0xa6   :  { %v158_v46 = vpop.permute.xlu0 %157  ;;  %v251_v47 = vpop.permute.xlu1 %250 }
  0xa7   :  { %v160_v48 = vsel %vm159_vm4, %v156_v44, %v158_v46  ;;  %v4507_v52 = vsel %vm163_vm3, %v249_v45, %v251_v47 }
  0xaa   :  { %v274_v57 = vpop.permute.xlu0 %273 }
  0xab   :  { %v4512_v59 = vsel %vm163_vm3, %v251_v47, %v274_v57 }
  0xae   :  { %v4024_v18 = vpop.permute.xlu0 %4023 }
  0xaf   :  { %v4026_v26 = vunpack.i.h.bf16 %v4024_v18 }
  0xb2   :  { %v4034_v22 = vpop.permute.xlu0 %4033 }
  0xb3   :  { %v4036_v40 = vunpack.i.h.bf16 %v4034_v22  ;;  %v4035_v43 = vunpack.i.l.bf16 %v4034_v22 }
  0xfd   :  { %v132_v28 = vpop.f32.mrb[0].mxu0 }
  0xfe   :  { %v133_v29 = vadd.f32 %v3307_v27, %v132_v28  ;;  %v3441_v30 = vpop.f32.mrb[1].mxu0  ;;  %v4025_v27 = vunpack.i.l.bf16 %v4024_v18 }
 0x100   :  { %4182 = vtanh.f32 %v133_v29  ;;  %v353_v29 = vsel %vm159_vm4, %v4025_v27, %v4026_v26 }
 0x10a   :  { %v4183_v31 = vpop.eup %4182 }
 0x10b   :  { %3310 = vmatmul.mubr.msk.f32.vlgmr.msra.gmra.mrb[0].mxu1 %vm163_vm3, %v4183_v31  ;;  %v4044_v31 = vpop.permute.xlu0 %4043 }
 0x10c   :  { %547 = vmatprep.mubr.f32.mxu1 %v4371_v0 }
 0x1de   :  { %v233_v49 = vpop.f32.mrb[0].mxu1 }
 0x1df   :  { %v4504_v50 = vadd.f32 %v233_v49, %v160_v48  ;;  %v235_v51 = vpop.f32.mrb[1].mxu1  ;;  %v4046_v48 = vunpack.i.h.bf16 %v4044_v31  ;;  %v4045_v49 = vunpack.i.l.bf16 %v4044_v31 }
 0x1e0   :  { %v4515_v61 = vadd.f32 %v235_v51, %v158_v46  ;;  %v355_v51 = vsel %vm159_vm4, %v4035_v43, %v4036_v40 }
 0x1e1   :  { %v254_v53 = vadd.f32 %v4507_v52, %v4504_v50  ;;  %v262_v13 = vadd.f32 %v251_v47, %v4504_v50 }
 0x1e3   :  { %v3311_v54 = vmul.f32 -1.442695, %v254_v53  ;;  %v3312_v14 = vmul.f32 -1.442695, %v262_v13 }
 0x1e5   :  { %4184 = vpow2.f32 %v3311_v54 }
 0x1ef   :  { %v4185_v55 = vpop.eup %4184 }
 0x1f0   :  { %v258_v56 = vadd.f32 1.0, %v4185_v55  ;;  %v4054_v55 = vpop.permute.xlu0 %4053 }
 0x1f2   :  { %4186 = vrcp.f32 %v258_v56 }
 0x1fc   :  { %v4187_v58 = vpop.eup %4186 }
 0x1fd   :  { %v277_v60 = vmul.f32 %v4187_v58, %v4512_v59 }
 0x1ff   :  { %v278_v62 = vadd.f32 %v277_v60, %v4515_v61  ;;  %v357_v60 = vsel %vm159_vm4, %v4045_v49, %v4046_v48 }
 0x201   :  { %4188 = vtanh.f32 %v278_v62 }
 0x202   :  { %4190 = vpow2.f32 %v3312_v14 }
 0x20b   :  { %v4189_v2 = vpop.eup %4188 }
 0x20c   :  { %282 = vrot.lane.b32.xlu1 %v4189_v2, %s4375_s29  ;;  %v4191_v15 = vpop.eup %4190 }
 0x20d   :  { %v266_v17 = vadd.f32 1.0, %v4191_v15 }
 0x20f   :  { %4192 = vrcp.f32 %v266_v17 }
 0x210   :  { %4028 = vrot.lane.b32.xlu1 %v4027_v3, %s4373_s25 }
 0x214   :  { %4038 = vrot.lane.b32.xlu1 %v4037_v6, %s4373_s25  ;;  %v4056_v6 = vunpack.i.h.bf16 %v4054_v55 }
 0x218   :  { %4048 = vrot.lane.b32.xlu1 %v4047_v9, %s4373_s25  ;;  %v4055_v9 = vunpack.i.l.bf16 %v4054_v55 }
 0x219   :  { %v4193_v21 = vpop.eup %4192 }
 0x21a   :  { %v280_v23 = vsub.f32 1.0, %v4193_v21  ;;  %v359_v17 = vsel %vm159_vm4, %v4055_v9, %v4056_v6 }
 0x21c   :  { %4058 = vrot.lane.b32.xlu1 %v4057_v12, %s4373_s25 }
 0x27e   :  { %v283_v24 = vpop.permute.xlu1 %282 }
 0x27f   :  { %v4548_v28 = vmul.f32 %v283_v24, %v280_v23 }
 0x281   :  { %303 = vrot.lane.b32.xlu0 %v4548_v28, %s4375_s29 }
 0x282   :  { %v4029_v30 = vpop.permute.xlu1 %4028 }
 0x283   :  { %v4031_v34 = vunpack.i.h.bf16 %v4029_v30  ;;  %v4030_v37 = vunpack.i.l.bf16 %v4029_v30 }
 0x285   :  { %v4553_v44 = vpack.c.bf16 %v4031_v34, %v4026_v26  ;;  %v354_v45 = vsel %vm159_vm4, %v4030_v37, %v4031_v34 }
 0x286   :  { %v4556_v46 = vpack.c.bf16 %v354_v45, %v353_v29  ;;  %v4039_v47 = vpop.permute.xlu1 %4038 }
 0x287   :  { %v4041_v53 = vunpack.i.h.bf16 %v4039_v47  ;;  %v4040_v54 = vunpack.i.l.bf16 %v4039_v47  ;;  %3622 = vmatprep.subr.bf16.mxu0 %v4553_v44  ;;  %3638 = vmatprep.subr.bf16.mxu1 %v4553_v44 }
 0x288   :  { %3624 = vmatpush1.bf16.msra.mxu0 %v4556_v46  ;;  %3640 = vmatpush1.bf16.msra.mxu1 %v4556_v46 }
 0x289   :  { %v4563_v56 = vpack.c.bf16 %v4041_v53, %v4036_v40  ;;  %v356_v57 = vsel %vm159_vm4, %v4040_v54, %v4041_v53  ;;  %v473_v54 = vrot.slane %v4548_v28, 7 }
 0x28a   :  { %v4566_v58 = vpack.c.bf16 %v356_v57, %v355_v51  ;;  %v4049_v62 = vpop.permute.xlu1 %4048 }
 0x28b   :  { %v4051_v2 = vunpack.i.h.bf16 %v4049_v62  ;;  %v4050_v3 = vunpack.i.l.bf16 %v4049_v62  ;;  %3626 = vmatprep.subr.bf16.mxu0 %v4563_v56  ;;  %3642 = vmatprep.subr.bf16.mxu1 %v4563_v56 }
 0x28c   :  { %3628 = vmatpush1.bf16.msra.mxu0 %v4566_v58  ;;  %3644 = vmatpush1.bf16.msra.mxu1 %v4566_v58 }
 0x28d   :  { %v4573_v12 = vpack.c.bf16 %v4051_v2, %v4046_v48  ;;  %v358_v13 = vsel %vm159_vm4, %v4050_v3, %v4051_v2 }
 0x28e   :  { %v4576_v14 = vpack.c.bf16 %v358_v13, %v357_v60  ;;  %v4059_v15 = vpop.permute.xlu1 %4058 }
 0x28f   :  { %v4061_v18 = vunpack.i.h.bf16 %v4059_v15  ;;  %v4060_v21 = vunpack.i.l.bf16 %v4059_v15  ;;  %3630 = vmatprep.subr.bf16.mxu0 %v4573_v12  ;;  %3646 = vmatprep.subr.bf16.mxu1 %v4573_v12 }
 0x290   :  { %3632 = vmatpush1.bf16.msra.mxu0 %v4576_v14  ;;  %3648 = vmatpush1.bf16.msra.mxu1 %v4576_v14 }
 0x291   :  { %v4583_v22 = vpack.c.bf16 %v4061_v18, %v4056_v6  ;;  %v360_v23 = vsel %vm159_vm4, %v4060_v21, %v4061_v18 }
 0x292   :  { %v4586_v24 = vpack.c.bf16 %v360_v23, %v359_v17 }
 0x293   :  { %3634 = vmatprep.subr.bf16.mxu0 %v4583_v22  ;;  %3650 = vmatprep.subr.bf16.mxu1 %v4583_v22 }
 0x294   :  { %3636 = vmatpush1.bf16.msra.mxu0 %v4586_v24  ;;  %3652 = vmatpush1.bf16.msra.mxu1 %v4586_v24 }
 0x295   :  { %3654 = vmatprep.subr.bf16.mxu0 %v4553_v44  ;;  %3670 = vmatprep.subr.bf16.mxu1 %v4553_v44 }
 0x2f3   :  { %v304_v26 = vpop.permute.xlu0 %303 }
 0x2f4   :  { %3313 = vmatmul.mubr.msk.f32.vlgmr.msra.gmra.mrb[2].mxu0 %vm377_vm5, %v304_v26 }
 0x2f5   :  { %3656 = vmatpush1.bf16.msra.mxu0 %v4556_v46  ;;  %650 = vmatprep.mubr.f32.mxu0 %v4371_v0 }
 0x2f6   :  { %3658 = vmatprep.subr.bf16.mxu0 %v4563_v56 }
 0x2f9   :  { %3660 = vmatpush1.bf16.msra.mxu0 %v4566_v58 }
 0x2fa   :  { %3662 = vmatprep.subr.bf16.mxu0 %v4573_v12 }
 0x2fd   :  { %3664 = vmatpush1.bf16.msra.mxu0 %v4576_v14 }
 0x2fe   :  { %3666 = vmatprep.subr.bf16.mxu0 %v4583_v22 }
 0x301   :  { %3668 = vmatpush1.bf16.msra.mxu0 %v4586_v24 }
 0x302   :  { %3686 = vmatprep.subr.bf16.mxu0 %v4553_v44 }
 0x3c7   :  { %v446_v27 = vpop.f32.mrb[2].mxu0 }
 0x3c8   :  { %v447_v29 = vadd.f32 %v446_v27, %v4507_v52  ;;  %v448_v30 = vpop.f32.mrb[3].mxu0 }
 0x3c9   :  { %v449_v45 = vadd.f32 %v448_v30, %v4512_v59 }
 0x3ca   :  { %v452_v31 = vrot.slane %v447_v29, 7 }
 0x3cb   :  { %v462_v47 = vrot.slane %v449_v45, 7 }
 0x3cc   :  { %v454_v34 = vadd.f32 %v452_v31, %v4504_v50 }
 0x3ce   :  { %v3314_v37 = vmul.f32 -1.442695, %v454_v34 }
 0x3d0   :  { %4194 = vpow2.f32 %v3314_v37 }
 0x3da   :  { %v4195_v40 = vpop.eup %4194 }
 0x3db   :  { %v458_v43 = vadd.f32 1.0, %v4195_v40 }
 0x3dd   :  { %4196 = vrcp.f32 %v458_v43 }
 0x3e7   :  { %v4197_v48 = vpop.eup %4196 }
 0x3e8   :  { %v464_v49 = vmul.f32 %v4197_v48, %v462_v47  ;;  %v467_v55 = vsub.f32 1.0, %v4197_v48  ;;  %v475_v60 = vmul.f32 %v4197_v48, %v473_v54 }
 0x3ea   :  { %v465_v51 = vadd.f32 %v464_v49, %v4515_v61 }
 0x3ec   :  { %4198 = vtanh.f32 %v465_v51 }
 0x3f6   :  { %v4199_v53 = vpop.eup %4198 }
 0x3f7   :  { %469 = vrot.lane.b32.xlu1 %v4199_v53, %s4375_s29 }
 0x469   :  { %v470_v57 = vpop.permute.xlu1 %469 }
 0x46a   :  { %v472_v62 = vmul.f32 %v470_v57, %v467_v55 }
 0x46c   :  { %v476_v2 = vadd.f32 %v475_v60, %v472_v62 }
 0x46e   :  { %v478_v3 = vrot.slane %v476_v2, 1  ;;  %v576_v30 = vrot.slane %v476_v2, 7  ;;  %v1096_v51 = vsel %vm1095_vm6, %v4548_v28, %v476_v2 }
 0x470   :  { %479 = vrot.lane.b32.xlu0 %v478_v3, %s4375_s29 }
 0x4e2   :  { %v480_v6 = vpop.permute.xlu0 %479 }
 0x4e3   :  { %3315 = vmatmul.mubr.msk.f32.vlgmr.msra.gmra.mrb[2].mxu1 %vm377_vm5, %v480_v6 }
 0x4e4   :  { %3672 = vmatpush1.bf16.msra.mxu1 %v4556_v46  ;;  %753 = vmatprep.mubr.f32.mxu1 %v4371_v0 }
 0x4e5   :  { %3674 = vmatprep.subr.bf16.mxu1 %v4563_v56 }
 0x4e8   :  { %3676 = vmatpush1.bf16.msra.mxu1 %v4566_v58 }
 0x4e9   :  { %3678 = vmatprep.subr.bf16.mxu1 %v4573_v12 }
 0x4ec   :  { %3680 = vmatpush1.bf16.msra.mxu1 %v4576_v14 }
 0x4ed   :  { %3682 = vmatprep.subr.bf16.mxu1 %v4583_v22 }
 0x4f0   :  { %3684 = vmatpush1.bf16.msra.mxu1 %v4586_v24 }
 0x4f1   :  { %3702 = vmatprep.subr.bf16.mxu1 %v4553_v44 }
 0x5b6   :  { %v549_v9 = vpop.f32.mrb[2].mxu1 }
 0x5b7   :  { %v550_v13 = vadd.f32 %v549_v9, %v4507_v52  ;;  %v551_v15 = vpop.f32.mrb[3].mxu1 }
 0x5b8   :  { %v552_v27 = vadd.f32 %v551_v15, %v4512_v59 }
 0x5b9   :  { %v555_v17 = vrot.slane %v550_v13, 6 }
 0x5ba   :  { %v565_v29 = vrot.slane %v552_v27, 6 }
 0x5bb   :  { %v557_v18 = vadd.f32 %v555_v17, %v4504_v50 }
 0x5bd   :  { %v3316_v21 = vmul.f32 -1.442695, %v557_v18 }
 0x5bf   :  { %4200 = vpow2.f32 %v3316_v21 }
 0x5c9   :  { %v4201_v23 = vpop.eup %4200 }
 0x5ca   :  { %v561_v26 = vadd.f32 1.0, %v4201_v23 }
 0x5cc   :  { %4202 = vrcp.f32 %v561_v26 }
 0x5d6   :  { %v4203_v31 = vpop.eup %4202 }
 0x5d7   :  { %v567_v34 = vmul.f32 %v4203_v31, %v565_v29  ;;  %v578_v37 = vmul.f32 %v4203_v31, %v576_v30  ;;  %v570_v45 = vsub.f32 1.0, %v4203_v31 }
 0x5d9   :  { %v568_v40 = vadd.f32 %v567_v34, %v4515_v61 }
 0x5db   :  { %4204 = vtanh.f32 %v568_v40 }
 0x5e5   :  { %v4205_v43 = vpop.eup %4204 }
 0x5e6   :  { %572 = vrot.lane.b32.xlu1 %v4205_v43, %s4375_s29 }
 0x658   :  { %v573_v47 = vpop.permute.xlu1 %572 }
 0x659   :  { %v575_v48 = vmul.f32 %v573_v47, %v570_v45 }
 0x65b   :  { %v579_v49 = vadd.f32 %v578_v37, %v575_v48 }
 0x65d   :  { %v1098_v53 = vsel %vm1097_vm7, %v1096_v51, %v579_v49  ;;  %v581_v54 = vrot.slane %v579_v49, 2  ;;  %v679_v17 = vrot.slane %v579_v49, 7 }
 0x65f   :  { %582 = vrot.lane.b32.xlu0 %v581_v54, %s4375_s29 }
 0x6d1   :  { %v583_v55 = vpop.permute.xlu0 %582 }
 0x6d2   :  { %3317 = vmatmul.mubr.msk.f32.vlgmr.msra.gmra.mrb[4].mxu0 %vm377_vm5, %v583_v55 }
 0x6d3   :  { %3688 = vmatpush1.bf16.msra.mxu0 %v4556_v46  ;;  %856 = vmatprep.mubr.f32.mxu0 %v4371_v0 }
 0x6d4   :  { %3690 = vmatprep.subr.bf16.mxu0 %v4563_v56 }
 0x6d7   :  { %3692 = vmatpush1.bf16.msra.mxu0 %v4566_v58 }
 0x6d8   :  { %3694 = vmatprep.subr.bf16.mxu0 %v4573_v12 }
 0x6db   :  { %3696 = vmatpush1.bf16.msra.mxu0 %v4576_v14 }
 0x6dc   :  { %3698 = vmatprep.subr.bf16.mxu0 %v4583_v22 }
 0x6df   :  { %3700 = vmatpush1.bf16.msra.mxu0 %v4586_v24 }
 0x6e0   :  { %3718 = vmatprep.subr.bf16.mxu0 %v4553_v44 }
 0x7a5   :  { %v652_v28 = vpop.f32.mrb[4].mxu0 }
 0x7a6   :  { %v653_v57 = vadd.f32 %v652_v28, %v4507_v52  ;;  %v654_v60 = vpop.f32.mrb[5].mxu0 }
 0x7a7   :  { %v655_v13 = vadd.f32 %v654_v60, %v4512_v59 }
 0x7a8   :  { %v658_v62 = vrot.slane %v653_v57, 5 }
 0x7a9   :  { %v668_v15 = vrot.slane %v655_v13, 5 }
 0x7aa   :  { %v660_v2 = vadd.f32 %v658_v62, %v4504_v50 }
 0x7ac   :  { %v3318_v3 = vmul.f32 -1.442695, %v660_v2 }
 0x7ae   :  { %4206 = vpow2.f32 %v3318_v3 }
 0x7b8   :  { %v4207_v6 = vpop.eup %4206 }
 0x7b9   :  { %v664_v9 = vadd.f32 1.0, %v4207_v6 }
 0x7bb   :  { %4208 = vrcp.f32 %v664_v9 }
 0x7c5   :  { %v4209_v18 = vpop.eup %4208 }
 0x7c6   :  { %v670_v21 = vmul.f32 %v4209_v18, %v668_v15  ;;  %v681_v23 = vmul.f32 %v4209_v18, %v679_v17  ;;  %v673_v27 = vsub.f32 1.0, %v4209_v18 }
 0x7c8   :  { %v671_v44 = vadd.f32 %v670_v21, %v4515_v61 }
 0x7ca   :  { %4210 = vtanh.f32 %v671_v44 }
 0x7d4   :  { %v4211_v26 = vpop.eup %4210 }
 0x7d5   :  { %675 = vrot.lane.b32.xlu1 %v4211_v26, %s4375_s29 }
 0x847   :  { %v676_v29 = vpop.permute.xlu1 %675 }
 0x848   :  { %v678_v30 = vmul.f32 %v676_v29, %v673_v27 }
 0x84a   :  { %v682_v31 = vadd.f32 %v681_v23, %v678_v30 }
 0x84c   :  { %v1100_v34 = vsel %vm1099_vm8, %v1098_v53, %v682_v31  ;;  %v684_v37 = vrot.slane %v682_v31, 3  ;;  %v782_v57 = vrot.slane %v682_v31, 7 }
 0x84e   :  { %685 = vrot.lane.b32.xlu0 %v684_v37, %s4375_s29 }
 0x8c0   :  { %v686_v40 = vpop.permute.xlu0 %685 }
 0x8c1   :  { %3319 = vmatmul.mubr.msk.f32.vlgmr.msra.gmra.mrb[4].mxu1 %vm377_vm5, %v686_v40 }
 0x8c2   :  { %3704 = vmatpush1.bf16.msra.mxu1 %v4556_v46  ;;  %959 = vmatprep.mubr.f32.mxu1 %v4371_v0 }
 0x8c3   :  { %3706 = vmatprep.subr.bf16.mxu1 %v4563_v56 }
 0x8c6   :  { %3708 = vmatpush1.bf16.msra.mxu1 %v4566_v58 }
 0x8c7   :  { %3710 = vmatprep.subr.bf16.mxu1 %v4573_v12 }
 0x8ca   :  { %3712 = vmatpush1.bf16.msra.mxu1 %v4576_v14 }
 0x8cb   :  { %3714 = vmatprep.subr.bf16.mxu1 %v4583_v22 }
 0x8ce   :  { %3716 = vmatpush1.bf16.msra.mxu1 %v4586_v24 }
 0x994   :  { %v755_v43 = vpop.f32.mrb[4].mxu1 }
 0x995   :  { %v756_v45 = vadd.f32 %v755_v43, %v4507_v52  ;;  %v757_v47 = vpop.f32.mrb[5].mxu1 }
 0x996   :  { %v758_v55 = vadd.f32 %v757_v47, %v4512_v59 }
 0x997   :  { %v761_v48 = vrot.slane %v756_v45, 4 }
 0x998   :  { %v771_v28 = vrot.slane %v758_v55, 4 }
 0x999   :  { %v763_v49 = vadd.f32 %v761_v48, %v4504_v50 }
 0x99b   :  { %v3320_v51 = vmul.f32 -1.442695, %v763_v49 }
 0x99d   :  { %4212 = vpow2.f32 %v3320_v51 }
 0x9a7   :  { %v4213_v53 = vpop.eup %4212 }
 0x9a8   :  { %v767_v54 = vadd.f32 1.0, %v4213_v53 }
 0x9aa   :  { %4214 = vrcp.f32 %v767_v54 }
 0x9b4   :  { %v4215_v60 = vpop.eup %4214 }
 0x9b5   :  { %v773_v62 = vmul.f32 %v4215_v60, %v771_v28  ;;  %v784_v2 = vmul.f32 %v4215_v60, %v782_v57  ;;  %v776_v9 = vsub.f32 1.0, %v4215_v60 }
 0x9b7   :  { %v774_v3 = vadd.f32 %v773_v62, %v4515_v61 }
 0x9b9   :  { %4216 = vtanh.f32 %v774_v3 }
 0x9c3   :  { %v4217_v6 = vpop.eup %4216 }
 0x9c4   :  { %778 = vrot.lane.b32.xlu1 %v4217_v6, %s4375_s29 }
 0xa36   :  { %v779_v13 = vpop.permute.xlu1 %778 }
 0xa37   :  { %v781_v15 = vmul.f32 %v779_v13, %v776_v9 }
 0xa39   :  { %v785_v17 = vadd.f32 %v784_v2, %v781_v15 }
 0xa3b   :  { %v1101_v18 = vsel %vm62_vm1, %v1100_v34, %v785_v17  ;;  %v787_v21 = vrot.slane %v785_v17, 4 }
 0xa3d   :  { %788 = vrot.lane.b32.xlu0 %v787_v21, %s4375_s29 }
 0xaaf   :  { %v789_v23 = vpop.permute.xlu0 %788 }
 0xab0   :  { %3321 = vmatmul.mubr.msk.f32.vlgmr.msra.gmra.mrb[6].mxu0 %vm377_vm5, %v789_v23 }
 0xab1   :  { %3720 = vmatpush1.bf16.msra.mxu0 %v4556_v46  ;;  %1062 = vmatprep.mubr.f32.mxu0 %v4371_v0 }
 0xab2   :  { %3722 = vmatprep.subr.bf16.mxu0 %v4563_v56 }
 0xab5   :  { %3724 = vmatpush1.bf16.msra.mxu0 %v4566_v58 }
 0xab6   :  { %3726 = vmatprep.subr.bf16.mxu0 %v4573_v12 }
 0xab9   :  { %3728 = vmatpush1.bf16.msra.mxu0 %v4576_v14  ;;  %v885_v14 = vrot.slane %v785_v17, 7 }
 0xaba   :  { %3730 = vmatprep.subr.bf16.mxu0 %v4583_v22 }
 0xabd   :  { %3732 = vmatpush1.bf16.msra.mxu0 %v4586_v24 }
 0xb83   :  { %v858_v44 = vpop.f32.mrb[6].mxu0 }
 0xb84   :  { %v859_v26 = vadd.f32 %v858_v44, %v4507_v52  ;;  %v860_v27 = vpop.f32.mrb[7].mxu0 }
 0xb85   :  { %v861_v58 = vadd.f32 %v860_v27, %v4512_v59 }
 0xb86   :  { %v864_v29 = vrot.slane %v859_v26, 3 }
 0xb87   :  { %v874_v12 = vrot.slane %v861_v58, 3 }
 0xb88   :  { %v866_v46 = vadd.f32 %v864_v29, %v4504_v50 }
 0xb8a   :  { %v3322_v30 = vmul.f32 -1.442695, %v866_v46 }
 0xb8c   :  { %4218 = vpow2.f32 %v3322_v30 }
 0xb96   :  { %v4219_v56 = vpop.eup %4218 }
 0xb97   :  { %v870_v31 = vadd.f32 1.0, %v4219_v56 }
 0xb99   :  { %4220 = vrcp.f32 %v870_v31  ;;  %v4691_v31 = vld [vmem:[#allocation5 + $0x20] sm:$0xff] }
 0xb9a   :  { %v4062_v58 = vpack.i.bf16 %v4691_v31, %v4477_v33 }
 0xba3   :  { %v4221_v34 = vpop.eup %4220 }
 0xba4   :  { %v876_v22 = vmul.f32 %v4221_v34, %v874_v12  ;;  %v887_v37 = vmul.f32 %v4221_v34, %v885_v14  ;;  %v879_v43 = vsub.f32 1.0, %v4221_v34  ;;  %v4696_v12 = vld [vmem:[#allocation5 + $0x80] sm:$0xff] }
 0xba5   :  { %v4072_v14 = vpack.i.bf16 %v4696_v12, %v4484_v36  ;;  %v4701_v34 = vld [vmem:[#allocation5 + $0xe0] sm:$0xff] }
 0xba6   :  { %v877_v24 = vadd.f32 %v876_v22, %v4515_v61  ;;  %v4082_v22 = vpack.i.bf16 %v4701_v34, %v4491_v39 }
 0xba8   :  { %4222 = vtanh.f32 %v877_v24 }
 0xbb2   :  { %v4223_v40 = vpop.eup %4222 }
 0xbb3   :  { %881 = vrot.lane.b32.xlu1 %v4223_v40, %s4375_s29 }
 0xc25   :  { %v882_v45 = vpop.permute.xlu1 %881 }
 0xc26   :  { %v884_v47 = vmul.f32 %v882_v45, %v879_v43 }
 0xc28   :  { %v888_v48 = vadd.f32 %v887_v37, %v884_v47  ;;  %v4706_v37 = vld [vmem:[#allocation5 + $0x140] sm:$0xff] }
 0xc29   :  { %v4092_v33 = vpack.i.bf16 %v4706_v37, %v4498_v42 }
 0xc2a   :  { %v890_v49 = vrot.slane %v888_v48, 5  ;;  %v1103_v51 = vsel %vm1102_vm9, %v1101_v18, %v888_v48  ;;  %v988_v13 = vrot.slane %v888_v48, 7 }
 0xc2c   :  { %891 = vrot.lane.b32.xlu0 %v890_v49, %s4375_s29 }
 0xc9e   :  { %v892_v53 = vpop.permute.xlu0 %891 }
 0xc9f   :  { %3323 = vmatmul.mubr.msk.f32.vlgmr.msra.gmra.mrb[6].mxu1 %vm377_vm5, %v892_v53 }
 0xca0   :  { %3458 = vmatprep.mubr.msk.f32.mxu1 %vm4372_vm0, %v4371_v0 }
 0xd72   :  { %v961_v54 = vpop.f32.mrb[6].mxu1 }
 0xd73   :  { %v962_v55 = vadd.f32 %v961_v54, %v4507_v52  ;;  %v963_v28 = vpop.f32.mrb[7].mxu1 }
 0xd74   :  { %v964_v6 = vadd.f32 %v963_v28, %v4512_v59 }
 0xd75   :  { %v967_v57 = vrot.slane %v962_v55, 2 }
 0xd76   :  { %v977_v9 = vrot.slane %v964_v6, 2 }
 0xd77   :  { %v969_v60 = vadd.f32 %v967_v57, %v4504_v50  ;;  %v1274_v57 = vld [vmem:[#allocation5 + $0x8] sm:$0xff] }
 0xd79   :  { %v3324_v62 = vmul.f32 -1.442695, %v969_v60  ;;  %v1277_v60 = vld [vmem:[#allocation5 + $0x38] sm:$0xff] }
 0xd7b   :  { %4224 = vpow2.f32 %v3324_v62 }
 0xd85   :  { %v4225_v2 = vpop.eup %4224 }
 0xd86   :  { %v973_v3 = vadd.f32 1.0, %v4225_v2  ;;  %v4376_v2 = vmov 0.0|0.0  }
 0xd87   :  { %3733 = vmatprep.subr.bf16.mxu1 %v4376_v2 }
 0xd88   :  { %4226 = vrcp.f32 %v973_v3  ;;  %v4718_v3 = vpack.c.bf16 %v1277_v60, %v1274_v57 }
 0xd8a   :  { %3746 = vmatprep.subr.bf16.mxu0 %v4718_v3 }
 0xd92   :  { %v4227_v15 = vpop.eup %4226 }
 0xd93   :  { %v979_v17 = vmul.f32 %v4227_v15, %v977_v9  ;;  %v990_v18 = vmul.f32 %v4227_v15, %v988_v13  ;;  %v982_v44 = vsub.f32 1.0, %v4227_v15  ;;  %v1280_v13 = vld [vmem:[#allocation5 + $0x68] sm:$0xff]  ;;  %v1283_v15 = vld [vmem:[#allocation5 + $0x98] sm:$0xff] }
 0xd95   :  { %v980_v21 = vadd.f32 %v979_v17, %v4515_v61  ;;  %v1279_v17 = vld [vmem:[#allocation5 + $0x60] sm:$0xff] }
 0xd97   :  { %4228 = vtanh.f32 %v980_v21  ;;  %v1282_v21 = vld [vmem:[#allocation5 + $0x90] sm:$0xff] }
 0xda1   :  { %v4229_v23 = vpop.eup %4228 }
 0xda2   :  { %984 = vrot.lane.b32.xlu1 %v4229_v23, %s4375_s29 }
 0xe14   :  { %v985_v26 = vpop.permute.xlu1 %984 }
 0xe15   :  { %v987_v27 = vmul.f32 %v985_v26, %v982_v44  ;;  %v4736_v44 = vld [vmem:[#allocation5 + $0x110] sm:$0xff]  ;;  %v1286_v26 = vld [vmem:[#allocation5 + $0xc8] sm:$0xff] }
 0xe17   :  { %v991_v29 = vadd.f32 %v990_v18, %v987_v27  ;;  %v4729_v18 = vpack.c.bf16 %v1283_v15, %v1280_v13  ;;  %v1289_v27 = vld [vmem:[#allocation5 + $0xf8] sm:$0xff] }
 0xe19   :  { %v993_v46 = vrot.slane %v991_v29, 6  ;;  %v4686_v30 = vsel %vm1104_vm10, %v1103_v51, %v991_v29  ;;  %v1091_v53 = vrot.slane %v991_v29, 7  ;;  %v1285_v29 = vld [vmem:[#allocation5 + $0xc0] sm:$0xff] }
 0xe1b   :  { %994 = vrot.lane.b32.xlu0 %v993_v46, %s4375_s29  ;;  %v4740_v46 = vpack.c.bf16 %v1289_v27, %v1286_v26  ;;  %v3327_v27 = vld [vmem:[%s5286_s4 + $0x3] ss:$0 sm:$0xff] }
 0xe1f   :  { %4063 = vrot.lane.b32.xlu0 %v4062_v58, %s4374_s26  ;;  %v4087_v58 = vpack.i.bf16 %v4736_v44, %v4534_v8 }
 0xe23   :  { %4073 = vrot.lane.b32.xlu0 %v4072_v14, %s4374_s26  ;;  %v1292_v14 = vld [vmem:[#allocation5 + $0x128] sm:$0xff] }
 0xe27   :  { %4083 = vrot.lane.b32.xlu0 %v4082_v22, %s4374_s26  ;;  %v1295_v22 = vld [vmem:[#allocation5 + $0x158] sm:$0xff] }
 0xe2b   :  { %4093 = vrot.lane.b32.xlu0 %v4092_v33, %s4374_s26  ;;  %v1291_v33 = vld [vmem:[#allocation5 + $0x120] sm:$0xff] }
 0xe8d   :  { %v995_v56 = vpop.permute.xlu0 %994 }
 0xe8e   :  { %3325 = vmatmul.mubr.msk.f32.vlgmr.msra.gmra.mrb[8].mxu0 %vm377_vm5, %v995_v56  ;;  %v1288_v56 = vld [vmem:[#allocation5 + $0xf0] sm:$0xff] }
 0xe8f   :  { %1394 = vmatprep.mubr.f32.mxu0 %v4371_v0 }
 0xf61   :  { %v1064_v24 = vpop.f32.mrb[8].mxu0 }
 0xf62   :  { %v1065_v40 = vadd.f32 %v1064_v24, %v4507_v52  ;;  %v1066_v36 = vpop.f32.mrb[9].mxu0  ;;  %v4715_v52 = vld [vmem:[#allocation5 + $0x50] sm:$0xff] }
 0xf63   :  { %v1067_v49 = vadd.f32 %v1066_v36, %v4512_v59  ;;  %v1276_v59 = vld [vmem:[#allocation5 + $0x30] sm:$0xff]  ;;  %v4067_v6 = vpack.i.bf16 %v4715_v52, %v4520_v1  ;;  %v4734_v1 = vpack.c.bf16 %v1282_v21, %v1279_v17 }
 0xf64   :  { %v1070_v43 = vrot.slane %v1065_v40, 1  ;;  %v4747_v24 = vld [vmem:[#allocation5 + $0x170] sm:$0xff]  ;;  %v4750_v40 = vpack.c.bf16 %v1295_v22, %v1292_v14 }
 0xf65   :  { %v1080_v51 = vrot.slane %v1067_v49, 1  ;;  %v1294_v36 = vld [vmem:[#allocation5 + $0x150] sm:$0xff]  ;;  %v4097_v8 = vpack.i.bf16 %v4747_v24, %v4541_v11 }
 0xf66   :  { %v1072_v45 = vadd.f32 %v1070_v43, %v4504_v50  ;;  %v1273_v50 = vld [vmem:[#allocation5] sm:$0xff]  ;;  %v4753_v43 = vpack.c.bf16 %v1294_v36, %v1291_v33 }
 0xf67   :  { %v4723_v9 = vpack.c.bf16 %v1276_v59, %v1273_v50 }
 0xf68   :  { %v3326_v47 = vmul.f32 -1.442695, %v1072_v45  ;;  %v4064_v45 = vpop.permute.xlu0 %4063 }
 0xf69   :  { %3748 = vmatpush1.bf16.msra.mxu0 %v4723_v9  ;;  %v4066_v49 = vunpack.i.h.bf16 %v4064_v45 }
 0xf6a   :  { %4230 = vpow2.f32 %v3326_v47  ;;  %3750 = vmatprep.subr.bf16.mxu0 %v4729_v18 }
 0xf6c   :  { %v4074_v47 = vpop.permute.xlu0 %4073 }
 0xf6d   :  { %3752 = vmatpush1.bf16.msra.mxu0 %v4734_v1  ;;  %v4076_v60 = vunpack.i.h.bf16 %v4074_v47  ;;  %v4075_v50 = vunpack.i.l.bf16 %v4074_v47 }
 0xf6e   :  { %3754 = vmatprep.subr.bf16.mxu0 %v4740_v46 }
 0xf70   :  { %v4084_v11 = vpop.permute.xlu0 %4083 }
 0xf71   :  { %v4086_v17 = vunpack.i.h.bf16 %v4084_v11  ;;  %v4085_v21 = vunpack.i.l.bf16 %v4084_v11 }
 0xf73   :  { %v1185_v22 = vsel %vm163_vm3, %v4085_v21, %v4086_v17 }
 0xf74   :  { %v4231_v48 = vpop.eup %4230 }
 0xf75   :  { %v1076_v39 = vadd.f32 1.0, %v4231_v48 }
 0xf77   :  { %4232 = vrcp.f32 %v1076_v39 }
 0xf81   :  { %v4233_v54 = vpop.eup %4232 }
 0xf82   :  { %v1082_v42 = vmul.f32 %v4233_v54, %v1080_v51  ;;  %v1093_v55 = vmul.f32 %v4233_v54, %v1091_v53  ;;  %v1085_v48 = vsub.f32 1.0, %v4233_v54  ;;  %v4065_v51 = vunpack.i.l.bf16 %v4064_v45 }
 0xf84   :  { %v1083_v28 = vadd.f32 %v1082_v42, %v4515_v61  ;;  %v4725_v61 = vld [vmem:[#allocation5 + $0xb0] sm:$0xff]  ;;  %v1181_v57 = vsel %vm163_vm3, %v4065_v51, %v4066_v49 }
 0xf85   :  { %v4077_v23 = vpack.i.bf16 %v4725_v61, %v4527_v5  ;;  %v4745_v5 = vpack.c.bf16 %v1288_v56, %v1285_v29  ;;  %v4094_v29 = vpop.permute.xlu0 %4093 }
 0xf86   :  { %4234 = vtanh.f32 %v1083_v28  ;;  %v4095_v45 = vunpack.i.l.bf16 %v4094_v29 }
 0xf87   :  { %3756 = vmatpush1.bf16.msra.mxu0 %v4745_v5 }
 0xf88   :  { %3758 = vmatprep.subr.bf16.mxu0 %v4750_v40 }
 0xf8b   :  { %3760 = vmatpush1.bf16.msra.mxu0 %v4753_v43 }
 0xf90   :  { %v4235_v62 = vpop.eup %4234 }
 0xf91   :  { %1087 = vrot.lane.b32.xlu1 %v4235_v62, %s4375_s29 }
 0xf95   :  { %4068 = vrot.lane.b32.xlu1 %v4067_v6, %s4374_s26 }
 0xf99   :  { %4078 = vrot.lane.b32.xlu1 %v4077_v23, %s4374_s26 }
 0xf9d   :  { %4088 = vrot.lane.b32.xlu1 %v4087_v58, %s4374_s26 }
 0xfa1   :  { %4098 = vrot.lane.b32.xlu1 %v4097_v8, %s4374_s26  ;;  %v4096_v8 = vunpack.i.h.bf16 %v4094_v29 }
0x1003   :  { %v1088_v39 = vpop.permute.xlu1 %1087 }
0x1004   :  { %v1090_v53 = vmul.f32 %v1088_v39, %v1085_v48 }
0x1006   :  { %v4761_v42 = vadd.f32 %v1093_v55, %v1090_v53  ;;  %v1187_v53 = vsel %vm163_vm3, %v4095_v45, %v4096_v8  ;;  %v4852_v45 = vld [vmem:[#allocation5 + $0xb8] sm:$0xff] }
0x1007   :  { %v4069_v28 = vpop.permute.xlu1 %4068 }
0x1008   :  { %v1107_v62 = vsel %vm1106_vm11, %v4686_v30, %v4761_v42  ;;  %v1325_v59 = vrot.slane %v4761_v42, 7  ;;  %v4071_v6 = vunpack.i.h.bf16 %v4069_v28  ;;  %v4070_v54 = vunpack.i.l.bf16 %v4069_v28 }
0x1009   :  { %1131 = vrot.lane.b32.xlu0 %v1107_v62, %s4375_s29  ;;  %v1183_v30 = vsel %vm163_vm3, %v4075_v50, %v4076_v60  ;;  %v4788_v60 = vpack.c.bf16 %v4518_v63, %v4475_v32  ;;  %v4798_v62 = vpack.c.bf16 %v4525_v4, %v4482_v35  ;;  %v4807_v32 = vpack.c.bf16 %v4532_v7, %v4489_v38  ;;  %v1272_v38 = vld [vmem:[%s5286_s4 + $0x3] sm:$0x3] }
0x100a   :  { %1326 = vrot.lane.b32.xlu1 %v1325_v59, %s4375_s29  ;;  %v1182_v55 = vsel %vm163_vm3, %v4070_v54, %v4071_v6  ;;  %v4813_v35 = vpack.c.bf16 %v4539_v10, %v4496_v41  ;;  %v1520_v63 = vrot.slane %v1272_v38, %v4453_v19 }
0x100b   :  { %v3734_v13 = vpack.c.bf16 %v1182_v55, %v1181_v57  ;;  %v4079_v15 = vpop.permute.xlu1 %4078  ;;  %v1524_v55 = vrot.slane %v1272_v38, %v4456_v20  ;;  %v4881_v38 = vld [vmem:[#allocation5 + $0x148] sm:$0xff] }
0x100c   :  { %v4081_v23 = vunpack.i.h.bf16 %v4079_v15  ;;  %v4080_v26 = vunpack.i.l.bf16 %v4079_v15 }
0x100d   :  { %3735 = vmatpush3.bf16.msra.mxu1 %v3734_v13  ;;  %1197 = vrot.lane.b32.xlu0 %v3327_v27, %s4373_s25 }
0x100e   :  { %v1184_v56 = vsel %vm163_vm3, %v4080_v26, %v4081_v23  ;;  %3736 = vmatprep.subr.bf16.mxu1 %v4376_v2 }
0x100f   :  { %v3737_v58 = vpack.c.bf16 %v1184_v56, %v1183_v30  ;;  %v4089_v14 = vpop.permute.xlu1 %4088 }
0x1010   :  { %v4091_v33 = vunpack.i.h.bf16 %v4089_v14  ;;  %v4090_v36 = vunpack.i.l.bf16 %v4089_v14 }
0x1011   :  { %3738 = vmatpush3.bf16.msra.mxu1 %v3737_v58  ;;  %1525 = vrot.lane.b32.xlu0 %v1520_v63, %s4373_s25  ;;  %v4132_v63 = vpack.i.bf16 %v4881_v38, %v4706_v37 }
0x1012   :  { %v1186_v47 = vsel %vm163_vm3, %v4090_v36, %v4091_v33  ;;  %3739 = vmatprep.subr.bf16.mxu1 %v4376_v2  ;;  %v4848_v36 = vld [vmem:[#allocation5 + $0x58] sm:$0xff] }
0x1013   :  { %v3740_v48 = vpack.c.bf16 %v1186_v47, %v1185_v22  ;;  %v4099_v39 = vpop.permute.xlu1 %4098  ;;  %v4107_v8 = vpack.i.bf16 %v4848_v36, %v4715_v52  ;;  %v4854_v47 = vld [vmem:[#allocation5 + $0x28] sm:$0xff] }
0x1014   :  { %v4101_v49 = vunpack.i.h.bf16 %v4099_v39  ;;  %v4100_v51 = vunpack.i.l.bf16 %v4099_v39  ;;  %v4102_v39 = vpack.i.bf16 %v4854_v47, %v4691_v31 }
0x1015   :  { %3741 = vmatpush3.bf16.msra.mxu1 %v3740_v48  ;;  %v4117_v48 = vpack.i.bf16 %v4852_v45, %v4725_v61  ;;  %v4873_v61 = vld [vmem:[#allocation5 + $0xe8] sm:$0xff] }
0x1016   :  { %v1188_v28 = vsel %vm163_vm3, %v4100_v51, %v4101_v49  ;;  %3742 = vmatprep.subr.bf16.mxu1 %v4376_v2  ;;  %v4861_v49 = vld [vmem:[#allocation5 + $0x118] sm:$0xff]  ;;  %v4863_v51 = vld [vmem:[#allocation5 + $0x88] sm:$0xff] }
0x1017   :  { %v3743_v57 = vpack.c.bf16 %v1188_v28, %v1187_v53  ;;  %v4127_v52 = vpack.i.bf16 %v4861_v49, %v4736_v44  ;;  %v4112_v53 = vpack.i.bf16 %v4863_v51, %v4696_v12  ;;  %v4871_v28 = vld [vmem:[#allocation5 + $0x178] sm:$0xff]  ;;  %v1297_v44 = vld [vmem:[#allocation2 + $0x8] sm:$0xff] }
0x1018   :  { %v4137_v31 = vpack.i.bf16 %v4871_v28, %v4747_v24 }
0x1019   :  { %3744 = vmatpush3.bf16.msra.mxu1 %v3743_v57  ;;  %v4122_v57 = vpack.i.bf16 %v4873_v61, %v4701_v34  ;;  %v1321_v34 = vld [vmem:[%s5286_s4 + $0x5] sm:$0x7] }
0x101a   :  { %3761 = vmatprep.subr.bf16.mxu1 %v4376_v2  ;;  %v1475_v37 = vrot.slane %v1321_v34, %v4453_v19 }
0x107b   :  { %v4790_v50 = vpop.permute.xlu0 %1131 }
0x107c   :  { %v1327_v11 = vpop.permute.xlu1 %1326  ;;  %3459 = vmatmul.mubr.msk.f32.vlgmr.msra.gmra.mrb[8].mxu1 %vm377_vm5, %v4790_v50 }
0x107d   :  { %3763 = vmatpush3.bf16.msra.mxu1 %v4788_v60  ;;  %3329 = vmatmul.mubr.msk.f32.vlgmr.msra.gmra.mrb[10].mxu0 %vm377_vm5, %v1327_v11 }
0x107e   :  { %3764 = vmatprep.subr.bf16.mxu1 %v4376_v2  ;;  %3477 = vmatprep.mubr.msk.f32.mxu1 %vm4372_vm0, %v4371_v0 }
0x107f   :  { %1713 = vmatprep.mubr.f32.mxu0 %v4371_v0  ;;  %v1198_v41 = vpop.permute.xlu0 %1197 }
0x1081   :  { %3766 = vmatpush3.bf16.msra.mxu1 %v4798_v62 }
0x1082   :  { %3767 = vmatprep.subr.bf16.mxu1 %v4376_v2 }
0x1083   :  { %v1526_v26 = vpop.permute.xlu0 %1525 }
0x1085   :  { %3769 = vmatpush3.bf16.msra.mxu1 %v4807_v32 }
0x1086   :  { %3770 = vmatprep.subr.bf16.mxu1 %v4376_v2 }
0x1089   :  { %3772 = vmatpush3.bf16.msra.mxu1 %v4813_v35 }
0x108a   :  { %3797 = vmatprep.subr.bf16.mxu1 %v4376_v2 }
0x108c   :  { %3478 = vmatmul.mubr.msk.f32.vlgmr.msra.gmra.mrb[10].mxu1 %vm377_vm5, %v1327_v11  ;;  %v1298_v11 = vld [vmem:[#allocation2 + $0x10] sm:$0xff] }
0x108d   :  { %3496 = vmatprep.mubr.msk.f32.mxu1 %vm4372_vm0, %v4371_v0  ;;  %v4142_v12 = vpack.i.bf16 %v1298_v11, %v1297_v44 }
0x114f   :  { %v1268_v4 = vpop.f32.mrb[8].mxu1 }
0x1150   :  { %v1269_v7 = vadd.f32 %v1268_v4, %v1198_v41  ;;  %v3460_v10 = vpop.f32.mrb[9].mxu1  ;;  %v4826_v6 = vpop.f32.mrb[10].mxu0  ;;  %v1301_v41 = vld [vmem:[#allocation2 + $0x38] sm:$0xff]  ;;  %v1302_v4 = vld [vmem:[#allocation2 + $0x40] sm:$0xff] }
0x1151   :  { %v4828_v54 = vpop.f32.mrb[11].mxu0  ;;  %v4152_v24 = vpack.i.bf16 %v1302_v4, %v1301_v41  ;;  %v1299_v10 = vld [vmem:[#allocation2 + $0x20] sm:$0xff] }
0x1152   :  { %1511 = vrot.lane.b32.xlu1 %v1269_v7, %s4375_s29  ;;  %v1509_v17 = vrot.slane %v4828_v54, %v4453_v19  ;;  %v3331_v7 = vld [vmem:[%s5286_s4 + $0x7] ss:$0 sm:$0xff] }
0x1156   :  { %1527 = vrot.lane.b32.xlu1 %v1524_v55, %s4373_s25  ;;  %v1300_v55 = vld [vmem:[#allocation2 + $0x28] sm:$0xff] }
0x115f   :  { %v4833_v13 = vpop.f32.mrb[10].mxu1 }
0x1160   :  { %v3479_v15 = vpop.f32.mrb[11].mxu1 }
0x1161   :  { %v4147_v15 = vpack.i.bf16 %v1300_v55, %v1299_v10 }
0x11c4   :  { %v4837_v21 = vpop.permute.xlu1 %1511 }
0x11c5   :  { %v1514_v23 = vadd.f32 %v4837_v21, %v1509_v17  ;;  %v1322_v17 = vld [vmem:[%s5286_s4 + $0x4] sm:$0x3] }
0x11c7   :  { %4236 = vtanh.f32 %v1514_v23  ;;  %v1303_v23 = vld [vmem:[#allocation2 + $0x50] sm:$0xff] }
0x11c8   :  { %v1528_v30 = vpop.permute.xlu1 %1527 }
0x11c9   :  { %v4841_v27 = vsel %vm159_vm4, %v1526_v26, %v1528_v30  ;;  %v1304_v26 = vld [vmem:[#allocation2 + $0x58] sm:$0xff]  ;;  %v1834_v30 = vrot.slane %v1322_v17, %v4453_v19 }
0x11d1   :  { %v4237_v29 = vpop.eup %4236 }
0x11d2   :  { %v1531_v56 = vmul.f32 %v4237_v29, %v4841_v27  ;;  %v4157_v29 = vpack.i.bf16 %v1304_v26, %v1303_v23 }
0x11d4   :  { %1539 = vrot.lane.b32.xlu1 %v1531_v56, %s4374_s26  ;;  %1533 = vrot.lane.b32.xlu0 %v1531_v56, %s4375_s29  ;;  %v1483_v56 = vrot.slane %v1321_v34, %v271_v25 }
0x1246   :  { %v1540_v58 = vpop.permute.xlu1 %1539  ;;  %v1534_v14 = vpop.permute.xlu0 %1533 }
0x1247   :  { %v1542_v22 = vsel %vm163_vm3, %v1540_v58, 0.0  ;;  %v1536_v33 = vsel %vm163_vm3, %v1534_v14, 0.0  ;;  %v1479_v58 = vrot.slane %v1321_v34, %v4456_v20  ;;  %v1838_v14 = vrot.slane %v1322_v17, %v4456_v20 }
0x1248   :  { %1543 = vadd.xlane.f32.xlu1 %v1542_v22  ;;  %1537 = vadd.xlane.f32.xlu0 %v1536_v33 }
0x1259   :  { %4108 = vrot.lane.b32.xlu1 %v4107_v8, %s4373_s25 }
0x125d   :  { %4118 = vrot.lane.b32.xlu1 %v4117_v48, %s4373_s25 }
0x125e   :  { %4103 = vrot.lane.b32.xlu0 %v4102_v39, %s4373_s25 }
0x1261   :  { %4128 = vrot.lane.b32.xlu1 %v4127_v52, %s4373_s25 }
0x1262   :  { %4113 = vrot.lane.b32.xlu0 %v4112_v53, %s4373_s25 }
0x1265   :  { %4138 = vrot.lane.b32.xlu1 %v4137_v31, %s4373_s25 }
0x1266   :  { %4123 = vrot.lane.b32.xlu0 %v4122_v57, %s4373_s25 }
0x1269   :  { %4143 = vrot.lane.b32.xlu1 %v4142_v12, %s4375_s29 }
0x126a   :  { %4133 = vrot.lane.b32.xlu0 %v4132_v63, %s4373_s25 }
0x126d   :  { %4153 = vrot.lane.b32.xlu1 %v4152_v24, %s4375_s29 }
0x126e   :  { %1501 = vrot.lane.b32.xlu0 %v3331_v7, %s4373_s25 }
0x1271   :  { %1484 = vrot.lane.b32.xlu1 %v1475_v37, %s4374_s26 }
0x1272   :  { %4148 = vrot.lane.b32.xlu0 %v4147_v15, %s4375_s29 }
0x1275   :  { %1839 = vrot.lane.b32.xlu1 %v1834_v30, %s4373_s25 }
0x1276   :  { %4158 = vrot.lane.b32.xlu0 %v4157_v29, %s4375_s29 }
0x1279   :  { %1488 = vrot.lane.b32.xlu1 %v1483_v56, %s4374_s26 }
0x127a   :  { %1486 = vrot.lane.b32.xlu0 %v1479_v58, %s4374_s26 }
0x127e   :  { %1841 = vrot.lane.b32.xlu0 %v1838_v14, %s4373_s25 }
0x12d5   :  { %v1544_v22 = vpop.xlane.xlu1 %1543  ;;  %v1538_v33 = vpop.xlane.xlu0 %1537 }
0x12d6   :  { %v1545_v8 = vsel %vm163_vm3, %v1538_v33, %v1544_v22 }
0x12d7   :  { %v1546_v48 = vsel %vm377_vm5, %v1545_v8, -inf }
0x12d8   :  { %v1547_v16 = vrot.slane %v1546_v48, 4 }
0x12d9   :  { %v4109_v25 = vpop.permute.xlu1 %4108  ;;  %v4104_v39 = vpop.permute.xlu0 %4103 }
0x12da   :  { %v1548_v52 = vmax.f32 %v1546_v48, %v1547_v16  ;;  %v4111_v53 = vunpack.i.h.bf16 %v4109_v25  ;;  %v4110_v31 = vunpack.i.l.bf16 %v4109_v25  ;;  %v4106_v57 = vunpack.i.h.bf16 %v4104_v39 }
0x12db   :  { %v4105_v44 = vunpack.i.l.bf16 %v4104_v39 }
0x12dc   :  { %v1549_v11 = vrot.slane %v1548_v52, 2  ;;  %v1623_v12 = vsel %vm159_vm4, %v4110_v31, %v4111_v53  ;;  %v4916_v20 = vpack.c.bf16 %v4111_v53, %v4106_v57 }
0x12dd   :  { %v1622_v63 = vsel %vm159_vm4, %v4105_v44, %v4106_v57  ;;  %v4119_v41 = vpop.permute.xlu1 %4118  ;;  %v4114_v4 = vpop.permute.xlu0 %4113 }
0x12de   :  { %v1550_v24 = vmax.f32 %v1548_v52, %v1549_v11  ;;  %v4919_v34 = vpack.c.bf16 %v1623_v12, %v1622_v63  ;;  %v4121_v7 = vunpack.i.h.bf16 %v4119_v41  ;;  %v4120_v10 = vunpack.i.l.bf16 %v4119_v41  ;;  %3774 = vmatprep.subr.bf16.mxu0 %v4916_v20 }
0x12df   :  { %v4116_v55 = vunpack.i.h.bf16 %v4114_v4  ;;  %v4115_v37 = vunpack.i.l.bf16 %v4114_v4 }
0x12e0   :  { %v1551_v15 = vrot.slane %v1550_v24, 1  ;;  %v1625_v17 = vsel %vm159_vm4, %v4120_v10, %v4121_v7  ;;  %3776 = vmatpush1.bf16.msra.mxu0 %v4919_v34 }
0x12e1   :  { %v4924_v23 = vpack.c.bf16 %v4121_v7, %v4116_v55  ;;  %v1624_v26 = vsel %vm159_vm4, %v4115_v37, %v4116_v55  ;;  %v4129_v30 = vpop.permute.xlu1 %4128  ;;  %v4124_v29 = vpop.permute.xlu0 %4123 }
0x12e2   :  { %v1552_v56 = vmax.f32 %v1550_v24, %v1551_v15  ;;  %v4927_v58 = vpack.c.bf16 %v1625_v17, %v1624_v26  ;;  %v4131_v14 = vunpack.i.h.bf16 %v4129_v30  ;;  %v4130_v22 = vunpack.i.l.bf16 %v4129_v30 }
0x12e3   :  { %v4126_v33 = vunpack.i.h.bf16 %v4124_v29  ;;  %v4125_v48 = vunpack.i.l.bf16 %v4124_v29  ;;  %3778 = vmatprep.subr.bf16.mxu0 %v4924_v23 }
0x12e4   :  { %v1553_v16 = vsub.f32 %v1545_v8, %v1552_v56  ;;  %v1627_v25 = vsel %vm159_vm4, %v4130_v22, %v4131_v14  ;;  %3780 = vmatpush1.bf16.msra.mxu0 %v4927_v58 }
0x12e5   :  { %v4932_v39 = vpack.c.bf16 %v4131_v14, %v4126_v33  ;;  %v1626_v52 = vsel %vm159_vm4, %v4125_v48, %v4126_v33  ;;  %v4139_v53 = vpop.permute.xlu1 %4138  ;;  %v4134_v31 = vpop.permute.xlu0 %4133 }
0x12e6   :  { %v1554_v57 = vmul.f32 1.442695, %v1553_v16  ;;  %v4935_v44 = vpack.c.bf16 %v1627_v25, %v1626_v52  ;;  %v4141_v11 = vunpack.i.h.bf16 %v4139_v53  ;;  %v4140_v12 = vunpack.i.l.bf16 %v4139_v53 }
0x12e7   :  { %v4136_v63 = vunpack.i.h.bf16 %v4134_v31  ;;  %v4135_v41 = vunpack.i.l.bf16 %v4134_v31  ;;  %3782 = vmatprep.subr.bf16.mxu0 %v4932_v39 }
0x12e8   :  { %4238 = vpow2.f32 %v1554_v57  ;;  %v1629_v8 = vsel %vm159_vm4, %v4140_v12, %v4141_v11  ;;  %3784 = vmatpush1.bf16.msra.mxu0 %v4935_v44 }
0x12e9   :  { %v4940_v4 = vpack.c.bf16 %v4141_v11, %v4136_v63  ;;  %v1628_v24 = vsel %vm159_vm4, %v4135_v41, %v4136_v63  ;;  %v4943_v7 = vpop.permute.xlu0 %1501  ;;  %v4144_v55 = vpop.permute.xlu1 %4143 }
0x12ea   :  { %v4945_v10 = vpack.c.bf16 %v1629_v8, %v1628_v24  ;;  %v4146_v37 = vunpack.i.h.bf16 %v4144_v55  ;;  %v4145_v11 = vunpack.i.l.bf16 %v4144_v55 }
0x12eb   :  { %3786 = vmatprep.subr.bf16.mxu0 %v4940_v4 }
0x12ec   :  { %3788 = vmatpush1.bf16.msra.mxu0 %v4945_v10  ;;  %v1744_v24 = vsel %vm377_vm5, %v4145_v11, %v4146_v37 }
0x12ed   :  { %v4149_v15 = vpop.permute.xlu0 %4148  ;;  %v4154_v41 = vpop.permute.xlu1 %4153 }
0x12ee   :  { %v4151_v17 = vunpack.i.h.bf16 %v4149_v15  ;;  %v4150_v12 = vunpack.i.l.bf16 %v4149_v15 }
0x12f0   :  { %v4949_v26 = vpack.c.bf16 %v4151_v17, %v4146_v37 }
0x12f1   :  { %v1485_v11 = vpop.permute.xlu1 %1484 }
0x12f2   :  { %v4239_v30 = vpop.eup %4238  ;;  %3790 = vmatprep.subr.bf16.mxu0 %v4949_v26 }
0x12f3   :  { %v1556_v29 = vsel %vm377_vm5, %v4239_v30, 0.0 }
0x12f4   :  { %v1557_v56 = vrot.slane %v1556_v29, 4 }
0x12f6   :  { %v1558_v14 = vadd.f32 %v1557_v56, %v1556_v29  ;;  %v1504_v29 = vadd.f32 %v4943_v7, %v4833_v13  ;;  %v4156_v56 = vunpack.i.h.bf16 %v4154_v41 }
0x12f8   :  { %v1559_v22 = vrot.slane %v1558_v14, 2 }
0x12fa   :  { %v1560_v33 = vadd.f32 %v1559_v22, %v1558_v14  ;;  %v4155_v14 = vunpack.i.l.bf16 %v4154_v41  ;;  %v4159_v22 = vpop.permute.xlu0 %4158  ;;  %v1840_v41 = vpop.permute.xlu1 %1839 }
0x12fc   :  { %v1561_v48 = vrot.slane %v1560_v33, 1  ;;  %v1746_v15 = vsel %vm377_vm5, %v4155_v14, %v4156_v56 }
0x12fe   :  { %v1562_v16 = vadd.f32 %v1561_v48, %v1560_v33  ;;  %v4161_v33 = vunpack.i.h.bf16 %v4159_v22  ;;  %v4160_v48 = vunpack.i.l.bf16 %v4159_v22 }
0x1300   :  { %4240 = vrcp.f32 %v1562_v16  ;;  %v1747_v37 = vsel %vm377_vm5, %v4160_v48, %v4161_v33 }
0x1301   :  { %4242 = vtanh.f32 %v1504_v29  ;;  %v4966_v13 = vpack.c.bf16 %v1747_v37, %v1746_v15 }
0x130a   :  { %v4241_v25 = vpop.eup %4240 }
0x130b   :  { %v1564_v52 = vmul.f32 %v4241_v25, %v4239_v30  ;;  %v1745_v30 = vsel %vm377_vm5, %v4150_v12, %v4151_v17  ;;  %v4243_v17 = vpop.eup %4242  ;;  %v1487_v12 = vpop.permute.xlu0 %1486 }
0x130c   :  { %v4959_v55 = vpack.c.bf16 %v1745_v30, %v1744_v24  ;;  %v1489_v30 = vpop.permute.xlu1 %1488 }
0x130d   :  { %v1566_v53 = vmul.f32 %v1564_v52, %v4790_v50  ;;  %v4962_v52 = vpack.c.bf16 %v4161_v33, %v4156_v56  ;;  %v5003_v33 = vsel %vm163_vm3, %v1487_v12, %v1489_v30 }
0x130e   :  { %v1495_v48 = vadd.f32 %v5003_v33, %v4828_v54  ;;  %v4167_v54 = vpack.i.bf16 %v4852_v45, %v4863_v51 }
0x130f   :  { %v1567_v31 = vsel %vm377_vm5, %v1566_v53, 0.0 }
0x1310   :  { %v1568_v57 = vrot.slane %v1567_v31, 4 }
0x1312   :  { %v1569_v63 = vadd.f32 %v1568_v57, %v1567_v31  ;;  %v4162_v31 = vpack.i.bf16 %v4848_v36, %v4854_v47  ;;  %v4172_v57 = vpack.i.bf16 %v4861_v49, %v4873_v61 }
0x1314   :  { %v1570_v8 = vrot.slane %v1569_v63, 2  ;;  %4163 = vrot.lane.b32.xlu1 %v4162_v31, %s4374_s26 }
0x1316   :  { %v1571_v16 = vadd.f32 %v1570_v8, %v1569_v63  ;;  %v4990_v63 = vpop.permute.xlu0 %1841  ;;  %v4993_v8 = vsel %vm163_vm3, %v1485_v11, %v1487_v12  ;;  %v4177_v11 = vpack.i.bf16 %v4871_v28, %v4881_v38 }
0x1317   :  { %v4997_v24 = vsel %vm159_vm4, %v1840_v41, %v4990_v63  ;;  %v1494_v47 = vadd.f32 %v4993_v8, %v4826_v6 }
0x1318   :  { %v1572_v25 = vrot.slane %v1571_v16, 1  ;;  %4173 = vrot.lane.b32.xlu1 %v4172_v57, %s4374_s26 }
0x131a   :  { %v1573_v53 = vadd.f32 %v1572_v25, %v1571_v16 }
0x131c   :  { %3332 = vmatmul.mubr.msk.f32.vlgmr.msra.gmra.mrb[12].mxu0 %vm377_vm5, %v1573_v53 }
0x131d   :  { %3792 = vmatpush1.bf16.msra.mxu0 %v4959_v55  ;;  %1823 = vmatprep.mubr.f32.mxu0 %v4371_v0 }
0x131e   :  { %3794 = vmatprep.subr.bf16.mxu0 %v4962_v52 }
0x1321   :  { %3796 = vmatpush1.bf16.msra.mxu0 %v4966_v13 }
0x1322   :  { %3825 = vmatprep.subr.bf16.mxu0 %v4376_v2 }
0x1324   :  { %3333 = vmatmul.mubr.msk.f32.vlgmr.msra.gmra.mrb[12].mxu0 %vm163_vm3, %v4243_v17 }
0x1325   :  { %3827 = vmatpush3.bf16.msra.mxu0 %v4788_v60  ;;  %3515 = vmatprep.mubr.msk.f32.mxu0 %vm4372_vm0, %v4371_v0 }
0x1326   :  { %3828 = vmatprep.subr.bf16.mxu0 %v4376_v2 }
0x1329   :  { %3830 = vmatpush3.bf16.msra.mxu0 %v4798_v62 }
0x132a   :  { %3831 = vmatprep.subr.bf16.mxu0 %v4376_v2 }
0x132d   :  { %3833 = vmatpush3.bf16.msra.mxu0 %v4807_v32 }
0x132e   :  { %3834 = vmatprep.subr.bf16.mxu0 %v4376_v2 }
0x1331   :  { %3836 = vmatpush3.bf16.msra.mxu0 %v4813_v35 }
0x1332   :  { %3861 = vmatprep.subr.bf16.mxu0 %v4376_v2 }
0x1386   :  { %v4164_v37 = vpop.permute.xlu1 %4163 }
0x1387   :  { %v4166_v53 = vunpack.i.h.bf16 %v4164_v37  ;;  %v4165_v17 = vunpack.i.l.bf16 %v4164_v37 }
0x1389   :  { %v5008_v31 = vpack.c.bf16 %v4166_v53, %v4165_v17 }
0x138b   :  { %3799 = vmatpush3.bf16.msra.mxu1 %v5008_v31 }
0x138c   :  { %3800 = vmatprep.subr.bf16.mxu1 %v4376_v2 }
0x13f7   :  { %v1825_v36 = vpop.f32.mrb[12].mxu0 }
0x13f8   :  { %v1846_v49 = vadd.f32 %v4997_v24, %v1825_v36  ;;  %v1827_v61 = vpop.f32.mrb[13].mxu0 }
0x13f9   :  { %v1847_v25 = vadd.f32 %v4990_v63, %v1827_v61 }
0x13fa   :  { %v1848_v29 = vadd.f32 %v1846_v49, %v1494_v47  ;;  %v4174_v49 = vpop.permute.xlu1 %4173 }
0x13fc   :  { %v3334_v56 = vmul.f32 -1.442695, %v1848_v29 }
0x13fe   :  { %4244 = vpow2.f32 %v3334_v56  ;;  %v4176_v56 = vunpack.i.h.bf16 %v4174_v49 }
0x1408   :  { %v4245_v14 = vpop.eup %4244 }
0x1409   :  { %v1852_v22 = vadd.f32 1.0, %v4245_v14  ;;  %v4175_v14 = vunpack.i.l.bf16 %v4174_v49 }
0x140b   :  { %4246 = vrcp.f32 %v1852_v22  ;;  %v5027_v22 = vpack.c.bf16 %v4176_v56, %v4175_v14 }
0x1415   :  { %v4247_v16 = vpop.eup %4246 }
0x1416   :  { %v1855_v6 = vmul.f32 %v4247_v16, %v1495_v48  ;;  %v1858_v12 = vsub.f32 1.0, %v4247_v16  ;;  %v1865_v36 = vmul.f32 %v4247_v16, %v1325_v59 }
0x1418   :  { %v1856_v15 = vadd.f32 %v1855_v6, %v1847_v25 }
0x141a   :  { %4248 = vtanh.f32 %v1856_v15 }
0x1424   :  { %v4249_v57 = vpop.eup %4248 }
0x1425   :  { %1860 = vrot.lane.b32.xlu0 %v4249_v57, %s4375_s29 }
0x1429   :  { %4168 = vrot.lane.b32.xlu0 %v4167_v54, %s4374_s26 }
0x142d   :  { %4178 = vrot.lane.b32.xlu0 %v4177_v11, %s4374_s26 }
0x1497   :  { %v1861_v41 = vpop.permute.xlu0 %1860 }
0x1498   :  { %v1863_v47 = vmul.f32 %v1861_v41, %v1858_v12 }
0x149a   :  { %v5021_v61 = vadd.f32 %v1865_v36, %v1863_v47 }
0x149b   :  { %v4169_v29 = vpop.permute.xlu0 %4168 }
0x149c   :  { %1868 = vrot.lane.b32.xlu1 %v5021_v61, %s4375_s29  ;;  %v4171_v45 = vunpack.i.h.bf16 %v4169_v29  ;;  %v4170_v51 = vunpack.i.l.bf16 %v4169_v29 }
0x149e   :  { %v5025_v28 = vpack.c.bf16 %v4171_v45, %v4170_v51 }
0x149f   :  { %v4179_v38 = vpop.permute.xlu0 %4178 }
0x14a0   :  { %3802 = vmatpush3.bf16.msra.mxu1 %v5025_v28  ;;  %v4181_v42 = vunpack.i.h.bf16 %v4179_v38  ;;  %v4180_v59 = vunpack.i.l.bf16 %v4179_v38 }
0x14a1   :  { %3803 = vmatprep.subr.bf16.mxu1 %v4376_v2 }
0x14a2   :  { %v5031_v30 = vpack.c.bf16 %v4181_v42, %v4180_v59 }
0x14a4   :  { %3805 = vmatpush3.bf16.msra.mxu1 %v5027_v22 }
0x14a5   :  { %3806 = vmatprep.subr.bf16.mxu1 %v4376_v2 }
0x14a8   :  { %3808 = vmatpush3.bf16.msra.mxu1 %v5031_v30 }
0x14a9   :  { %3810 = vmatprep.subr.bf16.mxu1 %v4718_v3 }
0x150e   :  { %v1869_v48 = vpop.permute.xlu1 %1868 }
0x150f   :  { %3497 = vmatmul.mubr.msk.f32.vlgmr.msra.gmra.mrb[12].mxu1 %vm377_vm5, %v1869_v48  ;;  %3516 = vmatmul.mubr.msk.f32.vlgmr.msra.gmra.mrb[14].mxu0 %vm377_vm5, %v1869_v48 }
0x1510   :  { %3812 = vmatpush1.bf16.msra.mxu1 %v4723_v9  ;;  %3863 = vmatpush3.bf16.msra.mxu0 %v5008_v31 }
0x1511   :  { %3814 = vmatprep.subr.bf16.mxu1 %v4729_v18  ;;  %3864 = vmatprep.subr.bf16.mxu0 %v4376_v2 }
0x1512   :  { %2033 = vmatprep.mubr.f32.mxu1 %v4371_v0  ;;  %3534 = vmatprep.mubr.msk.f32.mxu0 %vm4372_vm0, %v4371_v0 }
0x1514   :  { %3816 = vmatpush1.bf16.msra.mxu1 %v4734_v1  ;;  %3866 = vmatpush3.bf16.msra.mxu0 %v5025_v28 }
0x1515   :  { %3818 = vmatprep.subr.bf16.mxu1 %v4740_v46  ;;  %3867 = vmatprep.subr.bf16.mxu0 %v4376_v2 }
0x1518   :  { %3820 = vmatpush1.bf16.msra.mxu1 %v4745_v5  ;;  %3869 = vmatpush3.bf16.msra.mxu0 %v5027_v22 }
0x1519   :  { %3822 = vmatprep.subr.bf16.mxu1 %v4750_v40  ;;  %3870 = vmatprep.subr.bf16.mxu0 %v4376_v2 }
0x151c   :  { %3824 = vmatpush1.bf16.msra.mxu1 %v4753_v43  ;;  %3872 = vmatpush3.bf16.msra.mxu0 %v5031_v30 }
0x151d   :  { %3838 = vmatprep.subr.bf16.mxu1 %v4916_v20  ;;  %3874 = vmatprep.subr.bf16.mxu0 %v4718_v3 }
0x151f   :  { %3336 = vmatmul.mubr.msk.f32.vlgmr.msra.gmra.mrb[14].mxu1 %vm377_vm5, %v1869_v48 }
0x1520   :  { %3840 = vmatpush1.bf16.msra.mxu1 %v4919_v34  ;;  %2229 = vmatprep.mubr.f32.mxu1 %v4371_v0 }
0x1521   :  { %3842 = vmatprep.subr.bf16.mxu1 %v4924_v23 }
0x1524   :  { %3844 = vmatpush1.bf16.msra.mxu1 %v4927_v58 }
0x1525   :  { %3846 = vmatprep.subr.bf16.mxu1 %v4932_v39 }
0x1528   :  { %3848 = vmatpush1.bf16.msra.mxu1 %v4935_v44 }
0x1529   :  { %3850 = vmatprep.subr.bf16.mxu1 %v4940_v4 }
0x152c   :  { %3852 = vmatpush1.bf16.msra.mxu1 %v4945_v10 }
0x152d   :  { %3854 = vmatprep.subr.bf16.mxu1 %v4949_v26 }
0x15e2   :  { %v5068_v16 = vpop.f32.mrb[12].mxu1  ;;  %v2106_v25 = vpop.f32.mrb[14].mxu0 }
0x15e3   :  { %v3498_v6 = vpop.f32.mrb[13].mxu1  ;;  %v3517_v15 = vpop.f32.mrb[15].mxu0 }
0x15f2   :  { %v5070_v37 = vpop.f32.mrb[14].mxu1 }
0x15f3   :  { %v5072_v53 = vpop.f32.mrb[15].mxu1 }
0x15f4   :  { %v2117_v17 = vrot.slane %v5072_v53, %v4453_v19 }
0x15f6   :  { %v2118_v57 = vadd.f32 %v2117_v17, %v4837_v21 }
0x15f8   :  { %4250 = vtanh.f32 %v2118_v57 }
0x1602   :  { %v4251_v54 = vpop.eup %4250 }
0x1603   :  { %v2120_v11 = vmul.f32 %v4251_v54, %v4841_v27 }
0x1605   :  { %2128 = vrot.lane.b32.xlu1 %v2120_v11, %s4374_s26  ;;  %2122 = vrot.lane.b32.xlu0 %v2120_v11, %s4375_s29 }
0x1677   :  { %v2129_v12 = vpop.permute.xlu1 %2128  ;;  %v2123_v41 = vpop.permute.xlu0 %2122 }
0x1678   :  { %v2131_v36 = vsel %vm163_vm3, %v2129_v12, 0.0  ;;  %v2125_v47 = vsel %vm163_vm3, %v2123_v41, 0.0 }
0x1679   :  { %2132 = vadd.xlane.f32.xlu1 %v2131_v36  ;;  %2126 = vadd.xlane.f32.xlu0 %v2125_v47 }
0x1706   :  { %v2133_v49 = vpop.xlane.xlu1 %2132  ;;  %v2127_v29 = vpop.xlane.xlu0 %2126 }
0x1707   :  { %v2134_v45 = vsel %vm163_vm3, %v2127_v29, %v2133_v49 }
0x1708   :  { %v2135_v51 = vsel %vm377_vm5, %v2134_v45, -inf }
0x1709   :  { %v2136_v56 = vrot.slane %v2135_v51, 4 }
0x170b   :  { %v2137_v14 = vmax.f32 %v2135_v51, %v2136_v56 }
0x170d   :  { %v2138_v38 = vrot.slane %v2137_v14, 2 }
0x170f   :  { %v2139_v42 = vmax.f32 %v2137_v14, %v2138_v38 }
0x1711   :  { %v2140_v59 = vrot.slane %v2139_v42, 1 }
0x1713   :  { %v2141_v48 = vmax.f32 %v2139_v42, %v2140_v59  ;;  %v2112_v42 = vadd.f32 %v2106_v25, %v4943_v7 }
0x1715   :  { %v2142_v6 = vsub.f32 %v2134_v45, %v2141_v48 }
0x1717   :  { %v2143_v15 = vmul.f32 1.442695, %v2142_v6 }
0x1719   :  { %4252 = vpow2.f32 %v2143_v15 }
0x1723   :  { %v4253_v17 = vpop.eup %4252 }
0x1724   :  { %v2145_v57 = vsel %vm377_vm5, %v4253_v17, 0.0 }
0x1725   :  { %v2146_v54 = vrot.slane %v2145_v57, 4 }
0x1727   :  { %v2147_v11 = vadd.f32 %v2146_v54, %v2145_v57 }
0x1729   :  { %v2148_v12 = vrot.slane %v2147_v11, 2 }
0x172b   :  { %v2149_v41 = vadd.f32 %v2148_v12, %v2147_v11 }
0x172d   :  { %v2150_v36 = vrot.slane %v2149_v41, 1 }
0x172f   :  { %v2151_v47 = vadd.f32 %v2150_v36, %v2149_v41 }
0x1731   :  { %4254 = vrcp.f32 %v2151_v47  ;;  %v2111_v47 = vadd.f32 %v5072_v53, %v5003_v33 }
0x1732   :  { %4256 = vtanh.f32 %v2112_v42 }
0x173b   :  { %v4255_v49 = vpop.eup %4254 }
0x173c   :  { %v2153_v29 = vmul.f32 %v4255_v49, %v4253_v17  ;;  %v4257_v15 = vpop.eup %4256  ;;  %v2110_v17 = vadd.f32 %v5070_v37, %v4993_v8 }
0x173e   :  { %v2154_v51 = vmul.f32 %v2153_v29, %v4790_v50 }
0x1740   :  { %v2155_v56 = vsel %vm377_vm5, %v2154_v51, 0.0 }
0x1741   :  { %v2156_v14 = vrot.slane %v2155_v56, 4 }
0x1743   :  { %v2157_v45 = vadd.f32 %v2156_v14, %v2155_v56 }
0x1745   :  { %v2158_v38 = vrot.slane %v2157_v45, 2 }
0x1747   :  { %v2159_v59 = vadd.f32 %v2158_v38, %v2157_v45 }
0x1749   :  { %v2160_v48 = vrot.slane %v2159_v59, 1 }
0x174b   :  { %v2161_v6 = vadd.f32 %v2160_v48, %v2159_v59 }
0x174d   :  { %3338 = vmatmul.mubr.msk.f32.vlgmr.msra.gmra.mrb[16].mxu1 %vm377_vm5, %v2161_v6 }
0x174e   :  { %3856 = vmatpush1.bf16.msra.mxu1 %v4959_v55  ;;  %2303 = vmatprep.mubr.f32.mxu1 %v4371_v0 }
0x174f   :  { %3858 = vmatprep.subr.bf16.mxu1 %v4962_v52 }
0x1752   :  { %3860 = vmatpush1.bf16.msra.mxu1 %v4966_v13 }
0x1753   :  { %3889 = vmatprep.subr.bf16.mxu1 %v4376_v2 }
0x1755   :  { %3339 = vmatmul.mubr.msk.f32.vlgmr.msra.gmra.mrb[16].mxu1 %vm163_vm3, %v4257_v15 }
0x1756   :  { %3891 = vmatpush3.bf16.msra.mxu1 %v4788_v60  ;;  %3553 = vmatprep.mubr.msk.f32.mxu1 %vm4372_vm0, %v4371_v0 }
0x1757   :  { %3892 = vmatprep.subr.bf16.mxu1 %v4376_v2 }
0x175a   :  { %3894 = vmatpush3.bf16.msra.mxu1 %v4798_v62 }
0x175b   :  { %3895 = vmatprep.subr.bf16.mxu1 %v4376_v2 }
0x175e   :  { %3897 = vmatpush3.bf16.msra.mxu1 %v4807_v32 }
0x175f   :  { %3898 = vmatprep.subr.bf16.mxu1 %v4376_v2 }
0x1762   :  { %3900 = vmatpush3.bf16.msra.mxu1 %v4813_v35 }
0x1763   :  { %3925 = vmatprep.subr.bf16.mxu1 %v4376_v2 }
0x1828   :  { %v2305_v25 = vpop.f32.mrb[16].mxu1 }
0x1829   :  { %v2310_v57 = vadd.f32 %v2305_v25, %v4997_v24  ;;  %v2307_v54 = vpop.f32.mrb[17].mxu1 }
0x182a   :  { %v2311_v29 = vadd.f32 %v2307_v54, %v4990_v63 }
0x182b   :  { %v2312_v11 = vadd.f32 %v2310_v57, %v2110_v17 }
0x182d   :  { %v3340_v12 = vmul.f32 -1.442695, %v2312_v11 }
0x182f   :  { %4258 = vpow2.f32 %v3340_v12 }
0x1839   :  { %v4259_v41 = vpop.eup %4258 }
0x183a   :  { %v2316_v36 = vadd.f32 1.0, %v4259_v41 }
0x183c   :  { %4260 = vrcp.f32 %v2316_v36 }
0x1846   :  { %v4261_v49 = vpop.eup %4260 }
0x1847   :  { %v2319_v51 = vmul.f32 %v4261_v49, %v2111_v47  ;;  %v2322_v37 = vsub.f32 1.0, %v4261_v49  ;;  %v2328_v38 = vmul.f32 %v4261_v49, %v5021_v61 }
0x1849   :  { %v2320_v56 = vadd.f32 %v2319_v51, %v2311_v29 }
0x184b   :  { %4262 = vtanh.f32 %v2320_v56 }
0x1855   :  { %v4263_v14 = vpop.eup %4262 }
0x1856   :  { %2324 = vrot.lane.b32.xlu0 %v4263_v14, %s4375_s29 }
0x18c8   :  { %v2325_v45 = vpop.permute.xlu0 %2324 }
0x18c9   :  { %v2327_v42 = vmul.f32 %v2325_v45, %v2322_v37 }
0x18cb   :  { %v5113_v59 = vadd.f32 %v2328_v38, %v2327_v42 }
0x18cd   :  { %2331 = vrot.lane.b32.xlu1 %v5113_v59, %s4375_s29 }
0x193f   :  { %v2332_v53 = vpop.permute.xlu1 %2331 }
0x1940   :  { %3535 = vmatmul.mubr.msk.f32.vlgmr.msra.gmra.mrb[16].mxu0 %vm377_vm5, %v2332_v53  ;;  %3554 = vmatmul.mubr.msk.f32.vlgmr.msra.gmra.mrb[18].mxu1 %vm377_vm5, %v2332_v53 }
0x1941   :  { %3876 = vmatpush1.bf16.msra.mxu0 %v4723_v9  ;;  %3927 = vmatpush3.bf16.msra.mxu1 %v5008_v31 }
0x1942   :  { %3878 = vmatprep.subr.bf16.mxu0 %v4729_v18  ;;  %3928 = vmatprep.subr.bf16.mxu1 %v4376_v2 }
0x1943   :  { %2469 = vmatprep.mubr.f32.mxu0 %v4371_v0  ;;  %3572 = vmatprep.mubr.msk.f32.mxu1 %vm4372_vm0, %v4371_v0 }
0x1945   :  { %3880 = vmatpush1.bf16.msra.mxu0 %v4734_v1  ;;  %3930 = vmatpush3.bf16.msra.mxu1 %v5025_v28 }
0x1946   :  { %3882 = vmatprep.subr.bf16.mxu0 %v4740_v46  ;;  %3931 = vmatprep.subr.bf16.mxu1 %v4376_v2 }
0x1949   :  { %3884 = vmatpush1.bf16.msra.mxu0 %v4745_v5  ;;  %3933 = vmatpush3.bf16.msra.mxu1 %v5027_v22 }
0x194a   :  { %3886 = vmatprep.subr.bf16.mxu0 %v4750_v40  ;;  %3934 = vmatprep.subr.bf16.mxu1 %v4376_v2 }
0x194d   :  { %3888 = vmatpush1.bf16.msra.mxu0 %v4753_v43  ;;  %3936 = vmatpush3.bf16.msra.mxu1 %v5031_v30 }
0x194e   :  { %3902 = vmatprep.subr.bf16.mxu0 %v4916_v20  ;;  %3938 = vmatprep.subr.bf16.mxu1 %v4718_v3 }
0x1950   :  { %3342 = vmatmul.mubr.msk.f32.vlgmr.msra.gmra.mrb[18].mxu0 %vm377_vm5, %v2332_v53 }
0x1951   :  { %3904 = vmatpush1.bf16.msra.mxu0 %v4919_v34  ;;  %2665 = vmatprep.mubr.f32.mxu0 %v4371_v0 }
0x1952   :  { %3906 = vmatprep.subr.bf16.mxu0 %v4924_v23 }
0x1955   :  { %3908 = vmatpush1.bf16.msra.mxu0 %v4927_v58 }
0x1956   :  { %3910 = vmatprep.subr.bf16.mxu0 %v4932_v39 }
0x1959   :  { %3912 = vmatpush1.bf16.msra.mxu0 %v4935_v44 }
0x195a   :  { %3914 = vmatprep.subr.bf16.mxu0 %v4940_v4 }
0x195d   :  { %3916 = vmatpush1.bf16.msra.mxu0 %v4945_v10 }
0x195e   :  { %3918 = vmatprep.subr.bf16.mxu0 %v4949_v26 }
0x1a13   :  { %v5148_v3 = vpop.f32.mrb[16].mxu0  ;;  %v2542_v61 = vpop.f32.mrb[18].mxu1 }
0x1a14   :  { %v3536_v48 = vpop.f32.mrb[17].mxu0  ;;  %v3555_v6 = vpop.f32.mrb[19].mxu1 }
0x1a23   :  { %v5150_v15 = vpop.f32.mrb[18].mxu0 }
0x1a24   :  { %v5152_v25 = vpop.f32.mrb[19].mxu0 }
0x1a25   :  { %v2553_v17 = vrot.slane %v5152_v25, %v4453_v19 }
0x1a27   :  { %v2554_v57 = vadd.f32 %v2553_v17, %v4837_v21 }
0x1a29   :  { %4264 = vtanh.f32 %v2554_v57 }
0x1a33   :  { %v4265_v54 = vpop.eup %4264 }
0x1a34   :  { %v2556_v11 = vmul.f32 %v4265_v54, %v4841_v27 }
0x1a36   :  { %2564 = vrot.lane.b32.xlu1 %v2556_v11, %s4374_s26  ;;  %2558 = vrot.lane.b32.xlu0 %v2556_v11, %s4375_s29 }
0x1aa8   :  { %v2565_v12 = vpop.permute.xlu1 %2564  ;;  %v2559_v41 = vpop.permute.xlu0 %2558 }
0x1aa9   :  { %v2567_v36 = vsel %vm163_vm3, %v2565_v12, 0.0  ;;  %v2561_v47 = vsel %vm163_vm3, %v2559_v41, 0.0 }
0x1aaa   :  { %2568 = vadd.xlane.f32.xlu1 %v2567_v36  ;;  %2562 = vadd.xlane.f32.xlu0 %v2561_v47 }
0x1b37   :  { %v2569_v49 = vpop.xlane.xlu1 %2568  ;;  %v2563_v29 = vpop.xlane.xlu0 %2562 }
0x1b38   :  { %v2570_v51 = vsel %vm163_vm3, %v2563_v29, %v2569_v49 }
0x1b39   :  { %v2571_v56 = vsel %vm377_vm5, %v2570_v51, -inf }
0x1b3a   :  { %v2572_v14 = vrot.slane %v2571_v56, 4 }
0x1b3c   :  { %v2573_v37 = vmax.f32 %v2571_v56, %v2572_v14 }
0x1b3e   :  { %v2574_v45 = vrot.slane %v2573_v37, 2 }
0x1b40   :  { %v2575_v38 = vmax.f32 %v2573_v37, %v2574_v45 }
0x1b42   :  { %v2576_v42 = vrot.slane %v2575_v38, 1 }
0x1b44   :  { %v2577_v53 = vmax.f32 %v2575_v38, %v2576_v42  ;;  %v2548_v38 = vadd.f32 %v2542_v61, %v4943_v7 }
0x1b46   :  { %v2578_v48 = vsub.f32 %v2570_v51, %v2577_v53 }
0x1b48   :  { %v2579_v6 = vmul.f32 1.442695, %v2578_v48 }
0x1b4a   :  { %4266 = vpow2.f32 %v2579_v6 }
0x1b54   :  { %v4267_v17 = vpop.eup %4266 }
0x1b55   :  { %v2581_v57 = vsel %vm377_vm5, %v4267_v17, 0.0 }
0x1b56   :  { %v2582_v54 = vrot.slane %v2581_v57, 4 }
0x1b58   :  { %v2583_v11 = vadd.f32 %v2582_v54, %v2581_v57 }
0x1b5a   :  { %v2584_v12 = vrot.slane %v2583_v11, 2 }
0x1b5c   :  { %v2585_v41 = vadd.f32 %v2584_v12, %v2583_v11 }
0x1b5e   :  { %v2586_v36 = vrot.slane %v2585_v41, 1 }
0x1b60   :  { %v2587_v47 = vadd.f32 %v2586_v36, %v2585_v41 }
0x1b62   :  { %4268 = vrcp.f32 %v2587_v47 }
0x1b63   :  { %4270 = vtanh.f32 %v2548_v38 }
0x1b6c   :  { %v4269_v49 = vpop.eup %4268 }
0x1b6d   :  { %v2589_v29 = vmul.f32 %v4269_v49, %v4267_v17  ;;  %v4271_v6 = vpop.eup %4270 }
0x1b6f   :  { %v2590_v56 = vmul.f32 %v2589_v29, %v4790_v50 }
0x1b71   :  { %v2591_v14 = vsel %vm377_vm5, %v2590_v56, 0.0 }
0x1b72   :  { %v2592_v37 = vrot.slane %v2591_v14, 4 }
0x1b74   :  { %v2593_v51 = vadd.f32 %v2592_v37, %v2591_v14 }
0x1b76   :  { %v2594_v45 = vrot.slane %v2593_v51, 2 }
0x1b78   :  { %v2595_v42 = vadd.f32 %v2594_v45, %v2593_v51 }
0x1b7a   :  { %v2596_v53 = vrot.slane %v2595_v42, 1 }
0x1b7c   :  { %v2597_v48 = vadd.f32 %v2596_v53, %v2595_v42 }
0x1b7e   :  { %3344 = vmatmul.mubr.msk.f32.vlgmr.msra.gmra.mrb[20].mxu0 %vm377_vm5, %v2597_v48 }
0x1b7f   :  { %3920 = vmatpush1.bf16.msra.mxu0 %v4959_v55  ;;  %2739 = vmatprep.mubr.f32.mxu0 %v4371_v0 }
0x1b80   :  { %3922 = vmatprep.subr.bf16.mxu0 %v4962_v52 }
0x1b83   :  { %3924 = vmatpush1.bf16.msra.mxu0 %v4966_v13 }
0x1b84   :  { %3953 = vmatprep.subr.bf16.mxu0 %v4376_v2 }
0x1b86   :  { %3345 = vmatmul.mubr.msk.f32.vlgmr.msra.gmra.mrb[20].mxu0 %vm163_vm3, %v4271_v6 }
0x1b87   :  { %3955 = vmatpush3.bf16.msra.mxu0 %v4788_v60  ;;  %3591 = vmatprep.mubr.msk.f32.mxu0 %vm4372_vm0, %v4371_v0  ;;  %v2546_v60 = vadd.f32 %v5150_v15, %v4993_v8 }
0x1b88   :  { %3956 = vmatprep.subr.bf16.mxu0 %v4376_v2 }
0x1b8b   :  { %3958 = vmatpush3.bf16.msra.mxu0 %v4798_v62 }
0x1b8c   :  { %3959 = vmatprep.subr.bf16.mxu0 %v4376_v2 }
0x1b8f   :  { %3961 = vmatpush3.bf16.msra.mxu0 %v4807_v32  ;;  %v2547_v32 = vadd.f32 %v5152_v25, %v5003_v33 }
0x1b90   :  { %3962 = vmatprep.subr.bf16.mxu0 %v4376_v2 }
0x1b93   :  { %3964 = vmatpush3.bf16.msra.mxu0 %v4813_v35 }
0x1b94   :  { %3989 = vmatprep.subr.bf16.mxu0 %v4376_v2 }
0x1c59   :  { %v2741_v61 = vpop.f32.mrb[20].mxu0 }
0x1c5a   :  { %v2746_v17 = vadd.f32 %v2741_v61, %v4997_v24  ;;  %v2743_v57 = vpop.f32.mrb[21].mxu0 }
0x1c5b   :  { %v2747_v35 = vadd.f32 %v2743_v57, %v4990_v63 }
0x1c5c   :  { %v2748_v54 = vadd.f32 %v2746_v17, %v2546_v60 }
0x1c5e   :  { %v3346_v11 = vmul.f32 -1.442695, %v2748_v54 }
0x1c60   :  { %4272 = vpow2.f32 %v3346_v11 }
0x1c6a   :  { %v4273_v62 = vpop.eup %4272 }
0x1c6b   :  { %v2752_v12 = vadd.f32 1.0, %v4273_v62 }
0x1c6d   :  { %4274 = vrcp.f32 %v2752_v12 }
0x1c77   :  { %v4275_v41 = vpop.eup %4274 }
0x1c78   :  { %v2755_v36 = vmul.f32 %v4275_v41, %v2547_v32  ;;  %v2758_v15 = vsub.f32 1.0, %v4275_v41  ;;  %v2764_v56 = vmul.f32 %v4275_v41, %v5113_v59 }
0x1c7a   :  { %v2756_v47 = vadd.f32 %v2755_v36, %v2747_v35 }
0x1c7c   :  { %4276 = vtanh.f32 %v2756_v47 }
0x1c86   :  { %v4277_v49 = vpop.eup %4276 }
0x1c87   :  { %2760 = vrot.lane.b32.xlu0 %v4277_v49, %s4375_s29 }
0x1cf9   :  { %v2761_v29 = vpop.permute.xlu0 %2760 }
0x1cfa   :  { %v2763_v14 = vmul.f32 %v2761_v29, %v2758_v15 }
0x1cfc   :  { %v5193_v37 = vadd.f32 %v2764_v56, %v2763_v14 }
0x1cfe   :  { %2767 = vrot.lane.b32.xlu1 %v5193_v37, %s4375_s29 }
0x1d70   :  { %v2768_v25 = vpop.permute.xlu1 %2767 }
0x1d71   :  { %3573 = vmatmul.mubr.msk.f32.vlgmr.msra.gmra.mrb[20].mxu1 %vm377_vm5, %v2768_v25  ;;  %3592 = vmatmul.mubr.msk.f32.vlgmr.msra.gmra.mrb[22].mxu0 %vm377_vm5, %v2768_v25 }
0x1d72   :  { %3940 = vmatpush1.bf16.msra.mxu1 %v4723_v9  ;;  %3991 = vmatpush3.bf16.msra.mxu0 %v5008_v31 }
0x1d73   :  { %3942 = vmatprep.subr.bf16.mxu1 %v4729_v18  ;;  %3992 = vmatprep.subr.bf16.mxu0 %v4376_v2 }
0x1d74   :  { %2905 = vmatprep.mubr.f32.mxu1 %v4371_v0  ;;  %3610 = vmatprep.mubr.msk.f32.mxu0 %vm4372_vm0, %v4371_v0 }
0x1d76   :  { %3944 = vmatpush1.bf16.msra.mxu1 %v4734_v1  ;;  %3994 = vmatpush3.bf16.msra.mxu0 %v5025_v28 }
0x1d77   :  { %3946 = vmatprep.subr.bf16.mxu1 %v4740_v46  ;;  %3995 = vmatprep.subr.bf16.mxu0 %v4376_v2 }
0x1d7a   :  { %3948 = vmatpush1.bf16.msra.mxu1 %v4745_v5  ;;  %3997 = vmatpush3.bf16.msra.mxu0 %v5027_v22 }
0x1d7b   :  { %3950 = vmatprep.subr.bf16.mxu1 %v4750_v40  ;;  %3998 = vmatprep.subr.bf16.mxu0 %v4376_v2 }
0x1d7e   :  { %3952 = vmatpush1.bf16.msra.mxu1 %v4753_v43  ;;  %4000 = vmatpush3.bf16.msra.mxu0 %v5031_v30 }
0x1d7f   :  { %3966 = vmatprep.subr.bf16.mxu1 %v4916_v20 }
0x1d81   :  { %3348 = vmatmul.mubr.msk.f32.vlgmr.msra.gmra.mrb[22].mxu1 %vm377_vm5, %v2768_v25 }
0x1d82   :  { %3968 = vmatpush1.bf16.msra.mxu1 %v4919_v34  ;;  %3101 = vmatprep.mubr.f32.mxu1 %v4371_v0 }
0x1d83   :  { %3970 = vmatprep.subr.bf16.mxu1 %v4924_v23 }
0x1d86   :  { %3972 = vmatpush1.bf16.msra.mxu1 %v4927_v58 }
0x1d87   :  { %3974 = vmatprep.subr.bf16.mxu1 %v4932_v39 }
0x1d8a   :  { %3976 = vmatpush1.bf16.msra.mxu1 %v4935_v44 }
0x1d8b   :  { %3978 = vmatprep.subr.bf16.mxu1 %v4940_v4 }
0x1d8e   :  { %3980 = vmatpush1.bf16.msra.mxu1 %v4945_v10 }
0x1d8f   :  { %3982 = vmatprep.subr.bf16.mxu1 %v4949_v26 }
0x1e44   :  { %v5227_v2 = vpop.f32.mrb[20].mxu1  ;;  %v2978_v9 = vpop.f32.mrb[22].mxu0 }
0x1e45   :  { %v3574_v18 = vpop.f32.mrb[21].mxu1  ;;  %v3593_v1 = vpop.f32.mrb[23].mxu0  ;;  %v2984_v41 = vadd.f32 %v2978_v9, %v4943_v7 }
0x1e54   :  { %v2907_v46 = vpop.f32.mrb[22].mxu1 }
0x1e55   :  { %v5229_v5 = vpop.f32.mrb[23].mxu1  ;;  %v2982_v7 = vadd.f32 %v2907_v46, %v4993_v8  ;;  %v4292_v8 = vld [vmem:[%s5286_s4 + $0x7] ss:$0 sm:$0xff]  ;;  %s4377_s4 = smov [#allocation7]  }
0x1e56   :  { %v2989_v40 = vrot.slane %v5229_v5, %v4453_v19  ;;  %s3297_s2 = sshll.u32 %s4377_s4, 4  ;;  %s3298_s2 = int_to_ptr.vmem [resolvable:$true] %s3297_s2 }
0x1e57   :  { %s4337_s17 = scalar_lea.vmem %s3298_s2, 64  ;;  %p4342_p3 = scmp.lt.s32.totalorder %s3298_s2, %s3298_s2 }
0x1e58   :  { %v2990_v43 = vadd.f32 %v2989_v40, %v4837_v21  ;;  %p4338_p2 = scmp.ne.s32.totalorder %s3298_s2, %s4337_s17  ;;  %p4343_p4 = scmp.lt.s32.totalorder %s4337_s17, %s4337_s17 }
0x1e5a   :  { %4278 = vtanh.f32 %v2990_v43  ;;  %p4344_p5 = por %p4343_p4, %p4342_p3 }
0x1e5c   :  { %p4345_p6 = pnand %p4344_p5, %p4338_p2 }
0x1e64   :  { %v4279_v20 = vpop.eup %4278 }
0x1e65   :  { %v2992_v34 = vmul.f32 %v4279_v20, %v4841_v27 }
0x1e67   :  { %3000 = vrot.lane.b32.xlu1 %v2992_v34, %s4374_s26  ;;  %2994 = vrot.lane.b32.xlu0 %v2992_v34, %s4375_s29 }
0x1ed9   :  { %v3001_v23 = vpop.permute.xlu1 %3000  ;;  %v2995_v58 = vpop.permute.xlu0 %2994 }
0x1eda   :  { %v3003_v39 = vsel %vm163_vm3, %v3001_v23, 0.0  ;;  %v2997_v44 = vsel %vm163_vm3, %v2995_v58, 0.0 }
0x1edb   :  { %3004 = vadd.xlane.f32.xlu1 %v3003_v39  ;;  %2998 = vadd.xlane.f32.xlu0 %v2997_v44 }
0x1f68   :  { %v3005_v4 = vpop.xlane.xlu1 %3004  ;;  %v2999_v19 = vpop.xlane.xlu0 %2998 }
0x1f69   :  { %v3006_v21 = vsel %vm163_vm3, %v2999_v19, %v3005_v4 }
0x1f6a   :  { %v3007_v10 = vsel %vm377_vm5, %v3006_v21, -inf }
0x1f6b   :  { %v3008_v26 = vrot.slane %v3007_v10, 4 }
0x1f6d   :  { %v3009_v27 = vmax.f32 %v3007_v10, %v3008_v26 }
0x1f6f   :  { %v3010_v31 = vrot.slane %v3009_v27, 2 }
0x1f71   :  { %v3011_v28 = vmax.f32 %v3009_v27, %v3010_v31 }
0x1f73   :  { %v3012_v22 = vrot.slane %v3011_v28, 1 }
0x1f75   :  { %v3013_v30 = vmax.f32 %v3011_v28, %v3012_v22 }
0x1f77   :  { %v3014_v59 = vsub.f32 %v3006_v21, %v3013_v30 }
0x1f79   :  { %v3015_v51 = vmul.f32 1.442695, %v3014_v59 }
0x1f7b   :  { %4280 = vpow2.f32 %v3015_v51 }
0x1f85   :  { %v4281_v45 = vpop.eup %4280 }
0x1f86   :  { %v3017_v38 = vsel %vm377_vm5, %v4281_v45, 0.0 }
0x1f87   :  { %v3018_v42 = vrot.slane %v3017_v38, 4 }
0x1f89   :  { %v3019_v53 = vadd.f32 %v3018_v42, %v3017_v38 }
0x1f8b   :  { %v3020_v48 = vrot.slane %v3019_v53, 2 }
0x1f8d   :  { %v3021_v6 = vadd.f32 %v3020_v48, %v3019_v53 }
0x1f8f   :  { %v3022_v61 = vrot.slane %v3021_v6, 1 }
0x1f91   :  { %v3023_v60 = vadd.f32 %v3022_v61, %v3021_v6 }
0x1f93   :  { %4282 = vrcp.f32 %v3023_v60 }
0x1f94   :  { %4284 = vtanh.f32 %v2984_v41 }
0x1f9d   :  { %v4283_v17 = vpop.eup %4282 }
0x1f9e   :  { %v3025_v57 = vmul.f32 %v4283_v17, %v4281_v45 }
0x1fa0   :  { %v3026_v54 = vmul.f32 %v3025_v57, %v4790_v50  ;;  %v4285_v50 = vpop.eup %4284 }
0x1fa2   :  { %v3027_v11 = vsel %vm377_vm5, %v3026_v54, 0.0 }
0x1fa3   :  { %v3028_v62 = vrot.slane %v3027_v11, 4 }
0x1fa5   :  { %v3029_v12 = vadd.f32 %v3028_v62, %v3027_v11 }
0x1fa7   :  { %v3030_v32 = vrot.slane %v3029_v12, 2 }
0x1fa9   :  { %v3031_v35 = vadd.f32 %v3030_v32, %v3029_v12 }
0x1fab   :  { %v3032_v36 = vrot.slane %v3031_v35, 1 }
0x1fad   :  { %v3033_v47 = vadd.f32 %v3032_v36, %v3031_v35 }
0x1faf   :  { %3350 = vmatmul.mubr.msk.f32.vlgmr.msra.gmra.mrb[24].mxu1 %vm377_vm5, %v3033_v47 }
0x1fb0   :  { %3984 = vmatpush1.bf16.msra.mxu1 %v4959_v55  ;;  %3175 = vmatprep.mubr.f32.mxu1 %v4371_v0  ;;  %v2983_v0 = vadd.f32 %v5229_v5, %v5003_v33 }
0x1fb1   :  { %3986 = vmatprep.subr.bf16.mxu1 %v4962_v52 }
0x1fb4   :  { %3988 = vmatpush1.bf16.msra.mxu1 %v4966_v13 }
0x1fb7   :  { %3351 = vmatmul.mubr.msk.f32.vlgmr.msra.gmra.mrb[24].mxu1 %vm163_vm3, %v4285_v50 }
0x208a   :  { %v3177_v49 = vpop.f32.mrb[24].mxu1 }
0x208b   :  { %v3182_v15 = vadd.f32 %v3177_v49, %v4997_v24  ;;  %v3179_v29 = vpop.f32.mrb[25].mxu1 }
0x208c   :  { %v3183_v13 = vadd.f32 %v3179_v29, %v4990_v63 }
0x208d   :  { %v3184_v56 = vadd.f32 %v3182_v15, %v2982_v7 }
0x208f   :  { %v3352_v14 = vmul.f32 -1.442695, %v3184_v56 }
0x2091   :  { %4286 = vpow2.f32 %v3352_v14 }
0x209b   :  { %v4287_v25 = vpop.eup %4286 }
0x209c   :  { %v3188_v55 = vadd.f32 1.0, %v4287_v25 }
0x209e   :  { %4288 = vrcp.f32 %v3188_v55 }
0x20a8   :  { %v4289_v52 = vpop.eup %4288 }
0x20a9   :  { %v3191_v9 = vmul.f32 %v4289_v52, %v2983_v0  ;;  %v3194_v24 = vsub.f32 1.0, %v4289_v52  ;;  %v3200_v40 = vmul.f32 %v4289_v52, %v5193_v37 }
0x20ab   :  { %v3192_v18 = vadd.f32 %v3191_v9, %v3183_v13 }
0x20ad   :  { %4290 = vtanh.f32 %v3192_v18 }
0x20b7   :  { %v4291_v1 = vpop.eup %4290 }
0x20b8   :  { %3196 = vrot.lane.b32.xlu0 %v4291_v1, %s4375_s29 }
0x20bc   :  { %1894 = vrot.lane.b32.xlu0 %v4292_v8, %s4375_s29 }
0x212a   :  { %v3197_v46 = vpop.permute.xlu0 %3196 }
0x212b   :  { %v3199_v33 = vmul.f32 %v3197_v46, %v3194_v24 }
0x212d   :  { %v3201_v5 = vadd.f32 %v3200_v40, %v3199_v33 }
0x212e   :  { %v1895_v43 = vpop.permute.xlu0 %1894 }
0x212f   :  { %v2402_v63 = vadd.f32 %v5148_v3, %v1895_v43  ;;  %v2838_v20 = vadd.f32 %v5227_v2, %v1895_v43  ;;  %3203 = vrot.lane.b32.xlu1 %v3201_v5, %s4375_s29  ;;  %v1966_v34 = vadd.f32 %v5068_v16, %v1895_v43 }
0x2131   :  { %v3278_v23 = vrot.slane %v2402_v63, 7  ;;  %v3281_v58 = vrot.slane %v2838_v20, 6 }
0x2133   :  { %v3286_v39 = vsel %vm1095_vm6, %v1966_v34, %v3278_v23 }
0x2134   :  { %v3287_v44 = vsel %vm1097_vm7, %v3286_v39, %v3281_v58 }
0x21a1   :  { %v3204_v4 = vpop.permute.xlu1 %3203 }
0x21a2   :  { %3611 = vmatmul.mubr.msk.f32.vlgmr.msra.gmra.mrb[24].mxu0 %vm377_vm5, %v3204_v4 }
0x2275   :  { %v3273_v37 = vpop.f32.mrb[24].mxu0 }
0x2276   :  { %v3274_v19 = vadd.f32 %v3273_v37, %v1895_v43  ;;  %v3612_v21 = vpop.f32.mrb[25].mxu0 }
0x2278   :  { %v3284_v3 = vrot.slane %v3274_v19, 5 }
0x227a   :  { %v3288_v2 = vsel %vm1099_vm8, %v3287_v44, %v3284_v3 }
0x227b   :  { %3290 = vst.msk [vmem:[#allocation7] sm:$0xf] %vm3289_vm12, %v3288_v2 }
0x227c   :  { %4348 = shalt.err (!%p4345_p6)
}
0x227d   :  { %s4349_s20 = scalar_lea.hbm %s5287_s5, 64 }
0x227e   :  { %p4350_p7 = scmp.ne.s32.totalorder %s5287_s5, %s4349_s20  ;;  %p4353_p8 = scmp.lt.u32.totalorder %s4349_s20, %s5287_s5 }
0x2280   :  { %p4355_p9 = pnand %p4353_p8, %p4350_p7 }
0x2282   :  { %4358 = shalt.err (!%p4355_p9)
}
0x2283   :  { %3300 = dma.vmem_to_hbm [thread:$0]  %s3298_s2, 64, %s5287_s5, [#allocation4]  }
0x2284   :  { %4363 = dma.done.wait [#allocation4], 64  }
0x2285   :  { %4364 = vsyncadd [#allocation4], 4294967232 }
0x2286   :  { %3304 = vsyncpa [#allocation3], 1 }
0x2287   :  { %3305 = vsyncpa [#allocation6], 1 }
0x2288   :  { %3306 = vsyncpa [#allocation4], 1 }

</bundles_post_ra>
